<compile_context>
chip_gen: v6e
topology: v6e:2x2x1
jax: 0.10.0
libtpu: 0.0.40
codegen_flags: <defaults>
</compile_context>

<pallas_src>
import math
import jax
import jax.numpy as jnp
from jax.experimental import pallas as pl
from jax.experimental.pallas import tpu as pltpu

_LANES = 128


# ----------------------------------------------------------------------------
# Fully fused kernel: encoder (2x ISAB) on x1 and x2, PMA MAB, final Linear
# ----------------------------------------------------------------------------
def _make_fused_kernel(layout, num_heads):
    """layout: name -> (row_offset, rows, cols) into the (R, 128) weight slab."""

    def kernel(x1_ref, x2_ref, w_ref, o_ref):
        def rd(name, full_lanes=False):
            off, rows, cols = layout[name]
            if full_lanes:
                return w_ref[off:off + rows, :]
            return w_ref[off:off + rows, :cols]

        def mab(q, k, prefix):
            """MAB(Q, K) matching the torch Set Transformer math.

            q: (Nq, dQ), k: (Nk, dK); params read from the weight slab.
            """
            Wq, bq = rd(prefix + "Wq"), rd(prefix + "bq")
            Wkv, bkv = rd(prefix + "Wkv"), rd(prefix + "bkv")
            Wo, bo = rd(prefix + "Wo"), rd(prefix + "bo")
            dV = Wq.shape[1]
            dh = dV // num_heads
            scale = 1.0 / math.sqrt(dV)        # torch scales by sqrt(dim_V)

            Qp = jnp.dot(q, Wq, preferred_element_type=jnp.float32) + bq    # (Nq, dV)
            KV = jnp.dot(k, Wkv, preferred_element_type=jnp.float32) + bkv  # (Nk, 2dV)
            Kp, Vp = KV[:, :dV], KV[:, dV:]

            # Heads via static lane slices (known-good lowering at dh=8; a
            # merged (Nq, H, Nk) softmax risks a relayout for Nk < 128).
            outs = []
            for h in range(num_heads):
                sl = slice(h * dh, (h + 1) * dh)
                Qh, Kh, Vh = Qp[:, sl], Kp[:, sl], Vp[:, sl]
                s = jnp.dot(Qh, Kh.T, preferred_element_type=jnp.float32) * scale
                s = s - jnp.max(s, axis=-1, keepdims=True)
                e = jnp.exp(s)
                w = e * pl.reciprocal(jnp.sum(e, axis=-1, keepdims=True),
                                      approx=False)
                outs.append(Qh + jnp.dot(w, Vh, preferred_element_type=jnp.float32))
            O = jnp.concatenate(outs, axis=-1)                               # (Nq, dV)
            ff = jnp.dot(O, Wo, preferred_element_type=jnp.float32) + bo
            return O + jnp.maximum(ff, 0.0)

        def isab(x, prefix):
            h = mab(rd(prefix + "I"), x, prefix + "m0_")
            return mab(x, h, prefix + "m1_")

        def encode(x):
            return isab(isab(x, "e0_"), "e1_")

        z1 = encode(x1_ref[0])                   # (N, P)
        z2 = encode(x2_ref[0])                   # (N, P)
        z = jnp.concatenate([z1, z2], axis=0)    # (2N, P), stays in VMEM/vregs

        o = mab(rd("pma_S"), z, "pma_m_")        # (num_seeds, P)
        Wl = rd("lin_W", full_lanes=True)        # (P, 128), zero-padded cols
        bl = rd("lin_b", full_lanes=True)        # (1, 128)
        res = jnp.dot(o, Wl, preferred_element_type=jnp.float32) + bl
        o_ref[0] = res.astype(o_ref.dtype)       # lane-dense (num_seeds, 128) store

    return kernel


# ----------------------------------------------------------------------------
# Wrapper: pack weights into one slab, launch the single fused kernel
# ----------------------------------------------------------------------------
def set_transformer_forward(x1, x2, params, num_heads):
    enc0, enc1, pma, (Wl, bl) = params
    B, N, F = x1.shape
    P = Wl.shape[0]
    out_dim = Wl.shape[1]
    S, pma_mab = pma
    num_seeds = S.shape[1]

    # ---- pack every weight/bias into one (R, 128) slab, 8-row-aligned pieces
    pieces = []

    def add(name, a):
        pieces.append((name, a))

    def add_mab(prefix, p):
        Wq, bq, Wk, bk, Wv, bv, Wo, bo = p
        add(prefix + "Wq", Wq)
        add(prefix + "bq", bq)
        add(prefix + "Wkv", jnp.concatenate([Wk, Wv], axis=1))   # fused K|V proj
        add(prefix + "bkv", jnp.concatenate([bk, bv], axis=1))
        add(prefix + "Wo", Wo)
        add(prefix + "bo", bo)

    I0, m00, m01 = enc0
    I1, m10, m11 = enc1
    add("e0_I", I0[0]); add_mab("e0_m0_", m00); add_mab("e0_m1_", m01)
    add("e1_I", I1[0]); add_mab("e1_m0_", m10); add_mab("e1_m1_", m11)
    add("pma_S", S[0]); add_mab("pma_m_", pma_mab)
    add("lin_W", Wl);   add("lin_b", bl)

    layout = {}
    blocks = []
    off = 0
    for name, a in pieces:
        rows, cols = a.shape
        prows = -(-rows // 8) * 8
        layout[name] = (off, rows, cols)
        blocks.append(jnp.pad(a.astype(jnp.float32),
                              ((0, prows - rows), (0, _LANES - cols))))
        off += prows
    slab = jnp.concatenate(blocks, axis=0)       # (R, 128); const-folded under jit
    R = off

    out = pl.pallas_call(
        _make_fused_kernel(layout, num_heads),
        out_shape=jax.ShapeDtypeStruct((B, num_seeds, _LANES), jnp.float32),
        grid=(B,),
        in_specs=[
            pl.BlockSpec((1, N, F), lambda b: (b, 0, 0)),
            pl.BlockSpec((1, N, F), lambda b: (b, 0, 0)),
            pl.BlockSpec((R, _LANES), lambda b: (0, 0)),   # weights: fetched once
        ],
        out_specs=pl.BlockSpec((1, num_seeds, _LANES), lambda b: (b, 0, 0)),
        compiler_params=pltpu.CompilerParams(dimension_semantics=("parallel",)),
    )(x1, x2, slab)

    # torch: self.dec(x).squeeze()  (drops num_seeds; also batch if B==1)
    return jnp.squeeze(out[:, :, :out_dim])


# ----------------------------------------------------------------------------
# Pure-JAX reference (mirrors the torch MAB math) for validation
# ----------------------------------------------------------------------------
def mab_ref(Q, K, params, num_heads):
    Wq, bq, Wk, bk, Wv, bv, Wo, bo = params
    dV = Wq.shape[1]
    Qp, Kp, Vp = Q @ Wq + bq, K @ Wk + bk, K @ Wv + bv
    Q_ = jnp.concatenate(jnp.split(Qp, num_heads, axis=2), axis=0)
    K_ = jnp.concatenate(jnp.split(Kp, num_heads, axis=2), axis=0)
    V_ = jnp.concatenate(jnp.split(Vp, num_heads, axis=2), axis=0)
    A = jax.nn.softmax(Q_ @ jnp.swapaxes(K_, 1, 2) / math.sqrt(dV), axis=2)
    O = jnp.concatenate(jnp.split(Q_ + A @ V_, num_heads, axis=0), axis=2)
    return O + jax.nn.relu(O @ Wo + bo)


def isab_ref(X, isab_params, num_heads):
    I, mab0_p, mab1_p = isab_params
    B = X.shape[0]
    I_rep = jnp.broadcast_to(I, (B,) + I.shape[1:])
    H = mab_ref(I_rep, X, mab0_p, num_heads)
    return mab_ref(X, H, mab1_p, num_heads)


def set_transformer_ref(x1, x2, params, num_heads):
    enc0, enc1, pma, (Wl, bl) = params
    z1 = isab_ref(isab_ref(x1, enc0, num_heads), enc1, num_heads)
    z2 = isab_ref(isab_ref(x2, enc0, num_heads), enc1, num_heads)
    z = jnp.concatenate([z1, z2], axis=-2)
    S, mab_p = pma
    S_rep = jnp.broadcast_to(S, (z.shape[0],) + S.shape[1:])
    z = mab_ref(S_rep, z, mab_p, num_heads)
    return jnp.squeeze(z @ Wl + bl)


# ----------------------------------------------------------------------------
# Deterministic parameter construction (synthetic; not a checkpoint load)
# ----------------------------------------------------------------------------
def make_linear(key, din, dout):
    kw, kb = jax.random.split(key)
    bound = 1.0 / math.sqrt(din)
    W = jax.random.uniform(kw, (din, dout), jnp.float32, -bound, bound)
    b = jax.random.uniform(kb, (1, dout), jnp.float32, -bound, bound)
    return W, b


def make_mab(key, dQ, dK, dV):
    ks = jax.random.split(key, 4)
    Wq, bq = make_linear(ks[0], dQ, dV)
    Wk, bk = make_linear(ks[1], dK, dV)
    Wv, bv = make_linear(ks[2], dK, dV)
    Wo, bo = make_linear(ks[3], dV, dV)
    return (Wq, bq, Wk, bk, Wv, bv, Wo, bo)


def make_isab(key, dim_in, dim_out, m):
    kI, k0, k1 = jax.random.split(key, 3)
    bound = math.sqrt(6.0 / (m + dim_out))
    I = jax.random.uniform(kI, (1, m, dim_out), jnp.float32, -bound, bound)
    mab0 = make_mab(k0, dim_out, dim_in, dim_out)   # MAB(dim_out, dim_in, dim_out)
    mab1 = make_mab(k1, dim_in, dim_out, dim_out)   # MAB(dim_in, dim_out, dim_out)
    return (I, mab0, mab1)


def make_pma(key, dim, num_seeds):
    kS, km = jax.random.split(key)
    bound = math.sqrt(6.0 / (num_seeds + dim))
    S = jax.random.uniform(kS, (1, num_seeds, dim), jnp.float32, -bound, bound)
    mab = make_mab(km, dim, dim, dim)
    return (S, mab)


if __name__ == "__main__":
    # Small, forward-consistent shapes
    B, N = 2, 8
    input_size, proj_dim, output_size = 16, 32, 10
    num_heads, num_seeds, m = 4, 1, 8

    key = jax.random.PRNGKey(0)
    k_x1, k_x2, k_e0, k_e1, k_pma, k_lin = jax.random.split(key, 6)

    x1 = jax.random.normal(k_x1, (B, N, input_size), jnp.float32)
    x2 = jax.random.normal(k_x2, (B, N, input_size), jnp.float32)

    params = (
        make_isab(k_e0, input_size, proj_dim, m),
        make_isab(k_e1, proj_dim, proj_dim, m),
        make_pma(k_pma, proj_dim, num_seeds),
        make_linear(k_lin, proj_dim, output_size),
    )

    fwd = jax.jit(lambda a, b: set_transformer_forward(a, b, params, num_heads))
    out = jax.block_until_ready(fwd(x1, x2))

    ref = set_transformer_ref(x1, x2, params, num_heads)
    assert out.shape == (B, output_size), out.shape
    assert jnp.allclose(out, ref, rtol=1e-4, atol=1e-4), float(jnp.max(jnp.abs(out - ref)))

    print("KERNEL_OK")
</pallas_src>

<mosaic_0001>
module attributes {stable_mosaic.version = 11 : i64} {
  func.func @kernel(%arg0: i32, %arg1: memref<1x8x16xf32, #tpu.memory_space<vmem>>, %arg2: memref<1x8x16xf32, #tpu.memory_space<vmem>>, %arg3: memref<632x128xf32, #tpu.memory_space<vmem>>, %arg4: memref<1x1x128xf32, #tpu.memory_space<vmem>>) attributes {dimension_semantics = [#tpu.dimension_semantics<parallel>], iteration_bounds = array<i64: 2>, scalar_prefetch = 0 : i64, scratch_operands = 0 : i64, tpu.core_type = #tpu.core_type<tc>, window_params = [{transform_indices = @transform_0, window_bounds = array<i64: 1, 8, 16>}, {transform_indices = @transform_1, window_bounds = array<i64: 1, 8, 16>}, {pipeline_mode = #tpu.pipeline_mode<synchronous>, transform_indices = @transform_2, window_bounds = array<i64: 632, 128>}, {transform_indices = @transform_3, window_bounds = array<i64: 1, 1, 128>}]} {
    %c0 = arith.constant 0 : index
    %c0_0 = arith.constant 0 : index
    %c0_1 = arith.constant 0 : index
    %0 = vector.load %arg1[%c0, %c0_0, %c0_1] : memref<1x8x16xf32, #tpu.memory_space<vmem>>, vector<1x8x16xf32>
    %1 = vector.shape_cast %0 : vector<1x8x16xf32> to vector<8x16xf32>
    %c0_2 = arith.constant 0 : index
    %c0_3 = arith.constant 0 : index
    %2 = vector.load %arg3[%c0_2, %c0_3] : memref<632x128xf32, #tpu.memory_space<vmem>>, vector<8x32xf32>
    %c8 = arith.constant 8 : index
    %c0_4 = arith.constant 0 : index
    %3 = vector.load %arg3[%c8, %c0_4] : memref<632x128xf32, #tpu.memory_space<vmem>>, vector<32x32xf32>
    %c40 = arith.constant 40 : index
    %c0_5 = arith.constant 0 : index
    %4 = vector.load %arg3[%c40, %c0_5] : memref<632x128xf32, #tpu.memory_space<vmem>>, vector<1x32xf32>
    %c48 = arith.constant 48 : index
    %c0_6 = arith.constant 0 : index
    %5 = vector.load %arg3[%c48, %c0_6] : memref<632x128xf32, #tpu.memory_space<vmem>>, vector<16x64xf32>
    %c64 = arith.constant 64 : index
    %c0_7 = arith.constant 0 : index
    %6 = vector.load %arg3[%c64, %c0_7] : memref<632x128xf32, #tpu.memory_space<vmem>>, vector<1x64xf32>
    %c72 = arith.constant 72 : index
    %c0_8 = arith.constant 0 : index
    %7 = vector.load %arg3[%c72, %c0_8] : memref<632x128xf32, #tpu.memory_space<vmem>>, vector<32x32xf32>
    %c104 = arith.constant 104 : index
    %c0_9 = arith.constant 0 : index
    %8 = vector.load %arg3[%c104, %c0_9] : memref<632x128xf32, #tpu.memory_space<vmem>>, vector<1x32xf32>
    %cst = arith.constant dense<0.000000e+00> : vector<8x32xf32>
    %9 = tpu.matmul %2, %3, %cst {dimension_numbers = #tpu.dot_dimension_numbers<[1], [0], [0], [1], [0, 0, 1, 1], [], []>} : vector<8x32xf32>, vector<32x32xf32>, vector<8x32xf32> -> vector<8x32xf32>
    %10 = vector.broadcast %4 : vector<1x32xf32> to vector<8x32xf32>
    %11 = arith.addf %9, %10 : vector<8x32xf32>
    %cst_10 = arith.constant dense<0.000000e+00> : vector<8x64xf32>
    %12 = tpu.matmul %1, %5, %cst_10 {dimension_numbers = #tpu.dot_dimension_numbers<[1], [0], [0], [1], [0, 0, 1, 1], [], []>} : vector<8x16xf32>, vector<16x64xf32>, vector<8x64xf32> -> vector<8x64xf32>
    %13 = vector.broadcast %6 : vector<1x64xf32> to vector<8x64xf32>
    %14 = arith.addf %12, %13 : vector<8x64xf32>
    %15 = vector.extract_strided_slice %14 {offsets = [0, 0], sizes = [8, 32], strides = [1, 1]} : vector<8x64xf32> to vector<8x32xf32>
    %16 = vector.extract_strided_slice %14 {offsets = [0, 32], sizes = [8, 32], strides = [1, 1]} : vector<8x64xf32> to vector<8x32xf32>
    %17 = vector.extract_strided_slice %11 {offsets = [0, 0], sizes = [8, 8], strides = [1, 1]} : vector<8x32xf32> to vector<8x8xf32>
    %18 = vector.extract_strided_slice %15 {offsets = [0, 0], sizes = [8, 8], strides = [1, 1]} : vector<8x32xf32> to vector<8x8xf32>
    %19 = vector.extract_strided_slice %16 {offsets = [0, 0], sizes = [8, 8], strides = [1, 1]} : vector<8x32xf32> to vector<8x8xf32>
    %20 = tpu.transpose %18, [1, 0] : vector<8x8xf32> -> vector<8x8xf32>
    %cst_11 = arith.constant dense<0.000000e+00> : vector<8x8xf32>
    %21 = tpu.matmul %17, %20, %cst_11 {dimension_numbers = #tpu.dot_dimension_numbers<[1], [0], [0], [1], [0, 0, 1, 1], [], []>} : vector<8x8xf32>, vector<8x8xf32>, vector<8x8xf32> -> vector<8x8xf32>
    %cst_12 = arith.constant 0.176776692 : f32
    %22 = vector.broadcast %cst_12 : f32 to vector<8x8xf32>
    %23 = arith.mulf %21, %22 : vector<8x8xf32>
    %cst_13 = arith.constant dense<0xFF800000> : vector<8xf32>
    %24 = vector.multi_reduction <maximumf>, %23, %cst_13 [1] : vector<8x8xf32> to vector<8xf32>
    %25 = vector.shape_cast %24 : vector<8xf32> to vector<8x1xf32>
    %26 = vector.broadcast %25 : vector<8x1xf32> to vector<8x8xf32>
    %27 = arith.subf %23, %26 : vector<8x8xf32>
    %28 = math.exp %27 : vector<8x8xf32>
    %cst_14 = arith.constant dense<0.000000e+00> : vector<8xf32>
    %29 = vector.multi_reduction <add>, %28, %cst_14 [1] : vector<8x8xf32> to vector<8xf32>
    %30 = vector.shape_cast %29 : vector<8xf32> to vector<8x1xf32>
    %31 = tpu.reciprocal %30 : vector<8x1xf32> -> vector<8x1xf32>
    %32 = vector.broadcast %31 : vector<8x1xf32> to vector<8x8xf32>
    %33 = arith.mulf %28, %32 : vector<8x8xf32>
    %cst_15 = arith.constant dense<0.000000e+00> : vector<8x8xf32>
    %34 = tpu.matmul %33, %19, %cst_15 {dimension_numbers = #tpu.dot_dimension_numbers<[1], [0], [0], [1], [0, 0, 1, 1], [], []>} : vector<8x8xf32>, vector<8x8xf32>, vector<8x8xf32> -> vector<8x8xf32>
    %35 = arith.addf %17, %34 : vector<8x8xf32>
    %36 = vector.extract_strided_slice %11 {offsets = [0, 8], sizes = [8, 8], strides = [1, 1]} : vector<8x32xf32> to vector<8x8xf32>
    %37 = vector.extract_strided_slice %15 {offsets = [0, 8], sizes = [8, 8], strides = [1, 1]} : vector<8x32xf32> to vector<8x8xf32>
    %38 = vector.extract_strided_slice %16 {offsets = [0, 8], sizes = [8, 8], strides = [1, 1]} : vector<8x32xf32> to vector<8x8xf32>
    %39 = tpu.transpose %37, [1, 0] : vector<8x8xf32> -> vector<8x8xf32>
    %cst_16 = arith.constant dense<0.000000e+00> : vector<8x8xf32>
    %40 = tpu.matmul %36, %39, %cst_16 {dimension_numbers = #tpu.dot_dimension_numbers<[1], [0], [0], [1], [0, 0, 1, 1], [], []>} : vector<8x8xf32>, vector<8x8xf32>, vector<8x8xf32> -> vector<8x8xf32>
    %cst_17 = arith.constant 0.176776692 : f32
    %41 = vector.broadcast %cst_17 : f32 to vector<8x8xf32>
    %42 = arith.mulf %40, %41 : vector<8x8xf32>
    %cst_18 = arith.constant dense<0xFF800000> : vector<8xf32>
    %43 = vector.multi_reduction <maximumf>, %42, %cst_18 [1] : vector<8x8xf32> to vector<8xf32>
    %44 = vector.shape_cast %43 : vector<8xf32> to vector<8x1xf32>
    %45 = vector.broadcast %44 : vector<8x1xf32> to vector<8x8xf32>
    %46 = arith.subf %42, %45 : vector<8x8xf32>
    %47 = math.exp %46 : vector<8x8xf32>
    %cst_19 = arith.constant dense<0.000000e+00> : vector<8xf32>
    %48 = vector.multi_reduction <add>, %47, %cst_19 [1] : vector<8x8xf32> to vector<8xf32>
    %49 = vector.shape_cast %48 : vector<8xf32> to vector<8x1xf32>
    %50 = tpu.reciprocal %49 : vector<8x1xf32> -> vector<8x1xf32>
    %51 = vector.broadcast %50 : vector<8x1xf32> to vector<8x8xf32>
    %52 = arith.mulf %47, %51 : vector<8x8xf32>
    %cst_20 = arith.constant dense<0.000000e+00> : vector<8x8xf32>
    %53 = tpu.matmul %52, %38, %cst_20 {dimension_numbers = #tpu.dot_dimension_numbers<[1], [0], [0], [1], [0, 0, 1, 1], [], []>} : vector<8x8xf32>, vector<8x8xf32>, vector<8x8xf32> -> vector<8x8xf32>
    %54 = arith.addf %36, %53 : vector<8x8xf32>
    %55 = vector.extract_strided_slice %11 {offsets = [0, 16], sizes = [8, 8], strides = [1, 1]} : vector<8x32xf32> to vector<8x8xf32>
    %56 = vector.extract_strided_slice %15 {offsets = [0, 16], sizes = [8, 8], strides = [1, 1]} : vector<8x32xf32> to vector<8x8xf32>
    %57 = vector.extract_strided_slice %16 {offsets = [0, 16], sizes = [8, 8], strides = [1, 1]} : vector<8x32xf32> to vector<8x8xf32>
    %58 = tpu.transpose %56, [1, 0] : vector<8x8xf32> -> vector<8x8xf32>
    %cst_21 = arith.constant dense<0.000000e+00> : vector<8x8xf32>
    %59 = tpu.matmul %55, %58, %cst_21 {dimension_numbers = #tpu.dot_dimension_numbers<[1], [0], [0], [1], [0, 0, 1, 1], [], []>} : vector<8x8xf32>, vector<8x8xf32>, vector<8x8xf32> -> vector<8x8xf32>
    %cst_22 = arith.constant 0.176776692 : f32
    %60 = vector.broadcast %cst_22 : f32 to vector<8x8xf32>
    %61 = arith.mulf %59, %60 : vector<8x8xf32>
    %cst_23 = arith.constant dense<0xFF800000> : vector<8xf32>
    %62 = vector.multi_reduction <maximumf>, %61, %cst_23 [1] : vector<8x8xf32> to vector<8xf32>
    %63 = vector.shape_cast %62 : vector<8xf32> to vector<8x1xf32>
    %64 = vector.broadcast %63 : vector<8x1xf32> to vector<8x8xf32>
    %65 = arith.subf %61, %64 : vector<8x8xf32>
    %66 = math.exp %65 : vector<8x8xf32>
    %cst_24 = arith.constant dense<0.000000e+00> : vector<8xf32>
    %67 = vector.multi_reduction <add>, %66, %cst_24 [1] : vector<8x8xf32> to vector<8xf32>
    %68 = vector.shape_cast %67 : vector<8xf32> to vector<8x1xf32>
    %69 = tpu.reciprocal %68 : vector<8x1xf32> -> vector<8x1xf32>
    %70 = vector.broadcast %69 : vector<8x1xf32> to vector<8x8xf32>
    %71 = arith.mulf %66, %70 : vector<8x8xf32>
    %cst_25 = arith.constant dense<0.000000e+00> : vector<8x8xf32>
    %72 = tpu.matmul %71, %57, %cst_25 {dimension_numbers = #tpu.dot_dimension_numbers<[1], [0], [0], [1], [0, 0, 1, 1], [], []>} : vector<8x8xf32>, vector<8x8xf32>, vector<8x8xf32> -> vector<8x8xf32>
    %73 = arith.addf %55, %72 : vector<8x8xf32>
    %74 = vector.extract_strided_slice %11 {offsets = [0, 24], sizes = [8, 8], strides = [1, 1]} : vector<8x32xf32> to vector<8x8xf32>
    %75 = vector.extract_strided_slice %15 {offsets = [0, 24], sizes = [8, 8], strides = [1, 1]} : vector<8x32xf32> to vector<8x8xf32>
    %76 = vector.extract_strided_slice %16 {offsets = [0, 24], sizes = [8, 8], strides = [1, 1]} : vector<8x32xf32> to vector<8x8xf32>
    %77 = tpu.transpose %75, [1, 0] : vector<8x8xf32> -> vector<8x8xf32>
    %cst_26 = arith.constant dense<0.000000e+00> : vector<8x8xf32>
    %78 = tpu.matmul %74, %77, %cst_26 {dimension_numbers = #tpu.dot_dimension_numbers<[1], [0], [0], [1], [0, 0, 1, 1], [], []>} : vector<8x8xf32>, vector<8x8xf32>, vector<8x8xf32> -> vector<8x8xf32>
    %cst_27 = arith.constant 0.176776692 : f32
    %79 = vector.broadcast %cst_27 : f32 to vector<8x8xf32>
    %80 = arith.mulf %78, %79 : vector<8x8xf32>
    %cst_28 = arith.constant dense<0xFF800000> : vector<8xf32>
    %81 = vector.multi_reduction <maximumf>, %80, %cst_28 [1] : vector<8x8xf32> to vector<8xf32>
    %82 = vector.shape_cast %81 : vector<8xf32> to vector<8x1xf32>
    %83 = vector.broadcast %82 : vector<8x1xf32> to vector<8x8xf32>
    %84 = arith.subf %80, %83 : vector<8x8xf32>
    %85 = math.exp %84 : vector<8x8xf32>
    %cst_29 = arith.constant dense<0.000000e+00> : vector<8xf32>
    %86 = vector.multi_reduction <add>, %85, %cst_29 [1] : vector<8x8xf32> to vector<8xf32>
    %87 = vector.shape_cast %86 : vector<8xf32> to vector<8x1xf32>
    %88 = tpu.reciprocal %87 : vector<8x1xf32> -> vector<8x1xf32>
    %89 = vector.broadcast %88 : vector<8x1xf32> to vector<8x8xf32>
    %90 = arith.mulf %85, %89 : vector<8x8xf32>
    %cst_30 = arith.constant dense<0.000000e+00> : vector<8x8xf32>
    %91 = tpu.matmul %90, %76, %cst_30 {dimension_numbers = #tpu.dot_dimension_numbers<[1], [0], [0], [1], [0, 0, 1, 1], [], []>} : vector<8x8xf32>, vector<8x8xf32>, vector<8x8xf32> -> vector<8x8xf32>
    %92 = arith.addf %74, %91 : vector<8x8xf32>
    %93 = tpu.concatenate %35, %54, %73, %92 in 1 : vector<8x8xf32>, vector<8x8xf32>, vector<8x8xf32>, vector<8x8xf32> -> vector<8x32xf32>
    %cst_31 = arith.constant dense<0.000000e+00> : vector<8x32xf32>
    %94 = tpu.matmul %93, %7, %cst_31 {dimension_numbers = #tpu.dot_dimension_numbers<[1], [0], [0], [1], [0, 0, 1, 1], [], []>} : vector<8x32xf32>, vector<32x32xf32>, vector<8x32xf32> -> vector<8x32xf32>
    %95 = vector.broadcast %8 : vector<1x32xf32> to vector<8x32xf32>
    %96 = arith.addf %94, %95 : vector<8x32xf32>
    %cst_32 = arith.constant 0.000000e+00 : f32
    %97 = vector.broadcast %cst_32 : f32 to vector<8x32xf32>
    %98 = arith.maximumf %96, %97 : vector<8x32xf32>
    %99 = arith.addf %93, %98 : vector<8x32xf32>
    %c112 = arith.constant 112 : index
    %c0_33 = arith.constant 0 : index
    %100 = vector.load %arg3[%c112, %c0_33] : memref<632x128xf32, #tpu.memory_space<vmem>>, vector<16x32xf32>
    %c128 = arith.constant 128 : index
    %c0_34 = arith.constant 0 : index
    %101 = vector.load %arg3[%c128, %c0_34] : memref<632x128xf32, #tpu.memory_space<vmem>>, vector<1x32xf32>
    %c136 = arith.constant 136 : index
    %c0_35 = arith.constant 0 : index
    %102 = vector.load %arg3[%c136, %c0_35] : memref<632x128xf32, #tpu.memory_space<vmem>>, vector<32x64xf32>
    %c168 = arith.constant 168 : index
    %c0_36 = arith.constant 0 : index
    %103 = vector.load %arg3[%c168, %c0_36] : memref<632x128xf32, #tpu.memory_space<vmem>>, vector<1x64xf32>
    %c176 = arith.constant 176 : index
    %c0_37 = arith.constant 0 : index
    %104 = vector.load %arg3[%c176, %c0_37] : memref<632x128xf32, #tpu.memory_space<vmem>>, vector<32x32xf32>
    %c208 = arith.constant 208 : index
    %c0_38 = arith.constant 0 : index
    %105 = vector.load %arg3[%c208, %c0_38] : memref<632x128xf32, #tpu.memory_space<vmem>>, vector<1x32xf32>
    %cst_39 = arith.constant dense<0.000000e+00> : vector<8x32xf32>
    %106 = tpu.matmul %1, %100, %cst_39 {dimension_numbers = #tpu.dot_dimension_numbers<[1], [0], [0], [1], [0, 0, 1, 1], [], []>} : vector<8x16xf32>, vector<16x32xf32>, vector<8x32xf32> -> vector<8x32xf32>
    %107 = vector.broadcast %101 : vector<1x32xf32> to vector<8x32xf32>
    %108 = arith.addf %106, %107 : vector<8x32xf32>
    %cst_40 = arith.constant dense<0.000000e+00> : vector<8x64xf32>
    %109 = tpu.matmul %99, %102, %cst_40 {dimension_numbers = #tpu.dot_dimension_numbers<[1], [0], [0], [1], [0, 0, 1, 1], [], []>} : vector<8x32xf32>, vector<32x64xf32>, vector<8x64xf32> -> vector<8x64xf32>
    %110 = vector.broadcast %103 : vector<1x64xf32> to vector<8x64xf32>
    %111 = arith.addf %109, %110 : vector<8x64xf32>
    %112 = vector.extract_strided_slice %111 {offsets = [0, 0], sizes = [8, 32], strides = [1, 1]} : vector<8x64xf32> to vector<8x32xf32>
    %113 = vector.extract_strided_slice %111 {offsets = [0, 32], sizes = [8, 32], strides = [1, 1]} : vector<8x64xf32> to vector<8x32xf32>
    %114 = vector.extract_strided_slice %108 {offsets = [0, 0], sizes = [8, 8], strides = [1, 1]} : vector<8x32xf32> to vector<8x8xf32>
    %115 = vector.extract_strided_slice %112 {offsets = [0, 0], sizes = [8, 8], strides = [1, 1]} : vector<8x32xf32> to vector<8x8xf32>
    %116 = vector.extract_strided_slice %113 {offsets = [0, 0], sizes = [8, 8], strides = [1, 1]} : vector<8x32xf32> to vector<8x8xf32>
    %117 = tpu.transpose %115, [1, 0] : vector<8x8xf32> -> vector<8x8xf32>
    %cst_41 = arith.constant dense<0.000000e+00> : vector<8x8xf32>
    %118 = tpu.matmul %114, %117, %cst_41 {dimension_numbers = #tpu.dot_dimension_numbers<[1], [0], [0], [1], [0, 0, 1, 1], [], []>} : vector<8x8xf32>, vector<8x8xf32>, vector<8x8xf32> -> vector<8x8xf32>
    %cst_42 = arith.constant 0.176776692 : f32
    %119 = vector.broadcast %cst_42 : f32 to vector<8x8xf32>
    %120 = arith.mulf %118, %119 : vector<8x8xf32>
    %cst_43 = arith.constant dense<0xFF800000> : vector<8xf32>
    %121 = vector.multi_reduction <maximumf>, %120, %cst_43 [1] : vector<8x8xf32> to vector<8xf32>
    %122 = vector.shape_cast %121 : vector<8xf32> to vector<8x1xf32>
    %123 = vector.broadcast %122 : vector<8x1xf32> to vector<8x8xf32>
    %124 = arith.subf %120, %123 : vector<8x8xf32>
    %125 = math.exp %124 : vector<8x8xf32>
    %cst_44 = arith.constant dense<0.000000e+00> : vector<8xf32>
    %126 = vector.multi_reduction <add>, %125, %cst_44 [1] : vector<8x8xf32> to vector<8xf32>
    %127 = vector.shape_cast %126 : vector<8xf32> to vector<8x1xf32>
    %128 = tpu.reciprocal %127 : vector<8x1xf32> -> vector<8x1xf32>
    %129 = vector.broadcast %128 : vector<8x1xf32> to vector<8x8xf32>
    %130 = arith.mulf %125, %129 : vector<8x8xf32>
    %cst_45 = arith.constant dense<0.000000e+00> : vector<8x8xf32>
    %131 = tpu.matmul %130, %116, %cst_45 {dimension_numbers = #tpu.dot_dimension_numbers<[1], [0], [0], [1], [0, 0, 1, 1], [], []>} : vector<8x8xf32>, vector<8x8xf32>, vector<8x8xf32> -> vector<8x8xf32>
    %132 = arith.addf %114, %131 : vector<8x8xf32>
    %133 = vector.extract_strided_slice %108 {offsets = [0, 8], sizes = [8, 8], strides = [1, 1]} : vector<8x32xf32> to vector<8x8xf32>
    %134 = vector.extract_strided_slice %112 {offsets = [0, 8], sizes = [8, 8], strides = [1, 1]} : vector<8x32xf32> to vector<8x8xf32>
    %135 = vector.extract_strided_slice %113 {offsets = [0, 8], sizes = [8, 8], strides = [1, 1]} : vector<8x32xf32> to vector<8x8xf32>
    %136 = tpu.transpose %134, [1, 0] : vector<8x8xf32> -> vector<8x8xf32>
    %cst_46 = arith.constant dense<0.000000e+00> : vector<8x8xf32>
    %137 = tpu.matmul %133, %136, %cst_46 {dimension_numbers = #tpu.dot_dimension_numbers<[1], [0], [0], [1], [0, 0, 1, 1], [], []>} : vector<8x8xf32>, vector<8x8xf32>, vector<8x8xf32> -> vector<8x8xf32>
    %cst_47 = arith.constant 0.176776692 : f32
    %138 = vector.broadcast %cst_47 : f32 to vector<8x8xf32>
    %139 = arith.mulf %137, %138 : vector<8x8xf32>
    %cst_48 = arith.constant dense<0xFF800000> : vector<8xf32>
    %140 = vector.multi_reduction <maximumf>, %139, %cst_48 [1] : vector<8x8xf32> to vector<8xf32>
    %141 = vector.shape_cast %140 : vector<8xf32> to vector<8x1xf32>
    %142 = vector.broadcast %141 : vector<8x1xf32> to vector<8x8xf32>
    %143 = arith.subf %139, %142 : vector<8x8xf32>
    %144 = math.exp %143 : vector<8x8xf32>
    %cst_49 = arith.constant dense<0.000000e+00> : vector<8xf32>
    %145 = vector.multi_reduction <add>, %144, %cst_49 [1] : vector<8x8xf32> to vector<8xf32>
    %146 = vector.shape_cast %145 : vector<8xf32> to vector<8x1xf32>
    %147 = tpu.reciprocal %146 : vector<8x1xf32> -> vector<8x1xf32>
    %148 = vector.broadcast %147 : vector<8x1xf32> to vector<8x8xf32>
    %149 = arith.mulf %144, %148 : vector<8x8xf32>
    %cst_50 = arith.constant dense<0.000000e+00> : vector<8x8xf32>
    %150 = tpu.matmul %149, %135, %cst_50 {dimension_numbers = #tpu.dot_dimension_numbers<[1], [0], [0], [1], [0, 0, 1, 1], [], []>} : vector<8x8xf32>, vector<8x8xf32>, vector<8x8xf32> -> vector<8x8xf32>
    %151 = arith.addf %133, %150 : vector<8x8xf32>
    %152 = vector.extract_strided_slice %108 {offsets = [0, 16], sizes = [8, 8], strides = [1, 1]} : vector<8x32xf32> to vector<8x8xf32>
    %153 = vector.extract_strided_slice %112 {offsets = [0, 16], sizes = [8, 8], strides = [1, 1]} : vector<8x32xf32> to vector<8x8xf32>
    %154 = vector.extract_strided_slice %113 {offsets = [0, 16], sizes = [8, 8], strides = [1, 1]} : vector<8x32xf32> to vector<8x8xf32>
    %155 = tpu.transpose %153, [1, 0] : vector<8x8xf32> -> vector<8x8xf32>
    %cst_51 = arith.constant dense<0.000000e+00> : vector<8x8xf32>
    %156 = tpu.matmul %152, %155, %cst_51 {dimension_numbers = #tpu.dot_dimension_numbers<[1], [0], [0], [1], [0, 0, 1, 1], [], []>} : vector<8x8xf32>, vector<8x8xf32>, vector<8x8xf32> -> vector<8x8xf32>
    %cst_52 = arith.constant 0.176776692 : f32
    %157 = vector.broadcast %cst_52 : f32 to vector<8x8xf32>
    %158 = arith.mulf %156, %157 : vector<8x8xf32>
    %cst_53 = arith.constant dense<0xFF800000> : vector<8xf32>
    %159 = vector.multi_reduction <maximumf>, %158, %cst_53 [1] : vector<8x8xf32> to vector<8xf32>
    %160 = vector.shape_cast %159 : vector<8xf32> to vector<8x1xf32>
    %161 = vector.broadcast %160 : vector<8x1xf32> to vector<8x8xf32>
    %162 = arith.subf %158, %161 : vector<8x8xf32>
    %163 = math.exp %162 : vector<8x8xf32>
    %cst_54 = arith.constant dense<0.000000e+00> : vector<8xf32>
    %164 = vector.multi_reduction <add>, %163, %cst_54 [1] : vector<8x8xf32> to vector<8xf32>
    %165 = vector.shape_cast %164 : vector<8xf32> to vector<8x1xf32>
    %166 = tpu.reciprocal %165 : vector<8x1xf32> -> vector<8x1xf32>
    %167 = vector.broadcast %166 : vector<8x1xf32> to vector<8x8xf32>
    %168 = arith.mulf %163, %167 : vector<8x8xf32>
    %cst_55 = arith.constant dense<0.000000e+00> : vector<8x8xf32>
    %169 = tpu.matmul %168, %154, %cst_55 {dimension_numbers = #tpu.dot_dimension_numbers<[1], [0], [0], [1], [0, 0, 1, 1], [], []>} : vector<8x8xf32>, vector<8x8xf32>, vector<8x8xf32> -> vector<8x8xf32>
    %170 = arith.addf %152, %169 : vector<8x8xf32>
    %171 = vector.extract_strided_slice %108 {offsets = [0, 24], sizes = [8, 8], strides = [1, 1]} : vector<8x32xf32> to vector<8x8xf32>
    %172 = vector.extract_strided_slice %112 {offsets = [0, 24], sizes = [8, 8], strides = [1, 1]} : vector<8x32xf32> to vector<8x8xf32>
    %173 = vector.extract_strided_slice %113 {offsets = [0, 24], sizes = [8, 8], strides = [1, 1]} : vector<8x32xf32> to vector<8x8xf32>
    %174 = tpu.transpose %172, [1, 0] : vector<8x8xf32> -> vector<8x8xf32>
    %cst_56 = arith.constant dense<0.000000e+00> : vector<8x8xf32>
    %175 = tpu.matmul %171, %174, %cst_56 {dimension_numbers = #tpu.dot_dimension_numbers<[1], [0], [0], [1], [0, 0, 1, 1], [], []>} : vector<8x8xf32>, vector<8x8xf32>, vector<8x8xf32> -> vector<8x8xf32>
    %cst_57 = arith.constant 0.176776692 : f32
    %176 = vector.broadcast %cst_57 : f32 to vector<8x8xf32>
    %177 = arith.mulf %175, %176 : vector<8x8xf32>
    %cst_58 = arith.constant dense<0xFF800000> : vector<8xf32>
    %178 = vector.multi_reduction <maximumf>, %177, %cst_58 [1] : vector<8x8xf32> to vector<8xf32>
    %179 = vector.shape_cast %178 : vector<8xf32> to vector<8x1xf32>
    %180 = vector.broadcast %179 : vector<8x1xf32> to vector<8x8xf32>
    %181 = arith.subf %177, %180 : vector<8x8xf32>
    %182 = math.exp %181 : vector<8x8xf32>
    %cst_59 = arith.constant dense<0.000000e+00> : vector<8xf32>
    %183 = vector.multi_reduction <add>, %182, %cst_59 [1] : vector<8x8xf32> to vector<8xf32>
    %184 = vector.shape_cast %183 : vector<8xf32> to vector<8x1xf32>
    %185 = tpu.reciprocal %184 : vector<8x1xf32> -> vector<8x1xf32>
    %186 = vector.broadcast %185 : vector<8x1xf32> to vector<8x8xf32>
    %187 = arith.mulf %182, %186 : vector<8x8xf32>
    %cst_60 = arith.constant dense<0.000000e+00> : vector<8x8xf32>
    %188 = tpu.matmul %187, %173, %cst_60 {dimension_numbers = #tpu.dot_dimension_numbers<[1], [0], [0], [1], [0, 0, 1, 1], [], []>} : vector<8x8xf32>, vector<8x8xf32>, vector<8x8xf32> -> vector<8x8xf32>
    %189 = arith.addf %171, %188 : vector<8x8xf32>
    %190 = tpu.concatenate %132, %151, %170, %189 in 1 : vector<8x8xf32>, vector<8x8xf32>, vector<8x8xf32>, vector<8x8xf32> -> vector<8x32xf32>
    %cst_61 = arith.constant dense<0.000000e+00> : vector<8x32xf32>
    %191 = tpu.matmul %190, %104, %cst_61 {dimension_numbers = #tpu.dot_dimension_numbers<[1], [0], [0], [1], [0, 0, 1, 1], [], []>} : vector<8x32xf32>, vector<32x32xf32>, vector<8x32xf32> -> vector<8x32xf32>
    %192 = vector.broadcast %105 : vector<1x32xf32> to vector<8x32xf32>
    %193 = arith.addf %191, %192 : vector<8x32xf32>
    %cst_62 = arith.constant 0.000000e+00 : f32
    %194 = vector.broadcast %cst_62 : f32 to vector<8x32xf32>
    %195 = arith.maximumf %193, %194 : vector<8x32xf32>
    %196 = arith.addf %190, %195 : vector<8x32xf32>
    %c216 = arith.constant 216 : index
    %c0_63 = arith.constant 0 : index
    %197 = vector.load %arg3[%c216, %c0_63] : memref<632x128xf32, #tpu.memory_space<vmem>>, vector<8x32xf32>
    %c224 = arith.constant 224 : index
    %c0_64 = arith.constant 0 : index
    %198 = vector.load %arg3[%c224, %c0_64] : memref<632x128xf32, #tpu.memory_space<vmem>>, vector<32x32xf32>
    %c256 = arith.constant 256 : index
    %c0_65 = arith.constant 0 : index
    %199 = vector.load %arg3[%c256, %c0_65] : memref<632x128xf32, #tpu.memory_space<vmem>>, vector<1x32xf32>
    %c264 = arith.constant 264 : index
    %c0_66 = arith.constant 0 : index
    %200 = vector.load %arg3[%c264, %c0_66] : memref<632x128xf32, #tpu.memory_space<vmem>>, vector<32x64xf32>
    %c296 = arith.constant 296 : index
    %c0_67 = arith.constant 0 : index
    %201 = vector.load %arg3[%c296, %c0_67] : memref<632x128xf32, #tpu.memory_space<vmem>>, vector<1x64xf32>
    %c304 = arith.constant 304 : index
    %c0_68 = arith.constant 0 : index
    %202 = vector.load %arg3[%c304, %c0_68] : memref<632x128xf32, #tpu.memory_space<vmem>>, vector<32x32xf32>
    %c336 = arith.constant 336 : index
    %c0_69 = arith.constant 0 : index
    %203 = vector.load %arg3[%c336, %c0_69] : memref<632x128xf32, #tpu.memory_space<vmem>>, vector<1x32xf32>
    %cst_70 = arith.constant dense<0.000000e+00> : vector<8x32xf32>
    %204 = tpu.matmul %197, %198, %cst_70 {dimension_numbers = #tpu.dot_dimension_numbers<[1], [0], [0], [1], [0, 0, 1, 1], [], []>} : vector<8x32xf32>, vector<32x32xf32>, vector<8x32xf32> -> vector<8x32xf32>
    %205 = vector.broadcast %199 : vector<1x32xf32> to vector<8x32xf32>
    %206 = arith.addf %204, %205 : vector<8x32xf32>
    %cst_71 = arith.constant dense<0.000000e+00> : vector<8x64xf32>
    %207 = tpu.matmul %196, %200, %cst_71 {dimension_numbers = #tpu.dot_dimension_numbers<[1], [0], [0], [1], [0, 0, 1, 1], [], []>} : vector<8x32xf32>, vector<32x64xf32>, vector<8x64xf32> -> vector<8x64xf32>
    %208 = vector.broadcast %201 : vector<1x64xf32> to vector<8x64xf32>
    %209 = arith.addf %207, %208 : vector<8x64xf32>
    %210 = vector.extract_strided_slice %209 {offsets = [0, 0], sizes = [8, 32], strides = [1, 1]} : vector<8x64xf32> to vector<8x32xf32>
    %211 = vector.extract_strided_slice %209 {offsets = [0, 32], sizes = [8, 32], strides = [1, 1]} : vector<8x64xf32> to vector<8x32xf32>
    %212 = vector.extract_strided_slice %206 {offsets = [0, 0], sizes = [8, 8], strides = [1, 1]} : vector<8x32xf32> to vector<8x8xf32>
    %213 = vector.extract_strided_slice %210 {offsets = [0, 0], sizes = [8, 8], strides = [1, 1]} : vector<8x32xf32> to vector<8x8xf32>
    %214 = vector.extract_strided_slice %211 {offsets = [0, 0], sizes = [8, 8], strides = [1, 1]} : vector<8x32xf32> to vector<8x8xf32>
    %215 = tpu.transpose %213, [1, 0] : vector<8x8xf32> -> vector<8x8xf32>
    %cst_72 = arith.constant dense<0.000000e+00> : vector<8x8xf32>
    %216 = tpu.matmul %212, %215, %cst_72 {dimension_numbers = #tpu.dot_dimension_numbers<[1], [0], [0], [1], [0, 0, 1, 1], [], []>} : vector<8x8xf32>, vector<8x8xf32>, vector<8x8xf32> -> vector<8x8xf32>
    %cst_73 = arith.constant 0.176776692 : f32
    %217 = vector.broadcast %cst_73 : f32 to vector<8x8xf32>
    %218 = arith.mulf %216, %217 : vector<8x8xf32>
    %cst_74 = arith.constant dense<0xFF800000> : vector<8xf32>
    %219 = vector.multi_reduction <maximumf>, %218, %cst_74 [1] : vector<8x8xf32> to vector<8xf32>
    %220 = vector.shape_cast %219 : vector<8xf32> to vector<8x1xf32>
    %221 = vector.broadcast %220 : vector<8x1xf32> to vector<8x8xf32>
    %222 = arith.subf %218, %221 : vector<8x8xf32>
    %223 = math.exp %222 : vector<8x8xf32>
    %cst_75 = arith.constant dense<0.000000e+00> : vector<8xf32>
    %224 = vector.multi_reduction <add>, %223, %cst_75 [1] : vector<8x8xf32> to vector<8xf32>
    %225 = vector.shape_cast %224 : vector<8xf32> to vector<8x1xf32>
    %226 = tpu.reciprocal %225 : vector<8x1xf32> -> vector<8x1xf32>
    %227 = vector.broadcast %226 : vector<8x1xf32> to vector<8x8xf32>
    %228 = arith.mulf %223, %227 : vector<8x8xf32>
    %cst_76 = arith.constant dense<0.000000e+00> : vector<8x8xf32>
    %229 = tpu.matmul %228, %214, %cst_76 {dimension_numbers = #tpu.dot_dimension_numbers<[1], [0], [0], [1], [0, 0, 1, 1], [], []>} : vector<8x8xf32>, vector<8x8xf32>, vector<8x8xf32> -> vector<8x8xf32>
    %230 = arith.addf %212, %229 : vector<8x8xf32>
    %231 = vector.extract_strided_slice %206 {offsets = [0, 8], sizes = [8, 8], strides = [1, 1]} : vector<8x32xf32> to vector<8x8xf32>
    %232 = vector.extract_strided_slice %210 {offsets = [0, 8], sizes = [8, 8], strides = [1, 1]} : vector<8x32xf32> to vector<8x8xf32>
    %233 = vector.extract_strided_slice %211 {offsets = [0, 8], sizes = [8, 8], strides = [1, 1]} : vector<8x32xf32> to vector<8x8xf32>
    %234 = tpu.transpose %232, [1, 0] : vector<8x8xf32> -> vector<8x8xf32>
    %cst_77 = arith.constant dense<0.000000e+00> : vector<8x8xf32>
    %235 = tpu.matmul %231, %234, %cst_77 {dimension_numbers = #tpu.dot_dimension_numbers<[1], [0], [0], [1], [0, 0, 1, 1], [], []>} : vector<8x8xf32>, vector<8x8xf32>, vector<8x8xf32> -> vector<8x8xf32>
    %cst_78 = arith.constant 0.176776692 : f32
    %236 = vector.broadcast %cst_78 : f32 to vector<8x8xf32>
    %237 = arith.mulf %235, %236 : vector<8x8xf32>
    %cst_79 = arith.constant dense<0xFF800000> : vector<8xf32>
    %238 = vector.multi_reduction <maximumf>, %237, %cst_79 [1] : vector<8x8xf32> to vector<8xf32>
    %239 = vector.shape_cast %238 : vector<8xf32> to vector<8x1xf32>
    %240 = vector.broadcast %239 : vector<8x1xf32> to vector<8x8xf32>
    %241 = arith.subf %237, %240 : vector<8x8xf32>
    %242 = math.exp %241 : vector<8x8xf32>
    %cst_80 = arith.constant dense<0.000000e+00> : vector<8xf32>
    %243 = vector.multi_reduction <add>, %242, %cst_80 [1] : vector<8x8xf32> to vector<8xf32>
    %244 = vector.shape_cast %243 : vector<8xf32> to vector<8x1xf32>
    %245 = tpu.reciprocal %244 : vector<8x1xf32> -> vector<8x1xf32>
    %246 = vector.broadcast %245 : vector<8x1xf32> to vector<8x8xf32>
    %247 = arith.mulf %242, %246 : vector<8x8xf32>
    %cst_81 = arith.constant dense<0.000000e+00> : vector<8x8xf32>
    %248 = tpu.matmul %247, %233, %cst_81 {dimension_numbers = #tpu.dot_dimension_numbers<[1], [0], [0], [1], [0, 0, 1, 1], [], []>} : vector<8x8xf32>, vector<8x8xf32>, vector<8x8xf32> -> vector<8x8xf32>
    %249 = arith.addf %231, %248 : vector<8x8xf32>
    %250 = vector.extract_strided_slice %206 {offsets = [0, 16], sizes = [8, 8], strides = [1, 1]} : vector<8x32xf32> to vector<8x8xf32>
    %251 = vector.extract_strided_slice %210 {offsets = [0, 16], sizes = [8, 8], strides = [1, 1]} : vector<8x32xf32> to vector<8x8xf32>
    %252 = vector.extract_strided_slice %211 {offsets = [0, 16], sizes = [8, 8], strides = [1, 1]} : vector<8x32xf32> to vector<8x8xf32>
    %253 = tpu.transpose %251, [1, 0] : vector<8x8xf32> -> vector<8x8xf32>
    %cst_82 = arith.constant dense<0.000000e+00> : vector<8x8xf32>
    %254 = tpu.matmul %250, %253, %cst_82 {dimension_numbers = #tpu.dot_dimension_numbers<[1], [0], [0], [1], [0, 0, 1, 1], [], []>} : vector<8x8xf32>, vector<8x8xf32>, vector<8x8xf32> -> vector<8x8xf32>
    %cst_83 = arith.constant 0.176776692 : f32
    %255 = vector.broadcast %cst_83 : f32 to vector<8x8xf32>
    %256 = arith.mulf %254, %255 : vector<8x8xf32>
    %cst_84 = arith.constant dense<0xFF800000> : vector<8xf32>
    %257 = vector.multi_reduction <maximumf>, %256, %cst_84 [1] : vector<8x8xf32> to vector<8xf32>
    %258 = vector.shape_cast %257 : vector<8xf32> to vector<8x1xf32>
    %259 = vector.broadcast %258 : vector<8x1xf32> to vector<8x8xf32>
    %260 = arith.subf %256, %259 : vector<8x8xf32>
    %261 = math.exp %260 : vector<8x8xf32>
    %cst_85 = arith.constant dense<0.000000e+00> : vector<8xf32>
    %262 = vector.multi_reduction <add>, %261, %cst_85 [1] : vector<8x8xf32> to vector<8xf32>
    %263 = vector.shape_cast %262 : vector<8xf32> to vector<8x1xf32>
    %264 = tpu.reciprocal %263 : vector<8x1xf32> -> vector<8x1xf32>
    %265 = vector.broadcast %264 : vector<8x1xf32> to vector<8x8xf32>
    %266 = arith.mulf %261, %265 : vector<8x8xf32>
    %cst_86 = arith.constant dense<0.000000e+00> : vector<8x8xf32>
    %267 = tpu.matmul %266, %252, %cst_86 {dimension_numbers = #tpu.dot_dimension_numbers<[1], [0], [0], [1], [0, 0, 1, 1], [], []>} : vector<8x8xf32>, vector<8x8xf32>, vector<8x8xf32> -> vector<8x8xf32>
    %268 = arith.addf %250, %267 : vector<8x8xf32>
    %269 = vector.extract_strided_slice %206 {offsets = [0, 24], sizes = [8, 8], strides = [1, 1]} : vector<8x32xf32> to vector<8x8xf32>
    %270 = vector.extract_strided_slice %210 {offsets = [0, 24], sizes = [8, 8], strides = [1, 1]} : vector<8x32xf32> to vector<8x8xf32>
    %271 = vector.extract_strided_slice %211 {offsets = [0, 24], sizes = [8, 8], strides = [1, 1]} : vector<8x32xf32> to vector<8x8xf32>
    %272 = tpu.transpose %270, [1, 0] : vector<8x8xf32> -> vector<8x8xf32>
    %cst_87 = arith.constant dense<0.000000e+00> : vector<8x8xf32>
    %273 = tpu.matmul %269, %272, %cst_87 {dimension_numbers = #tpu.dot_dimension_numbers<[1], [0], [0], [1], [0, 0, 1, 1], [], []>} : vector<8x8xf32>, vector<8x8xf32>, vector<8x8xf32> -> vector<8x8xf32>
    %cst_88 = arith.constant 0.176776692 : f32
    %274 = vector.broadcast %cst_88 : f32 to vector<8x8xf32>
    %275 = arith.mulf %273, %274 : vector<8x8xf32>
    %cst_89 = arith.constant dense<0xFF800000> : vector<8xf32>
    %276 = vector.multi_reduction <maximumf>, %275, %cst_89 [1] : vector<8x8xf32> to vector<8xf32>
    %277 = vector.shape_cast %276 : vector<8xf32> to vector<8x1xf32>
    %278 = vector.broadcast %277 : vector<8x1xf32> to vector<8x8xf32>
    %279 = arith.subf %275, %278 : vector<8x8xf32>
    %280 = math.exp %279 : vector<8x8xf32>
    %cst_90 = arith.constant dense<0.000000e+00> : vector<8xf32>
    %281 = vector.multi_reduction <add>, %280, %cst_90 [1] : vector<8x8xf32> to vector<8xf32>
    %282 = vector.shape_cast %281 : vector<8xf32> to vector<8x1xf32>
    %283 = tpu.reciprocal %282 : vector<8x1xf32> -> vector<8x1xf32>
    %284 = vector.broadcast %283 : vector<8x1xf32> to vector<8x8xf32>
    %285 = arith.mulf %280, %284 : vector<8x8xf32>
    %cst_91 = arith.constant dense<0.000000e+00> : vector<8x8xf32>
    %286 = tpu.matmul %285, %271, %cst_91 {dimension_numbers = #tpu.dot_dimension_numbers<[1], [0], [0], [1], [0, 0, 1, 1], [], []>} : vector<8x8xf32>, vector<8x8xf32>, vector<8x8xf32> -> vector<8x8xf32>
    %287 = arith.addf %269, %286 : vector<8x8xf32>
    %288 = tpu.concatenate %230, %249, %268, %287 in 1 : vector<8x8xf32>, vector<8x8xf32>, vector<8x8xf32>, vector<8x8xf32> -> vector<8x32xf32>
    %cst_92 = arith.constant dense<0.000000e+00> : vector<8x32xf32>
    %289 = tpu.matmul %288, %202, %cst_92 {dimension_numbers = #tpu.dot_dimension_numbers<[1], [0], [0], [1], [0, 0, 1, 1], [], []>} : vector<8x32xf32>, vector<32x32xf32>, vector<8x32xf32> -> vector<8x32xf32>
    %290 = vector.broadcast %203 : vector<1x32xf32> to vector<8x32xf32>
    %291 = arith.addf %289, %290 : vector<8x32xf32>
    %cst_93 = arith.constant 0.000000e+00 : f32
    %292 = vector.broadcast %cst_93 : f32 to vector<8x32xf32>
    %293 = arith.maximumf %291, %292 : vector<8x32xf32>
    %294 = arith.addf %288, %293 : vector<8x32xf32>
    %c344 = arith.constant 344 : index
    %c0_94 = arith.constant 0 : index
    %295 = vector.load %arg3[%c344, %c0_94] : memref<632x128xf32, #tpu.memory_space<vmem>>, vector<32x32xf32>
    %c376 = arith.constant 376 : index
    %c0_95 = arith.constant 0 : index
    %296 = vector.load %arg3[%c376, %c0_95] : memref<632x128xf32, #tpu.memory_space<vmem>>, vector<1x32xf32>
    %c384 = arith.constant 384 : index
    %c0_96 = arith.constant 0 : index
    %297 = vector.load %arg3[%c384, %c0_96] : memref<632x128xf32, #tpu.memory_space<vmem>>, vector<32x64xf32>
    %c416 = arith.constant 416 : index
    %c0_97 = arith.constant 0 : index
    %298 = vector.load %arg3[%c416, %c0_97] : memref<632x128xf32, #tpu.memory_space<vmem>>, vector<1x64xf32>
    %c424 = arith.constant 424 : index
    %c0_98 = arith.constant 0 : index
    %299 = vector.load %arg3[%c424, %c0_98] : memref<632x128xf32, #tpu.memory_space<vmem>>, vector<32x32xf32>
    %c456 = arith.constant 456 : index
    %c0_99 = arith.constant 0 : index
    %300 = vector.load %arg3[%c456, %c0_99] : memref<632x128xf32, #tpu.memory_space<vmem>>, vector<1x32xf32>
    %cst_100 = arith.constant dense<0.000000e+00> : vector<8x32xf32>
    %301 = tpu.matmul %196, %295, %cst_100 {dimension_numbers = #tpu.dot_dimension_numbers<[1], [0], [0], [1], [0, 0, 1, 1], [], []>} : vector<8x32xf32>, vector<32x32xf32>, vector<8x32xf32> -> vector<8x32xf32>
    %302 = vector.broadcast %296 : vector<1x32xf32> to vector<8x32xf32>
    %303 = arith.addf %301, %302 : vector<8x32xf32>
    %cst_101 = arith.constant dense<0.000000e+00> : vector<8x64xf32>
    %304 = tpu.matmul %294, %297, %cst_101 {dimension_numbers = #tpu.dot_dimension_numbers<[1], [0], [0], [1], [0, 0, 1, 1], [], []>} : vector<8x32xf32>, vector<32x64xf32>, vector<8x64xf32> -> vector<8x64xf32>
    %305 = vector.broadcast %298 : vector<1x64xf32> to vector<8x64xf32>
    %306 = arith.addf %304, %305 : vector<8x64xf32>
    %307 = vector.extract_strided_slice %306 {offsets = [0, 0], sizes = [8, 32], strides = [1, 1]} : vector<8x64xf32> to vector<8x32xf32>
    %308 = vector.extract_strided_slice %306 {offsets = [0, 32], sizes = [8, 32], strides = [1, 1]} : vector<8x64xf32> to vector<8x32xf32>
    %309 = vector.extract_strided_slice %303 {offsets = [0, 0], sizes = [8, 8], strides = [1, 1]} : vector<8x32xf32> to vector<8x8xf32>
    %310 = vector.extract_strided_slice %307 {offsets = [0, 0], sizes = [8, 8], strides = [1, 1]} : vector<8x32xf32> to vector<8x8xf32>
    %311 = vector.extract_strided_slice %308 {offsets = [0, 0], sizes = [8, 8], strides = [1, 1]} : vector<8x32xf32> to vector<8x8xf32>
    %312 = tpu.transpose %310, [1, 0] : vector<8x8xf32> -> vector<8x8xf32>
    %cst_102 = arith.constant dense<0.000000e+00> : vector<8x8xf32>
    %313 = tpu.matmul %309, %312, %cst_102 {dimension_numbers = #tpu.dot_dimension_numbers<[1], [0], [0], [1], [0, 0, 1, 1], [], []>} : vector<8x8xf32>, vector<8x8xf32>, vector<8x8xf32> -> vector<8x8xf32>
    %cst_103 = arith.constant 0.176776692 : f32
    %314 = vector.broadcast %cst_103 : f32 to vector<8x8xf32>
    %315 = arith.mulf %313, %314 : vector<8x8xf32>
    %cst_104 = arith.constant dense<0xFF800000> : vector<8xf32>
    %316 = vector.multi_reduction <maximumf>, %315, %cst_104 [1] : vector<8x8xf32> to vector<8xf32>
    %317 = vector.shape_cast %316 : vector<8xf32> to vector<8x1xf32>
    %318 = vector.broadcast %317 : vector<8x1xf32> to vector<8x8xf32>
    %319 = arith.subf %315, %318 : vector<8x8xf32>
    %320 = math.exp %319 : vector<8x8xf32>
    %cst_105 = arith.constant dense<0.000000e+00> : vector<8xf32>
    %321 = vector.multi_reduction <add>, %320, %cst_105 [1] : vector<8x8xf32> to vector<8xf32>
    %322 = vector.shape_cast %321 : vector<8xf32> to vector<8x1xf32>
    %323 = tpu.reciprocal %322 : vector<8x1xf32> -> vector<8x1xf32>
    %324 = vector.broadcast %323 : vector<8x1xf32> to vector<8x8xf32>
    %325 = arith.mulf %320, %324 : vector<8x8xf32>
    %cst_106 = arith.constant dense<0.000000e+00> : vector<8x8xf32>
    %326 = tpu.matmul %325, %311, %cst_106 {dimension_numbers = #tpu.dot_dimension_numbers<[1], [0], [0], [1], [0, 0, 1, 1], [], []>} : vector<8x8xf32>, vector<8x8xf32>, vector<8x8xf32> -> vector<8x8xf32>
    %327 = arith.addf %309, %326 : vector<8x8xf32>
    %328 = vector.extract_strided_slice %303 {offsets = [0, 8], sizes = [8, 8], strides = [1, 1]} : vector<8x32xf32> to vector<8x8xf32>
    %329 = vector.extract_strided_slice %307 {offsets = [0, 8], sizes = [8, 8], strides = [1, 1]} : vector<8x32xf32> to vector<8x8xf32>
    %330 = vector.extract_strided_slice %308 {offsets = [0, 8], sizes = [8, 8], strides = [1, 1]} : vector<8x32xf32> to vector<8x8xf32>
    %331 = tpu.transpose %329, [1, 0] : vector<8x8xf32> -> vector<8x8xf32>
    %cst_107 = arith.constant dense<0.000000e+00> : vector<8x8xf32>
    %332 = tpu.matmul %328, %331, %cst_107 {dimension_numbers = #tpu.dot_dimension_numbers<[1], [0], [0], [1], [0, 0, 1, 1], [], []>} : vector<8x8xf32>, vector<8x8xf32>, vector<8x8xf32> -> vector<8x8xf32>
    %cst_108 = arith.constant 0.176776692 : f32
    %333 = vector.broadcast %cst_108 : f32 to vector<8x8xf32>
    %334 = arith.mulf %332, %333 : vector<8x8xf32>
    %cst_109 = arith.constant dense<0xFF800000> : vector<8xf32>
    %335 = vector.multi_reduction <maximumf>, %334, %cst_109 [1] : vector<8x8xf32> to vector<8xf32>
    %336 = vector.shape_cast %335 : vector<8xf32> to vector<8x1xf32>
    %337 = vector.broadcast %336 : vector<8x1xf32> to vector<8x8xf32>
    %338 = arith.subf %334, %337 : vector<8x8xf32>
    %339 = math.exp %338 : vector<8x8xf32>
    %cst_110 = arith.constant dense<0.000000e+00> : vector<8xf32>
    %340 = vector.multi_reduction <add>, %339, %cst_110 [1] : vector<8x8xf32> to vector<8xf32>
    %341 = vector.shape_cast %340 : vector<8xf32> to vector<8x1xf32>
    %342 = tpu.reciprocal %341 : vector<8x1xf32> -> vector<8x1xf32>
    %343 = vector.broadcast %342 : vector<8x1xf32> to vector<8x8xf32>
    %344 = arith.mulf %339, %343 : vector<8x8xf32>
    %cst_111 = arith.constant dense<0.000000e+00> : vector<8x8xf32>
    %345 = tpu.matmul %344, %330, %cst_111 {dimension_numbers = #tpu.dot_dimension_numbers<[1], [0], [0], [1], [0, 0, 1, 1], [], []>} : vector<8x8xf32>, vector<8x8xf32>, vector<8x8xf32> -> vector<8x8xf32>
    %346 = arith.addf %328, %345 : vector<8x8xf32>
    %347 = vector.extract_strided_slice %303 {offsets = [0, 16], sizes = [8, 8], strides = [1, 1]} : vector<8x32xf32> to vector<8x8xf32>
    %348 = vector.extract_strided_slice %307 {offsets = [0, 16], sizes = [8, 8], strides = [1, 1]} : vector<8x32xf32> to vector<8x8xf32>
    %349 = vector.extract_strided_slice %308 {offsets = [0, 16], sizes = [8, 8], strides = [1, 1]} : vector<8x32xf32> to vector<8x8xf32>
    %350 = tpu.transpose %348, [1, 0] : vector<8x8xf32> -> vector<8x8xf32>
    %cst_112 = arith.constant dense<0.000000e+00> : vector<8x8xf32>
    %351 = tpu.matmul %347, %350, %cst_112 {dimension_numbers = #tpu.dot_dimension_numbers<[1], [0], [0], [1], [0, 0, 1, 1], [], []>} : vector<8x8xf32>, vector<8x8xf32>, vector<8x8xf32> -> vector<8x8xf32>
    %cst_113 = arith.constant 0.176776692 : f32
    %352 = vector.broadcast %cst_113 : f32 to vector<8x8xf32>
    %353 = arith.mulf %351, %352 : vector<8x8xf32>
    %cst_114 = arith.constant dense<0xFF800000> : vector<8xf32>
    %354 = vector.multi_reduction <maximumf>, %353, %cst_114 [1] : vector<8x8xf32> to vector<8xf32>
    %355 = vector.shape_cast %354 : vector<8xf32> to vector<8x1xf32>
    %356 = vector.broadcast %355 : vector<8x1xf32> to vector<8x8xf32>
    %357 = arith.subf %353, %356 : vector<8x8xf32>
    %358 = math.exp %357 : vector<8x8xf32>
    %cst_115 = arith.constant dense<0.000000e+00> : vector<8xf32>
    %359 = vector.multi_reduction <add>, %358, %cst_115 [1] : vector<8x8xf32> to vector<8xf32>
    %360 = vector.shape_cast %359 : vector<8xf32> to vector<8x1xf32>
    %361 = tpu.reciprocal %360 : vector<8x1xf32> -> vector<8x1xf32>
    %362 = vector.broadcast %361 : vector<8x1xf32> to vector<8x8xf32>
    %363 = arith.mulf %358, %362 : vector<8x8xf32>
    %cst_116 = arith.constant dense<0.000000e+00> : vector<8x8xf32>
    %364 = tpu.matmul %363, %349, %cst_116 {dimension_numbers = #tpu.dot_dimension_numbers<[1], [0], [0], [1], [0, 0, 1, 1], [], []>} : vector<8x8xf32>, vector<8x8xf32>, vector<8x8xf32> -> vector<8x8xf32>
    %365 = arith.addf %347, %364 : vector<8x8xf32>
    %366 = vector.extract_strided_slice %303 {offsets = [0, 24], sizes = [8, 8], strides = [1, 1]} : vector<8x32xf32> to vector<8x8xf32>
    %367 = vector.extract_strided_slice %307 {offsets = [0, 24], sizes = [8, 8], strides = [1, 1]} : vector<8x32xf32> to vector<8x8xf32>
    %368 = vector.extract_strided_slice %308 {offsets = [0, 24], sizes = [8, 8], strides = [1, 1]} : vector<8x32xf32> to vector<8x8xf32>
    %369 = tpu.transpose %367, [1, 0] : vector<8x8xf32> -> vector<8x8xf32>
    %cst_117 = arith.constant dense<0.000000e+00> : vector<8x8xf32>
    %370 = tpu.matmul %366, %369, %cst_117 {dimension_numbers = #tpu.dot_dimension_numbers<[1], [0], [0], [1], [0, 0, 1, 1], [], []>} : vector<8x8xf32>, vector<8x8xf32>, vector<8x8xf32> -> vector<8x8xf32>
    %cst_118 = arith.constant 0.176776692 : f32
    %371 = vector.broadcast %cst_118 : f32 to vector<8x8xf32>
    %372 = arith.mulf %370, %371 : vector<8x8xf32>
    %cst_119 = arith.constant dense<0xFF800000> : vector<8xf32>
    %373 = vector.multi_reduction <maximumf>, %372, %cst_119 [1] : vector<8x8xf32> to vector<8xf32>
    %374 = vector.shape_cast %373 : vector<8xf32> to vector<8x1xf32>
    %375 = vector.broadcast %374 : vector<8x1xf32> to vector<8x8xf32>
    %376 = arith.subf %372, %375 : vector<8x8xf32>
    %377 = math.exp %376 : vector<8x8xf32>
    %cst_120 = arith.constant dense<0.000000e+00> : vector<8xf32>
    %378 = vector.multi_reduction <add>, %377, %cst_120 [1] : vector<8x8xf32> to vector<8xf32>
    %379 = vector.shape_cast %378 : vector<8xf32> to vector<8x1xf32>
    %380 = tpu.reciprocal %379 : vector<8x1xf32> -> vector<8x1xf32>
    %381 = vector.broadcast %380 : vector<8x1xf32> to vector<8x8xf32>
    %382 = arith.mulf %377, %381 : vector<8x8xf32>
    %cst_121 = arith.constant dense<0.000000e+00> : vector<8x8xf32>
    %383 = tpu.matmul %382, %368, %cst_121 {dimension_numbers = #tpu.dot_dimension_numbers<[1], [0], [0], [1], [0, 0, 1, 1], [], []>} : vector<8x8xf32>, vector<8x8xf32>, vector<8x8xf32> -> vector<8x8xf32>
    %384 = arith.addf %366, %383 : vector<8x8xf32>
    %385 = tpu.concatenate %327, %346, %365, %384 in 1 : vector<8x8xf32>, vector<8x8xf32>, vector<8x8xf32>, vector<8x8xf32> -> vector<8x32xf32>
    %cst_122 = arith.constant dense<0.000000e+00> : vector<8x32xf32>
    %386 = tpu.matmul %385, %299, %cst_122 {dimension_numbers = #tpu.dot_dimension_numbers<[1], [0], [0], [1], [0, 0, 1, 1], [], []>} : vector<8x32xf32>, vector<32x32xf32>, vector<8x32xf32> -> vector<8x32xf32>
    %387 = vector.broadcast %300 : vector<1x32xf32> to vector<8x32xf32>
    %388 = arith.addf %386, %387 : vector<8x32xf32>
    %cst_123 = arith.constant 0.000000e+00 : f32
    %389 = vector.broadcast %cst_123 : f32 to vector<8x32xf32>
    %390 = arith.maximumf %388, %389 : vector<8x32xf32>
    %391 = arith.addf %385, %390 : vector<8x32xf32>
    %c0_124 = arith.constant 0 : index
    %c0_125 = arith.constant 0 : index
    %c0_126 = arith.constant 0 : index
    %392 = vector.load %arg2[%c0_124, %c0_125, %c0_126] : memref<1x8x16xf32, #tpu.memory_space<vmem>>, vector<1x8x16xf32>
    %393 = vector.shape_cast %392 : vector<1x8x16xf32> to vector<8x16xf32>
    %c0_127 = arith.constant 0 : index
    %c0_128 = arith.constant 0 : index
    %394 = vector.load %arg3[%c0_127, %c0_128] : memref<632x128xf32, #tpu.memory_space<vmem>>, vector<8x32xf32>
    %c8_129 = arith.constant 8 : index
    %c0_130 = arith.constant 0 : index
    %395 = vector.load %arg3[%c8_129, %c0_130] : memref<632x128xf32, #tpu.memory_space<vmem>>, vector<32x32xf32>
    %c40_131 = arith.constant 40 : index
    %c0_132 = arith.constant 0 : index
    %396 = vector.load %arg3[%c40_131, %c0_132] : memref<632x128xf32, #tpu.memory_space<vmem>>, vector<1x32xf32>
    %c48_133 = arith.constant 48 : index
    %c0_134 = arith.constant 0 : index
    %397 = vector.load %arg3[%c48_133, %c0_134] : memref<632x128xf32, #tpu.memory_space<vmem>>, vector<16x64xf32>
    %c64_135 = arith.constant 64 : index
    %c0_136 = arith.constant 0 : index
    %398 = vector.load %arg3[%c64_135, %c0_136] : memref<632x128xf32, #tpu.memory_space<vmem>>, vector<1x64xf32>
    %c72_137 = arith.constant 72 : index
    %c0_138 = arith.constant 0 : index
    %399 = vector.load %arg3[%c72_137, %c0_138] : memref<632x128xf32, #tpu.memory_space<vmem>>, vector<32x32xf32>
    %c104_139 = arith.constant 104 : index
    %c0_140 = arith.constant 0 : index
    %400 = vector.load %arg3[%c104_139, %c0_140] : memref<632x128xf32, #tpu.memory_space<vmem>>, vector<1x32xf32>
    %cst_141 = arith.constant dense<0.000000e+00> : vector<8x32xf32>
    %401 = tpu.matmul %394, %395, %cst_141 {dimension_numbers = #tpu.dot_dimension_numbers<[1], [0], [0], [1], [0, 0, 1, 1], [], []>} : vector<8x32xf32>, vector<32x32xf32>, vector<8x32xf32> -> vector<8x32xf32>
    %402 = vector.broadcast %396 : vector<1x32xf32> to vector<8x32xf32>
    %403 = arith.addf %401, %402 : vector<8x32xf32>
    %cst_142 = arith.constant dense<0.000000e+00> : vector<8x64xf32>
    %404 = tpu.matmul %393, %397, %cst_142 {dimension_numbers = #tpu.dot_dimension_numbers<[1], [0], [0], [1], [0, 0, 1, 1], [], []>} : vector<8x16xf32>, vector<16x64xf32>, vector<8x64xf32> -> vector<8x64xf32>
    %405 = vector.broadcast %398 : vector<1x64xf32> to vector<8x64xf32>
    %406 = arith.addf %404, %405 : vector<8x64xf32>
    %407 = vector.extract_strided_slice %406 {offsets = [0, 0], sizes = [8, 32], strides = [1, 1]} : vector<8x64xf32> to vector<8x32xf32>
    %408 = vector.extract_strided_slice %406 {offsets = [0, 32], sizes = [8, 32], strides = [1, 1]} : vector<8x64xf32> to vector<8x32xf32>
    %409 = vector.extract_strided_slice %403 {offsets = [0, 0], sizes = [8, 8], strides = [1, 1]} : vector<8x32xf32> to vector<8x8xf32>
    %410 = vector.extract_strided_slice %407 {offsets = [0, 0], sizes = [8, 8], strides = [1, 1]} : vector<8x32xf32> to vector<8x8xf32>
    %411 = vector.extract_strided_slice %408 {offsets = [0, 0], sizes = [8, 8], strides = [1, 1]} : vector<8x32xf32> to vector<8x8xf32>
    %412 = tpu.transpose %410, [1, 0] : vector<8x8xf32> -> vector<8x8xf32>
    %cst_143 = arith.constant dense<0.000000e+00> : vector<8x8xf32>
    %413 = tpu.matmul %409, %412, %cst_143 {dimension_numbers = #tpu.dot_dimension_numbers<[1], [0], [0], [1], [0, 0, 1, 1], [], []>} : vector<8x8xf32>, vector<8x8xf32>, vector<8x8xf32> -> vector<8x8xf32>
    %cst_144 = arith.constant 0.176776692 : f32
    %414 = vector.broadcast %cst_144 : f32 to vector<8x8xf32>
    %415 = arith.mulf %413, %414 : vector<8x8xf32>
    %cst_145 = arith.constant dense<0xFF800000> : vector<8xf32>
    %416 = vector.multi_reduction <maximumf>, %415, %cst_145 [1] : vector<8x8xf32> to vector<8xf32>
    %417 = vector.shape_cast %416 : vector<8xf32> to vector<8x1xf32>
    %418 = vector.broadcast %417 : vector<8x1xf32> to vector<8x8xf32>
    %419 = arith.subf %415, %418 : vector<8x8xf32>
    %420 = math.exp %419 : vector<8x8xf32>
    %cst_146 = arith.constant dense<0.000000e+00> : vector<8xf32>
    %421 = vector.multi_reduction <add>, %420, %cst_146 [1] : vector<8x8xf32> to vector<8xf32>
    %422 = vector.shape_cast %421 : vector<8xf32> to vector<8x1xf32>
    %423 = tpu.reciprocal %422 : vector<8x1xf32> -> vector<8x1xf32>
    %424 = vector.broadcast %423 : vector<8x1xf32> to vector<8x8xf32>
    %425 = arith.mulf %420, %424 : vector<8x8xf32>
    %cst_147 = arith.constant dense<0.000000e+00> : vector<8x8xf32>
    %426 = tpu.matmul %425, %411, %cst_147 {dimension_numbers = #tpu.dot_dimension_numbers<[1], [0], [0], [1], [0, 0, 1, 1], [], []>} : vector<8x8xf32>, vector<8x8xf32>, vector<8x8xf32> -> vector<8x8xf32>
    %427 = arith.addf %409, %426 : vector<8x8xf32>
    %428 = vector.extract_strided_slice %403 {offsets = [0, 8], sizes = [8, 8], strides = [1, 1]} : vector<8x32xf32> to vector<8x8xf32>
    %429 = vector.extract_strided_slice %407 {offsets = [0, 8], sizes = [8, 8], strides = [1, 1]} : vector<8x32xf32> to vector<8x8xf32>
    %430 = vector.extract_strided_slice %408 {offsets = [0, 8], sizes = [8, 8], strides = [1, 1]} : vector<8x32xf32> to vector<8x8xf32>
    %431 = tpu.transpose %429, [1, 0] : vector<8x8xf32> -> vector<8x8xf32>
    %cst_148 = arith.constant dense<0.000000e+00> : vector<8x8xf32>
    %432 = tpu.matmul %428, %431, %cst_148 {dimension_numbers = #tpu.dot_dimension_numbers<[1], [0], [0], [1], [0, 0, 1, 1], [], []>} : vector<8x8xf32>, vector<8x8xf32>, vector<8x8xf32> -> vector<8x8xf32>
    %cst_149 = arith.constant 0.176776692 : f32
    %433 = vector.broadcast %cst_149 : f32 to vector<8x8xf32>
    %434 = arith.mulf %432, %433 : vector<8x8xf32>
    %cst_150 = arith.constant dense<0xFF800000> : vector<8xf32>
    %435 = vector.multi_reduction <maximumf>, %434, %cst_150 [1] : vector<8x8xf32> to vector<8xf32>
    %436 = vector.shape_cast %435 : vector<8xf32> to vector<8x1xf32>
    %437 = vector.broadcast %436 : vector<8x1xf32> to vector<8x8xf32>
    %438 = arith.subf %434, %437 : vector<8x8xf32>
    %439 = math.exp %438 : vector<8x8xf32>
    %cst_151 = arith.constant dense<0.000000e+00> : vector<8xf32>
    %440 = vector.multi_reduction <add>, %439, %cst_151 [1] : vector<8x8xf32> to vector<8xf32>
    %441 = vector.shape_cast %440 : vector<8xf32> to vector<8x1xf32>
    %442 = tpu.reciprocal %441 : vector<8x1xf32> -> vector<8x1xf32>
    %443 = vector.broadcast %442 : vector<8x1xf32> to vector<8x8xf32>
    %444 = arith.mulf %439, %443 : vector<8x8xf32>
    %cst_152 = arith.constant dense<0.000000e+00> : vector<8x8xf32>
    %445 = tpu.matmul %444, %430, %cst_152 {dimension_numbers = #tpu.dot_dimension_numbers<[1], [0], [0], [1], [0, 0, 1, 1], [], []>} : vector<8x8xf32>, vector<8x8xf32>, vector<8x8xf32> -> vector<8x8xf32>
    %446 = arith.addf %428, %445 : vector<8x8xf32>
    %447 = vector.extract_strided_slice %403 {offsets = [0, 16], sizes = [8, 8], strides = [1, 1]} : vector<8x32xf32> to vector<8x8xf32>
    %448 = vector.extract_strided_slice %407 {offsets = [0, 16], sizes = [8, 8], strides = [1, 1]} : vector<8x32xf32> to vector<8x8xf32>
    %449 = vector.extract_strided_slice %408 {offsets = [0, 16], sizes = [8, 8], strides = [1, 1]} : vector<8x32xf32> to vector<8x8xf32>
    %450 = tpu.transpose %448, [1, 0] : vector<8x8xf32> -> vector<8x8xf32>
    %cst_153 = arith.constant dense<0.000000e+00> : vector<8x8xf32>
    %451 = tpu.matmul %447, %450, %cst_153 {dimension_numbers = #tpu.dot_dimension_numbers<[1], [0], [0], [1], [0, 0, 1, 1], [], []>} : vector<8x8xf32>, vector<8x8xf32>, vector<8x8xf32> -> vector<8x8xf32>
    %cst_154 = arith.constant 0.176776692 : f32
    %452 = vector.broadcast %cst_154 : f32 to vector<8x8xf32>
    %453 = arith.mulf %451, %452 : vector<8x8xf32>
    %cst_155 = arith.constant dense<0xFF800000> : vector<8xf32>
    %454 = vector.multi_reduction <maximumf>, %453, %cst_155 [1] : vector<8x8xf32> to vector<8xf32>
    %455 = vector.shape_cast %454 : vector<8xf32> to vector<8x1xf32>
    %456 = vector.broadcast %455 : vector<8x1xf32> to vector<8x8xf32>
    %457 = arith.subf %453, %456 : vector<8x8xf32>
    %458 = math.exp %457 : vector<8x8xf32>
    %cst_156 = arith.constant dense<0.000000e+00> : vector<8xf32>
    %459 = vector.multi_reduction <add>, %458, %cst_156 [1] : vector<8x8xf32> to vector<8xf32>
    %460 = vector.shape_cast %459 : vector<8xf32> to vector<8x1xf32>
    %461 = tpu.reciprocal %460 : vector<8x1xf32> -> vector<8x1xf32>
    %462 = vector.broadcast %461 : vector<8x1xf32> to vector<8x8xf32>
    %463 = arith.mulf %458, %462 : vector<8x8xf32>
    %cst_157 = arith.constant dense<0.000000e+00> : vector<8x8xf32>
    %464 = tpu.matmul %463, %449, %cst_157 {dimension_numbers = #tpu.dot_dimension_numbers<[1], [0], [0], [1], [0, 0, 1, 1], [], []>} : vector<8x8xf32>, vector<8x8xf32>, vector<8x8xf32> -> vector<8x8xf32>
    %465 = arith.addf %447, %464 : vector<8x8xf32>
    %466 = vector.extract_strided_slice %403 {offsets = [0, 24], sizes = [8, 8], strides = [1, 1]} : vector<8x32xf32> to vector<8x8xf32>
    %467 = vector.extract_strided_slice %407 {offsets = [0, 24], sizes = [8, 8], strides = [1, 1]} : vector<8x32xf32> to vector<8x8xf32>
    %468 = vector.extract_strided_slice %408 {offsets = [0, 24], sizes = [8, 8], strides = [1, 1]} : vector<8x32xf32> to vector<8x8xf32>
    %469 = tpu.transpose %467, [1, 0] : vector<8x8xf32> -> vector<8x8xf32>
    %cst_158 = arith.constant dense<0.000000e+00> : vector<8x8xf32>
    %470 = tpu.matmul %466, %469, %cst_158 {dimension_numbers = #tpu.dot_dimension_numbers<[1], [0], [0], [1], [0, 0, 1, 1], [], []>} : vector<8x8xf32>, vector<8x8xf32>, vector<8x8xf32> -> vector<8x8xf32>
    %cst_159 = arith.constant 0.176776692 : f32
    %471 = vector.broadcast %cst_159 : f32 to vector<8x8xf32>
    %472 = arith.mulf %470, %471 : vector<8x8xf32>
    %cst_160 = arith.constant dense<0xFF800000> : vector<8xf32>
    %473 = vector.multi_reduction <maximumf>, %472, %cst_160 [1] : vector<8x8xf32> to vector<8xf32>
    %474 = vector.shape_cast %473 : vector<8xf32> to vector<8x1xf32>
    %475 = vector.broadcast %474 : vector<8x1xf32> to vector<8x8xf32>
    %476 = arith.subf %472, %475 : vector<8x8xf32>
    %477 = math.exp %476 : vector<8x8xf32>
    %cst_161 = arith.constant dense<0.000000e+00> : vector<8xf32>
    %478 = vector.multi_reduction <add>, %477, %cst_161 [1] : vector<8x8xf32> to vector<8xf32>
    %479 = vector.shape_cast %478 : vector<8xf32> to vector<8x1xf32>
    %480 = tpu.reciprocal %479 : vector<8x1xf32> -> vector<8x1xf32>
    %481 = vector.broadcast %480 : vector<8x1xf32> to vector<8x8xf32>
    %482 = arith.mulf %477, %481 : vector<8x8xf32>
    %cst_162 = arith.constant dense<0.000000e+00> : vector<8x8xf32>
    %483 = tpu.matmul %482, %468, %cst_162 {dimension_numbers = #tpu.dot_dimension_numbers<[1], [0], [0], [1], [0, 0, 1, 1], [], []>} : vector<8x8xf32>, vector<8x8xf32>, vector<8x8xf32> -> vector<8x8xf32>
    %484 = arith.addf %466, %483 : vector<8x8xf32>
    %485 = tpu.concatenate %427, %446, %465, %484 in 1 : vector<8x8xf32>, vector<8x8xf32>, vector<8x8xf32>, vector<8x8xf32> -> vector<8x32xf32>
    %cst_163 = arith.constant dense<0.000000e+00> : vector<8x32xf32>
    %486 = tpu.matmul %485, %399, %cst_163 {dimension_numbers = #tpu.dot_dimension_numbers<[1], [0], [0], [1], [0, 0, 1, 1], [], []>} : vector<8x32xf32>, vector<32x32xf32>, vector<8x32xf32> -> vector<8x32xf32>
    %487 = vector.broadcast %400 : vector<1x32xf32> to vector<8x32xf32>
    %488 = arith.addf %486, %487 : vector<8x32xf32>
    %cst_164 = arith.constant 0.000000e+00 : f32
    %489 = vector.broadcast %cst_164 : f32 to vector<8x32xf32>
    %490 = arith.maximumf %488, %489 : vector<8x32xf32>
    %491 = arith.addf %485, %490 : vector<8x32xf32>
    %c112_165 = arith.constant 112 : index
    %c0_166 = arith.constant 0 : index
    %492 = vector.load %arg3[%c112_165, %c0_166] : memref<632x128xf32, #tpu.memory_space<vmem>>, vector<16x32xf32>
    %c128_167 = arith.constant 128 : index
    %c0_168 = arith.constant 0 : index
    %493 = vector.load %arg3[%c128_167, %c0_168] : memref<632x128xf32, #tpu.memory_space<vmem>>, vector<1x32xf32>
    %c136_169 = arith.constant 136 : index
    %c0_170 = arith.constant 0 : index
    %494 = vector.load %arg3[%c136_169, %c0_170] : memref<632x128xf32, #tpu.memory_space<vmem>>, vector<32x64xf32>
    %c168_171 = arith.constant 168 : index
    %c0_172 = arith.constant 0 : index
    %495 = vector.load %arg3[%c168_171, %c0_172] : memref<632x128xf32, #tpu.memory_space<vmem>>, vector<1x64xf32>
    %c176_173 = arith.constant 176 : index
    %c0_174 = arith.constant 0 : index
    %496 = vector.load %arg3[%c176_173, %c0_174] : memref<632x128xf32, #tpu.memory_space<vmem>>, vector<32x32xf32>
    %c208_175 = arith.constant 208 : index
    %c0_176 = arith.constant 0 : index
    %497 = vector.load %arg3[%c208_175, %c0_176] : memref<632x128xf32, #tpu.memory_space<vmem>>, vector<1x32xf32>
    %cst_177 = arith.constant dense<0.000000e+00> : vector<8x32xf32>
    %498 = tpu.matmul %393, %492, %cst_177 {dimension_numbers = #tpu.dot_dimension_numbers<[1], [0], [0], [1], [0, 0, 1, 1], [], []>} : vector<8x16xf32>, vector<16x32xf32>, vector<8x32xf32> -> vector<8x32xf32>
    %499 = vector.broadcast %493 : vector<1x32xf32> to vector<8x32xf32>
    %500 = arith.addf %498, %499 : vector<8x32xf32>
    %cst_178 = arith.constant dense<0.000000e+00> : vector<8x64xf32>
    %501 = tpu.matmul %491, %494, %cst_178 {dimension_numbers = #tpu.dot_dimension_numbers<[1], [0], [0], [1], [0, 0, 1, 1], [], []>} : vector<8x32xf32>, vector<32x64xf32>, vector<8x64xf32> -> vector<8x64xf32>
    %502 = vector.broadcast %495 : vector<1x64xf32> to vector<8x64xf32>
    %503 = arith.addf %501, %502 : vector<8x64xf32>
    %504 = vector.extract_strided_slice %503 {offsets = [0, 0], sizes = [8, 32], strides = [1, 1]} : vector<8x64xf32> to vector<8x32xf32>
    %505 = vector.extract_strided_slice %503 {offsets = [0, 32], sizes = [8, 32], strides = [1, 1]} : vector<8x64xf32> to vector<8x32xf32>
    %506 = vector.extract_strided_slice %500 {offsets = [0, 0], sizes = [8, 8], strides = [1, 1]} : vector<8x32xf32> to vector<8x8xf32>
    %507 = vector.extract_strided_slice %504 {offsets = [0, 0], sizes = [8, 8], strides = [1, 1]} : vector<8x32xf32> to vector<8x8xf32>
    %508 = vector.extract_strided_slice %505 {offsets = [0, 0], sizes = [8, 8], strides = [1, 1]} : vector<8x32xf32> to vector<8x8xf32>
    %509 = tpu.transpose %507, [1, 0] : vector<8x8xf32> -> vector<8x8xf32>
    %cst_179 = arith.constant dense<0.000000e+00> : vector<8x8xf32>
    %510 = tpu.matmul %506, %509, %cst_179 {dimension_numbers = #tpu.dot_dimension_numbers<[1], [0], [0], [1], [0, 0, 1, 1], [], []>} : vector<8x8xf32>, vector<8x8xf32>, vector<8x8xf32> -> vector<8x8xf32>
    %cst_180 = arith.constant 0.176776692 : f32
    %511 = vector.broadcast %cst_180 : f32 to vector<8x8xf32>
    %512 = arith.mulf %510, %511 : vector<8x8xf32>
    %cst_181 = arith.constant dense<0xFF800000> : vector<8xf32>
    %513 = vector.multi_reduction <maximumf>, %512, %cst_181 [1] : vector<8x8xf32> to vector<8xf32>
    %514 = vector.shape_cast %513 : vector<8xf32> to vector<8x1xf32>
    %515 = vector.broadcast %514 : vector<8x1xf32> to vector<8x8xf32>
    %516 = arith.subf %512, %515 : vector<8x8xf32>
    %517 = math.exp %516 : vector<8x8xf32>
    %cst_182 = arith.constant dense<0.000000e+00> : vector<8xf32>
    %518 = vector.multi_reduction <add>, %517, %cst_182 [1] : vector<8x8xf32> to vector<8xf32>
    %519 = vector.shape_cast %518 : vector<8xf32> to vector<8x1xf32>
    %520 = tpu.reciprocal %519 : vector<8x1xf32> -> vector<8x1xf32>
    %521 = vector.broadcast %520 : vector<8x1xf32> to vector<8x8xf32>
    %522 = arith.mulf %517, %521 : vector<8x8xf32>
    %cst_183 = arith.constant dense<0.000000e+00> : vector<8x8xf32>
    %523 = tpu.matmul %522, %508, %cst_183 {dimension_numbers = #tpu.dot_dimension_numbers<[1], [0], [0], [1], [0, 0, 1, 1], [], []>} : vector<8x8xf32>, vector<8x8xf32>, vector<8x8xf32> -> vector<8x8xf32>
    %524 = arith.addf %506, %523 : vector<8x8xf32>
    %525 = vector.extract_strided_slice %500 {offsets = [0, 8], sizes = [8, 8], strides = [1, 1]} : vector<8x32xf32> to vector<8x8xf32>
    %526 = vector.extract_strided_slice %504 {offsets = [0, 8], sizes = [8, 8], strides = [1, 1]} : vector<8x32xf32> to vector<8x8xf32>
    %527 = vector.extract_strided_slice %505 {offsets = [0, 8], sizes = [8, 8], strides = [1, 1]} : vector<8x32xf32> to vector<8x8xf32>
    %528 = tpu.transpose %526, [1, 0] : vector<8x8xf32> -> vector<8x8xf32>
    %cst_184 = arith.constant dense<0.000000e+00> : vector<8x8xf32>
    %529 = tpu.matmul %525, %528, %cst_184 {dimension_numbers = #tpu.dot_dimension_numbers<[1], [0], [0], [1], [0, 0, 1, 1], [], []>} : vector<8x8xf32>, vector<8x8xf32>, vector<8x8xf32> -> vector<8x8xf32>
    %cst_185 = arith.constant 0.176776692 : f32
    %530 = vector.broadcast %cst_185 : f32 to vector<8x8xf32>
    %531 = arith.mulf %529, %530 : vector<8x8xf32>
    %cst_186 = arith.constant dense<0xFF800000> : vector<8xf32>
    %532 = vector.multi_reduction <maximumf>, %531, %cst_186 [1] : vector<8x8xf32> to vector<8xf32>
    %533 = vector.shape_cast %532 : vector<8xf32> to vector<8x1xf32>
    %534 = vector.broadcast %533 : vector<8x1xf32> to vector<8x8xf32>
    %535 = arith.subf %531, %534 : vector<8x8xf32>
    %536 = math.exp %535 : vector<8x8xf32>
    %cst_187 = arith.constant dense<0.000000e+00> : vector<8xf32>
    %537 = vector.multi_reduction <add>, %536, %cst_187 [1] : vector<8x8xf32> to vector<8xf32>
    %538 = vector.shape_cast %537 : vector<8xf32> to vector<8x1xf32>
    %539 = tpu.reciprocal %538 : vector<8x1xf32> -> vector<8x1xf32>
    %540 = vector.broadcast %539 : vector<8x1xf32> to vector<8x8xf32>
    %541 = arith.mulf %536, %540 : vector<8x8xf32>
    %cst_188 = arith.constant dense<0.000000e+00> : vector<8x8xf32>
    %542 = tpu.matmul %541, %527, %cst_188 {dimension_numbers = #tpu.dot_dimension_numbers<[1], [0], [0], [1], [0, 0, 1, 1], [], []>} : vector<8x8xf32>, vector<8x8xf32>, vector<8x8xf32> -> vector<8x8xf32>
    %543 = arith.addf %525, %542 : vector<8x8xf32>
    %544 = vector.extract_strided_slice %500 {offsets = [0, 16], sizes = [8, 8], strides = [1, 1]} : vector<8x32xf32> to vector<8x8xf32>
    %545 = vector.extract_strided_slice %504 {offsets = [0, 16], sizes = [8, 8], strides = [1, 1]} : vector<8x32xf32> to vector<8x8xf32>
    %546 = vector.extract_strided_slice %505 {offsets = [0, 16], sizes = [8, 8], strides = [1, 1]} : vector<8x32xf32> to vector<8x8xf32>
    %547 = tpu.transpose %545, [1, 0] : vector<8x8xf32> -> vector<8x8xf32>
    %cst_189 = arith.constant dense<0.000000e+00> : vector<8x8xf32>
    %548 = tpu.matmul %544, %547, %cst_189 {dimension_numbers = #tpu.dot_dimension_numbers<[1], [0], [0], [1], [0, 0, 1, 1], [], []>} : vector<8x8xf32>, vector<8x8xf32>, vector<8x8xf32> -> vector<8x8xf32>
    %cst_190 = arith.constant 0.176776692 : f32
    %549 = vector.broadcast %cst_190 : f32 to vector<8x8xf32>
    %550 = arith.mulf %548, %549 : vector<8x8xf32>
    %cst_191 = arith.constant dense<0xFF800000> : vector<8xf32>
    %551 = vector.multi_reduction <maximumf>, %550, %cst_191 [1] : vector<8x8xf32> to vector<8xf32>
    %552 = vector.shape_cast %551 : vector<8xf32> to vector<8x1xf32>
    %553 = vector.broadcast %552 : vector<8x1xf32> to vector<8x8xf32>
    %554 = arith.subf %550, %553 : vector<8x8xf32>
    %555 = math.exp %554 : vector<8x8xf32>
    %cst_192 = arith.constant dense<0.000000e+00> : vector<8xf32>
    %556 = vector.multi_reduction <add>, %555, %cst_192 [1] : vector<8x8xf32> to vector<8xf32>
    %557 = vector.shape_cast %556 : vector<8xf32> to vector<8x1xf32>
    %558 = tpu.reciprocal %557 : vector<8x1xf32> -> vector<8x1xf32>
    %559 = vector.broadcast %558 : vector<8x1xf32> to vector<8x8xf32>
    %560 = arith.mulf %555, %559 : vector<8x8xf32>
    %cst_193 = arith.constant dense<0.000000e+00> : vector<8x8xf32>
    %561 = tpu.matmul %560, %546, %cst_193 {dimension_numbers = #tpu.dot_dimension_numbers<[1], [0], [0], [1], [0, 0, 1, 1], [], []>} : vector<8x8xf32>, vector<8x8xf32>, vector<8x8xf32> -> vector<8x8xf32>
    %562 = arith.addf %544, %561 : vector<8x8xf32>
    %563 = vector.extract_strided_slice %500 {offsets = [0, 24], sizes = [8, 8], strides = [1, 1]} : vector<8x32xf32> to vector<8x8xf32>
    %564 = vector.extract_strided_slice %504 {offsets = [0, 24], sizes = [8, 8], strides = [1, 1]} : vector<8x32xf32> to vector<8x8xf32>
    %565 = vector.extract_strided_slice %505 {offsets = [0, 24], sizes = [8, 8], strides = [1, 1]} : vector<8x32xf32> to vector<8x8xf32>
    %566 = tpu.transpose %564, [1, 0] : vector<8x8xf32> -> vector<8x8xf32>
    %cst_194 = arith.constant dense<0.000000e+00> : vector<8x8xf32>
    %567 = tpu.matmul %563, %566, %cst_194 {dimension_numbers = #tpu.dot_dimension_numbers<[1], [0], [0], [1], [0, 0, 1, 1], [], []>} : vector<8x8xf32>, vector<8x8xf32>, vector<8x8xf32> -> vector<8x8xf32>
    %cst_195 = arith.constant 0.176776692 : f32
    %568 = vector.broadcast %cst_195 : f32 to vector<8x8xf32>
    %569 = arith.mulf %567, %568 : vector<8x8xf32>
    %cst_196 = arith.constant dense<0xFF800000> : vector<8xf32>
    %570 = vector.multi_reduction <maximumf>, %569, %cst_196 [1] : vector<8x8xf32> to vector<8xf32>
    %571 = vector.shape_cast %570 : vector<8xf32> to vector<8x1xf32>
    %572 = vector.broadcast %571 : vector<8x1xf32> to vector<8x8xf32>
    %573 = arith.subf %569, %572 : vector<8x8xf32>
    %574 = math.exp %573 : vector<8x8xf32>
    %cst_197 = arith.constant dense<0.000000e+00> : vector<8xf32>
    %575 = vector.multi_reduction <add>, %574, %cst_197 [1] : vector<8x8xf32> to vector<8xf32>
    %576 = vector.shape_cast %575 : vector<8xf32> to vector<8x1xf32>
    %577 = tpu.reciprocal %576 : vector<8x1xf32> -> vector<8x1xf32>
    %578 = vector.broadcast %577 : vector<8x1xf32> to vector<8x8xf32>
    %579 = arith.mulf %574, %578 : vector<8x8xf32>
    %cst_198 = arith.constant dense<0.000000e+00> : vector<8x8xf32>
    %580 = tpu.matmul %579, %565, %cst_198 {dimension_numbers = #tpu.dot_dimension_numbers<[1], [0], [0], [1], [0, 0, 1, 1], [], []>} : vector<8x8xf32>, vector<8x8xf32>, vector<8x8xf32> -> vector<8x8xf32>
    %581 = arith.addf %563, %580 : vector<8x8xf32>
    %582 = tpu.concatenate %524, %543, %562, %581 in 1 : vector<8x8xf32>, vector<8x8xf32>, vector<8x8xf32>, vector<8x8xf32> -> vector<8x32xf32>
    %cst_199 = arith.constant dense<0.000000e+00> : vector<8x32xf32>
    %583 = tpu.matmul %582, %496, %cst_199 {dimension_numbers = #tpu.dot_dimension_numbers<[1], [0], [0], [1], [0, 0, 1, 1], [], []>} : vector<8x32xf32>, vector<32x32xf32>, vector<8x32xf32> -> vector<8x32xf32>
    %584 = vector.broadcast %497 : vector<1x32xf32> to vector<8x32xf32>
    %585 = arith.addf %583, %584 : vector<8x32xf32>
    %cst_200 = arith.constant 0.000000e+00 : f32
    %586 = vector.broadcast %cst_200 : f32 to vector<8x32xf32>
    %587 = arith.maximumf %585, %586 : vector<8x32xf32>
    %588 = arith.addf %582, %587 : vector<8x32xf32>
    %c216_201 = arith.constant 216 : index
    %c0_202 = arith.constant 0 : index
    %589 = vector.load %arg3[%c216_201, %c0_202] : memref<632x128xf32, #tpu.memory_space<vmem>>, vector<8x32xf32>
    %c224_203 = arith.constant 224 : index
    %c0_204 = arith.constant 0 : index
    %590 = vector.load %arg3[%c224_203, %c0_204] : memref<632x128xf32, #tpu.memory_space<vmem>>, vector<32x32xf32>
    %c256_205 = arith.constant 256 : index
    %c0_206 = arith.constant 0 : index
    %591 = vector.load %arg3[%c256_205, %c0_206] : memref<632x128xf32, #tpu.memory_space<vmem>>, vector<1x32xf32>
    %c264_207 = arith.constant 264 : index
    %c0_208 = arith.constant 0 : index
    %592 = vector.load %arg3[%c264_207, %c0_208] : memref<632x128xf32, #tpu.memory_space<vmem>>, vector<32x64xf32>
    %c296_209 = arith.constant 296 : index
    %c0_210 = arith.constant 0 : index
    %593 = vector.load %arg3[%c296_209, %c0_210] : memref<632x128xf32, #tpu.memory_space<vmem>>, vector<1x64xf32>
    %c304_211 = arith.constant 304 : index
    %c0_212 = arith.constant 0 : index
    %594 = vector.load %arg3[%c304_211, %c0_212] : memref<632x128xf32, #tpu.memory_space<vmem>>, vector<32x32xf32>
    %c336_213 = arith.constant 336 : index
    %c0_214 = arith.constant 0 : index
    %595 = vector.load %arg3[%c336_213, %c0_214] : memref<632x128xf32, #tpu.memory_space<vmem>>, vector<1x32xf32>
    %cst_215 = arith.constant dense<0.000000e+00> : vector<8x32xf32>
    %596 = tpu.matmul %589, %590, %cst_215 {dimension_numbers = #tpu.dot_dimension_numbers<[1], [0], [0], [1], [0, 0, 1, 1], [], []>} : vector<8x32xf32>, vector<32x32xf32>, vector<8x32xf32> -> vector<8x32xf32>
    %597 = vector.broadcast %591 : vector<1x32xf32> to vector<8x32xf32>
    %598 = arith.addf %596, %597 : vector<8x32xf32>
    %cst_216 = arith.constant dense<0.000000e+00> : vector<8x64xf32>
    %599 = tpu.matmul %588, %592, %cst_216 {dimension_numbers = #tpu.dot_dimension_numbers<[1], [0], [0], [1], [0, 0, 1, 1], [], []>} : vector<8x32xf32>, vector<32x64xf32>, vector<8x64xf32> -> vector<8x64xf32>
    %600 = vector.broadcast %593 : vector<1x64xf32> to vector<8x64xf32>
    %601 = arith.addf %599, %600 : vector<8x64xf32>
    %602 = vector.extract_strided_slice %601 {offsets = [0, 0], sizes = [8, 32], strides = [1, 1]} : vector<8x64xf32> to vector<8x32xf32>
    %603 = vector.extract_strided_slice %601 {offsets = [0, 32], sizes = [8, 32], strides = [1, 1]} : vector<8x64xf32> to vector<8x32xf32>
    %604 = vector.extract_strided_slice %598 {offsets = [0, 0], sizes = [8, 8], strides = [1, 1]} : vector<8x32xf32> to vector<8x8xf32>
    %605 = vector.extract_strided_slice %602 {offsets = [0, 0], sizes = [8, 8], strides = [1, 1]} : vector<8x32xf32> to vector<8x8xf32>
    %606 = vector.extract_strided_slice %603 {offsets = [0, 0], sizes = [8, 8], strides = [1, 1]} : vector<8x32xf32> to vector<8x8xf32>
    %607 = tpu.transpose %605, [1, 0] : vector<8x8xf32> -> vector<8x8xf32>
    %cst_217 = arith.constant dense<0.000000e+00> : vector<8x8xf32>
    %608 = tpu.matmul %604, %607, %cst_217 {dimension_numbers = #tpu.dot_dimension_numbers<[1], [0], [0], [1], [0, 0, 1, 1], [], []>} : vector<8x8xf32>, vector<8x8xf32>, vector<8x8xf32> -> vector<8x8xf32>
    %cst_218 = arith.constant 0.176776692 : f32
    %609 = vector.broadcast %cst_218 : f32 to vector<8x8xf32>
    %610 = arith.mulf %608, %609 : vector<8x8xf32>
    %cst_219 = arith.constant dense<0xFF800000> : vector<8xf32>
    %611 = vector.multi_reduction <maximumf>, %610, %cst_219 [1] : vector<8x8xf32> to vector<8xf32>
    %612 = vector.shape_cast %611 : vector<8xf32> to vector<8x1xf32>
    %613 = vector.broadcast %612 : vector<8x1xf32> to vector<8x8xf32>
    %614 = arith.subf %610, %613 : vector<8x8xf32>
    %615 = math.exp %614 : vector<8x8xf32>
    %cst_220 = arith.constant dense<0.000000e+00> : vector<8xf32>
    %616 = vector.multi_reduction <add>, %615, %cst_220 [1] : vector<8x8xf32> to vector<8xf32>
    %617 = vector.shape_cast %616 : vector<8xf32> to vector<8x1xf32>
    %618 = tpu.reciprocal %617 : vector<8x1xf32> -> vector<8x1xf32>
    %619 = vector.broadcast %618 : vector<8x1xf32> to vector<8x8xf32>
    %620 = arith.mulf %615, %619 : vector<8x8xf32>
    %cst_221 = arith.constant dense<0.000000e+00> : vector<8x8xf32>
    %621 = tpu.matmul %620, %606, %cst_221 {dimension_numbers = #tpu.dot_dimension_numbers<[1], [0], [0], [1], [0, 0, 1, 1], [], []>} : vector<8x8xf32>, vector<8x8xf32>, vector<8x8xf32> -> vector<8x8xf32>
    %622 = arith.addf %604, %621 : vector<8x8xf32>
    %623 = vector.extract_strided_slice %598 {offsets = [0, 8], sizes = [8, 8], strides = [1, 1]} : vector<8x32xf32> to vector<8x8xf32>
    %624 = vector.extract_strided_slice %602 {offsets = [0, 8], sizes = [8, 8], strides = [1, 1]} : vector<8x32xf32> to vector<8x8xf32>
    %625 = vector.extract_strided_slice %603 {offsets = [0, 8], sizes = [8, 8], strides = [1, 1]} : vector<8x32xf32> to vector<8x8xf32>
    %626 = tpu.transpose %624, [1, 0] : vector<8x8xf32> -> vector<8x8xf32>
    %cst_222 = arith.constant dense<0.000000e+00> : vector<8x8xf32>
    %627 = tpu.matmul %623, %626, %cst_222 {dimension_numbers = #tpu.dot_dimension_numbers<[1], [0], [0], [1], [0, 0, 1, 1], [], []>} : vector<8x8xf32>, vector<8x8xf32>, vector<8x8xf32> -> vector<8x8xf32>
    %cst_223 = arith.constant 0.176776692 : f32
    %628 = vector.broadcast %cst_223 : f32 to vector<8x8xf32>
    %629 = arith.mulf %627, %628 : vector<8x8xf32>
    %cst_224 = arith.constant dense<0xFF800000> : vector<8xf32>
    %630 = vector.multi_reduction <maximumf>, %629, %cst_224 [1] : vector<8x8xf32> to vector<8xf32>
    %631 = vector.shape_cast %630 : vector<8xf32> to vector<8x1xf32>
    %632 = vector.broadcast %631 : vector<8x1xf32> to vector<8x8xf32>
    %633 = arith.subf %629, %632 : vector<8x8xf32>
    %634 = math.exp %633 : vector<8x8xf32>
    %cst_225 = arith.constant dense<0.000000e+00> : vector<8xf32>
    %635 = vector.multi_reduction <add>, %634, %cst_225 [1] : vector<8x8xf32> to vector<8xf32>
    %636 = vector.shape_cast %635 : vector<8xf32> to vector<8x1xf32>
    %637 = tpu.reciprocal %636 : vector<8x1xf32> -> vector<8x1xf32>
    %638 = vector.broadcast %637 : vector<8x1xf32> to vector<8x8xf32>
    %639 = arith.mulf %634, %638 : vector<8x8xf32>
    %cst_226 = arith.constant dense<0.000000e+00> : vector<8x8xf32>
    %640 = tpu.matmul %639, %625, %cst_226 {dimension_numbers = #tpu.dot_dimension_numbers<[1], [0], [0], [1], [0, 0, 1, 1], [], []>} : vector<8x8xf32>, vector<8x8xf32>, vector<8x8xf32> -> vector<8x8xf32>
    %641 = arith.addf %623, %640 : vector<8x8xf32>
    %642 = vector.extract_strided_slice %598 {offsets = [0, 16], sizes = [8, 8], strides = [1, 1]} : vector<8x32xf32> to vector<8x8xf32>
    %643 = vector.extract_strided_slice %602 {offsets = [0, 16], sizes = [8, 8], strides = [1, 1]} : vector<8x32xf32> to vector<8x8xf32>
    %644 = vector.extract_strided_slice %603 {offsets = [0, 16], sizes = [8, 8], strides = [1, 1]} : vector<8x32xf32> to vector<8x8xf32>
    %645 = tpu.transpose %643, [1, 0] : vector<8x8xf32> -> vector<8x8xf32>
    %cst_227 = arith.constant dense<0.000000e+00> : vector<8x8xf32>
    %646 = tpu.matmul %642, %645, %cst_227 {dimension_numbers = #tpu.dot_dimension_numbers<[1], [0], [0], [1], [0, 0, 1, 1], [], []>} : vector<8x8xf32>, vector<8x8xf32>, vector<8x8xf32> -> vector<8x8xf32>
    %cst_228 = arith.constant 0.176776692 : f32
    %647 = vector.broadcast %cst_228 : f32 to vector<8x8xf32>
    %648 = arith.mulf %646, %647 : vector<8x8xf32>
    %cst_229 = arith.constant dense<0xFF800000> : vector<8xf32>
    %649 = vector.multi_reduction <maximumf>, %648, %cst_229 [1] : vector<8x8xf32> to vector<8xf32>
    %650 = vector.shape_cast %649 : vector<8xf32> to vector<8x1xf32>
    %651 = vector.broadcast %650 : vector<8x1xf32> to vector<8x8xf32>
    %652 = arith.subf %648, %651 : vector<8x8xf32>
    %653 = math.exp %652 : vector<8x8xf32>
    %cst_230 = arith.constant dense<0.000000e+00> : vector<8xf32>
    %654 = vector.multi_reduction <add>, %653, %cst_230 [1] : vector<8x8xf32> to vector<8xf32>
    %655 = vector.shape_cast %654 : vector<8xf32> to vector<8x1xf32>
    %656 = tpu.reciprocal %655 : vector<8x1xf32> -> vector<8x1xf32>
    %657 = vector.broadcast %656 : vector<8x1xf32> to vector<8x8xf32>
    %658 = arith.mulf %653, %657 : vector<8x8xf32>
    %cst_231 = arith.constant dense<0.000000e+00> : vector<8x8xf32>
    %659 = tpu.matmul %658, %644, %cst_231 {dimension_numbers = #tpu.dot_dimension_numbers<[1], [0], [0], [1], [0, 0, 1, 1], [], []>} : vector<8x8xf32>, vector<8x8xf32>, vector<8x8xf32> -> vector<8x8xf32>
    %660 = arith.addf %642, %659 : vector<8x8xf32>
    %661 = vector.extract_strided_slice %598 {offsets = [0, 24], sizes = [8, 8], strides = [1, 1]} : vector<8x32xf32> to vector<8x8xf32>
    %662 = vector.extract_strided_slice %602 {offsets = [0, 24], sizes = [8, 8], strides = [1, 1]} : vector<8x32xf32> to vector<8x8xf32>
    %663 = vector.extract_strided_slice %603 {offsets = [0, 24], sizes = [8, 8], strides = [1, 1]} : vector<8x32xf32> to vector<8x8xf32>
    %664 = tpu.transpose %662, [1, 0] : vector<8x8xf32> -> vector<8x8xf32>
    %cst_232 = arith.constant dense<0.000000e+00> : vector<8x8xf32>
    %665 = tpu.matmul %661, %664, %cst_232 {dimension_numbers = #tpu.dot_dimension_numbers<[1], [0], [0], [1], [0, 0, 1, 1], [], []>} : vector<8x8xf32>, vector<8x8xf32>, vector<8x8xf32> -> vector<8x8xf32>
    %cst_233 = arith.constant 0.176776692 : f32
    %666 = vector.broadcast %cst_233 : f32 to vector<8x8xf32>
    %667 = arith.mulf %665, %666 : vector<8x8xf32>
    %cst_234 = arith.constant dense<0xFF800000> : vector<8xf32>
    %668 = vector.multi_reduction <maximumf>, %667, %cst_234 [1] : vector<8x8xf32> to vector<8xf32>
    %669 = vector.shape_cast %668 : vector<8xf32> to vector<8x1xf32>
    %670 = vector.broadcast %669 : vector<8x1xf32> to vector<8x8xf32>
    %671 = arith.subf %667, %670 : vector<8x8xf32>
    %672 = math.exp %671 : vector<8x8xf32>
    %cst_235 = arith.constant dense<0.000000e+00> : vector<8xf32>
    %673 = vector.multi_reduction <add>, %672, %cst_235 [1] : vector<8x8xf32> to vector<8xf32>
    %674 = vector.shape_cast %673 : vector<8xf32> to vector<8x1xf32>
    %675 = tpu.reciprocal %674 : vector<8x1xf32> -> vector<8x1xf32>
    %676 = vector.broadcast %675 : vector<8x1xf32> to vector<8x8xf32>
    %677 = arith.mulf %672, %676 : vector<8x8xf32>
    %cst_236 = arith.constant dense<0.000000e+00> : vector<8x8xf32>
    %678 = tpu.matmul %677, %663, %cst_236 {dimension_numbers = #tpu.dot_dimension_numbers<[1], [0], [0], [1], [0, 0, 1, 1], [], []>} : vector<8x8xf32>, vector<8x8xf32>, vector<8x8xf32> -> vector<8x8xf32>
    %679 = arith.addf %661, %678 : vector<8x8xf32>
    %680 = tpu.concatenate %622, %641, %660, %679 in 1 : vector<8x8xf32>, vector<8x8xf32>, vector<8x8xf32>, vector<8x8xf32> -> vector<8x32xf32>
    %cst_237 = arith.constant dense<0.000000e+00> : vector<8x32xf32>
    %681 = tpu.matmul %680, %594, %cst_237 {dimension_numbers = #tpu.dot_dimension_numbers<[1], [0], [0], [1], [0, 0, 1, 1], [], []>} : vector<8x32xf32>, vector<32x32xf32>, vector<8x32xf32> -> vector<8x32xf32>
    %682 = vector.broadcast %595 : vector<1x32xf32> to vector<8x32xf32>
    %683 = arith.addf %681, %682 : vector<8x32xf32>
    %cst_238 = arith.constant 0.000000e+00 : f32
    %684 = vector.broadcast %cst_238 : f32 to vector<8x32xf32>
    %685 = arith.maximumf %683, %684 : vector<8x32xf32>
    %686 = arith.addf %680, %685 : vector<8x32xf32>
    %c344_239 = arith.constant 344 : index
    %c0_240 = arith.constant 0 : index
    %687 = vector.load %arg3[%c344_239, %c0_240] : memref<632x128xf32, #tpu.memory_space<vmem>>, vector<32x32xf32>
    %c376_241 = arith.constant 376 : index
    %c0_242 = arith.constant 0 : index
    %688 = vector.load %arg3[%c376_241, %c0_242] : memref<632x128xf32, #tpu.memory_space<vmem>>, vector<1x32xf32>
    %c384_243 = arith.constant 384 : index
    %c0_244 = arith.constant 0 : index
    %689 = vector.load %arg3[%c384_243, %c0_244] : memref<632x128xf32, #tpu.memory_space<vmem>>, vector<32x64xf32>
    %c416_245 = arith.constant 416 : index
    %c0_246 = arith.constant 0 : index
    %690 = vector.load %arg3[%c416_245, %c0_246] : memref<632x128xf32, #tpu.memory_space<vmem>>, vector<1x64xf32>
    %c424_247 = arith.constant 424 : index
    %c0_248 = arith.constant 0 : index
    %691 = vector.load %arg3[%c424_247, %c0_248] : memref<632x128xf32, #tpu.memory_space<vmem>>, vector<32x32xf32>
    %c456_249 = arith.constant 456 : index
    %c0_250 = arith.constant 0 : index
    %692 = vector.load %arg3[%c456_249, %c0_250] : memref<632x128xf32, #tpu.memory_space<vmem>>, vector<1x32xf32>
    %cst_251 = arith.constant dense<0.000000e+00> : vector<8x32xf32>
    %693 = tpu.matmul %588, %687, %cst_251 {dimension_numbers = #tpu.dot_dimension_numbers<[1], [0], [0], [1], [0, 0, 1, 1], [], []>} : vector<8x32xf32>, vector<32x32xf32>, vector<8x32xf32> -> vector<8x32xf32>
    %694 = vector.broadcast %688 : vector<1x32xf32> to vector<8x32xf32>
    %695 = arith.addf %693, %694 : vector<8x32xf32>
    %cst_252 = arith.constant dense<0.000000e+00> : vector<8x64xf32>
    %696 = tpu.matmul %686, %689, %cst_252 {dimension_numbers = #tpu.dot_dimension_numbers<[1], [0], [0], [1], [0, 0, 1, 1], [], []>} : vector<8x32xf32>, vector<32x64xf32>, vector<8x64xf32> -> vector<8x64xf32>
    %697 = vector.broadcast %690 : vector<1x64xf32> to vector<8x64xf32>
    %698 = arith.addf %696, %697 : vector<8x64xf32>
    %699 = vector.extract_strided_slice %698 {offsets = [0, 0], sizes = [8, 32], strides = [1, 1]} : vector<8x64xf32> to vector<8x32xf32>
    %700 = vector.extract_strided_slice %698 {offsets = [0, 32], sizes = [8, 32], strides = [1, 1]} : vector<8x64xf32> to vector<8x32xf32>
    %701 = vector.extract_strided_slice %695 {offsets = [0, 0], sizes = [8, 8], strides = [1, 1]} : vector<8x32xf32> to vector<8x8xf32>
    %702 = vector.extract_strided_slice %699 {offsets = [0, 0], sizes = [8, 8], strides = [1, 1]} : vector<8x32xf32> to vector<8x8xf32>
    %703 = vector.extract_strided_slice %700 {offsets = [0, 0], sizes = [8, 8], strides = [1, 1]} : vector<8x32xf32> to vector<8x8xf32>
    %704 = tpu.transpose %702, [1, 0] : vector<8x8xf32> -> vector<8x8xf32>
    %cst_253 = arith.constant dense<0.000000e+00> : vector<8x8xf32>
    %705 = tpu.matmul %701, %704, %cst_253 {dimension_numbers = #tpu.dot_dimension_numbers<[1], [0], [0], [1], [0, 0, 1, 1], [], []>} : vector<8x8xf32>, vector<8x8xf32>, vector<8x8xf32> -> vector<8x8xf32>
    %cst_254 = arith.constant 0.176776692 : f32
    %706 = vector.broadcast %cst_254 : f32 to vector<8x8xf32>
    %707 = arith.mulf %705, %706 : vector<8x8xf32>
    %cst_255 = arith.constant dense<0xFF800000> : vector<8xf32>
    %708 = vector.multi_reduction <maximumf>, %707, %cst_255 [1] : vector<8x8xf32> to vector<8xf32>
    %709 = vector.shape_cast %708 : vector<8xf32> to vector<8x1xf32>
    %710 = vector.broadcast %709 : vector<8x1xf32> to vector<8x8xf32>
    %711 = arith.subf %707, %710 : vector<8x8xf32>
    %712 = math.exp %711 : vector<8x8xf32>
    %cst_256 = arith.constant dense<0.000000e+00> : vector<8xf32>
    %713 = vector.multi_reduction <add>, %712, %cst_256 [1] : vector<8x8xf32> to vector<8xf32>
    %714 = vector.shape_cast %713 : vector<8xf32> to vector<8x1xf32>
    %715 = tpu.reciprocal %714 : vector<8x1xf32> -> vector<8x1xf32>
    %716 = vector.broadcast %715 : vector<8x1xf32> to vector<8x8xf32>
    %717 = arith.mulf %712, %716 : vector<8x8xf32>
    %cst_257 = arith.constant dense<0.000000e+00> : vector<8x8xf32>
    %718 = tpu.matmul %717, %703, %cst_257 {dimension_numbers = #tpu.dot_dimension_numbers<[1], [0], [0], [1], [0, 0, 1, 1], [], []>} : vector<8x8xf32>, vector<8x8xf32>, vector<8x8xf32> -> vector<8x8xf32>
    %719 = arith.addf %701, %718 : vector<8x8xf32>
    %720 = vector.extract_strided_slice %695 {offsets = [0, 8], sizes = [8, 8], strides = [1, 1]} : vector<8x32xf32> to vector<8x8xf32>
    %721 = vector.extract_strided_slice %699 {offsets = [0, 8], sizes = [8, 8], strides = [1, 1]} : vector<8x32xf32> to vector<8x8xf32>
    %722 = vector.extract_strided_slice %700 {offsets = [0, 8], sizes = [8, 8], strides = [1, 1]} : vector<8x32xf32> to vector<8x8xf32>
    %723 = tpu.transpose %721, [1, 0] : vector<8x8xf32> -> vector<8x8xf32>
    %cst_258 = arith.constant dense<0.000000e+00> : vector<8x8xf32>
    %724 = tpu.matmul %720, %723, %cst_258 {dimension_numbers = #tpu.dot_dimension_numbers<[1], [0], [0], [1], [0, 0, 1, 1], [], []>} : vector<8x8xf32>, vector<8x8xf32>, vector<8x8xf32> -> vector<8x8xf32>
    %cst_259 = arith.constant 0.176776692 : f32
    %725 = vector.broadcast %cst_259 : f32 to vector<8x8xf32>
    %726 = arith.mulf %724, %725 : vector<8x8xf32>
    %cst_260 = arith.constant dense<0xFF800000> : vector<8xf32>
    %727 = vector.multi_reduction <maximumf>, %726, %cst_260 [1] : vector<8x8xf32> to vector<8xf32>
    %728 = vector.shape_cast %727 : vector<8xf32> to vector<8x1xf32>
    %729 = vector.broadcast %728 : vector<8x1xf32> to vector<8x8xf32>
    %730 = arith.subf %726, %729 : vector<8x8xf32>
    %731 = math.exp %730 : vector<8x8xf32>
    %cst_261 = arith.constant dense<0.000000e+00> : vector<8xf32>
    %732 = vector.multi_reduction <add>, %731, %cst_261 [1] : vector<8x8xf32> to vector<8xf32>
    %733 = vector.shape_cast %732 : vector<8xf32> to vector<8x1xf32>
    %734 = tpu.reciprocal %733 : vector<8x1xf32> -> vector<8x1xf32>
    %735 = vector.broadcast %734 : vector<8x1xf32> to vector<8x8xf32>
    %736 = arith.mulf %731, %735 : vector<8x8xf32>
    %cst_262 = arith.constant dense<0.000000e+00> : vector<8x8xf32>
    %737 = tpu.matmul %736, %722, %cst_262 {dimension_numbers = #tpu.dot_dimension_numbers<[1], [0], [0], [1], [0, 0, 1, 1], [], []>} : vector<8x8xf32>, vector<8x8xf32>, vector<8x8xf32> -> vector<8x8xf32>
    %738 = arith.addf %720, %737 : vector<8x8xf32>
    %739 = vector.extract_strided_slice %695 {offsets = [0, 16], sizes = [8, 8], strides = [1, 1]} : vector<8x32xf32> to vector<8x8xf32>
    %740 = vector.extract_strided_slice %699 {offsets = [0, 16], sizes = [8, 8], strides = [1, 1]} : vector<8x32xf32> to vector<8x8xf32>
    %741 = vector.extract_strided_slice %700 {offsets = [0, 16], sizes = [8, 8], strides = [1, 1]} : vector<8x32xf32> to vector<8x8xf32>
    %742 = tpu.transpose %740, [1, 0] : vector<8x8xf32> -> vector<8x8xf32>
    %cst_263 = arith.constant dense<0.000000e+00> : vector<8x8xf32>
    %743 = tpu.matmul %739, %742, %cst_263 {dimension_numbers = #tpu.dot_dimension_numbers<[1], [0], [0], [1], [0, 0, 1, 1], [], []>} : vector<8x8xf32>, vector<8x8xf32>, vector<8x8xf32> -> vector<8x8xf32>
    %cst_264 = arith.constant 0.176776692 : f32
    %744 = vector.broadcast %cst_264 : f32 to vector<8x8xf32>
    %745 = arith.mulf %743, %744 : vector<8x8xf32>
    %cst_265 = arith.constant dense<0xFF800000> : vector<8xf32>
    %746 = vector.multi_reduction <maximumf>, %745, %cst_265 [1] : vector<8x8xf32> to vector<8xf32>
    %747 = vector.shape_cast %746 : vector<8xf32> to vector<8x1xf32>
    %748 = vector.broadcast %747 : vector<8x1xf32> to vector<8x8xf32>
    %749 = arith.subf %745, %748 : vector<8x8xf32>
    %750 = math.exp %749 : vector<8x8xf32>
    %cst_266 = arith.constant dense<0.000000e+00> : vector<8xf32>
    %751 = vector.multi_reduction <add>, %750, %cst_266 [1] : vector<8x8xf32> to vector<8xf32>
    %752 = vector.shape_cast %751 : vector<8xf32> to vector<8x1xf32>
    %753 = tpu.reciprocal %752 : vector<8x1xf32> -> vector<8x1xf32>
    %754 = vector.broadcast %753 : vector<8x1xf32> to vector<8x8xf32>
    %755 = arith.mulf %750, %754 : vector<8x8xf32>
    %cst_267 = arith.constant dense<0.000000e+00> : vector<8x8xf32>
    %756 = tpu.matmul %755, %741, %cst_267 {dimension_numbers = #tpu.dot_dimension_numbers<[1], [0], [0], [1], [0, 0, 1, 1], [], []>} : vector<8x8xf32>, vector<8x8xf32>, vector<8x8xf32> -> vector<8x8xf32>
    %757 = arith.addf %739, %756 : vector<8x8xf32>
    %758 = vector.extract_strided_slice %695 {offsets = [0, 24], sizes = [8, 8], strides = [1, 1]} : vector<8x32xf32> to vector<8x8xf32>
    %759 = vector.extract_strided_slice %699 {offsets = [0, 24], sizes = [8, 8], strides = [1, 1]} : vector<8x32xf32> to vector<8x8xf32>
    %760 = vector.extract_strided_slice %700 {offsets = [0, 24], sizes = [8, 8], strides = [1, 1]} : vector<8x32xf32> to vector<8x8xf32>
    %761 = tpu.transpose %759, [1, 0] : vector<8x8xf32> -> vector<8x8xf32>
    %cst_268 = arith.constant dense<0.000000e+00> : vector<8x8xf32>
    %762 = tpu.matmul %758, %761, %cst_268 {dimension_numbers = #tpu.dot_dimension_numbers<[1], [0], [0], [1], [0, 0, 1, 1], [], []>} : vector<8x8xf32>, vector<8x8xf32>, vector<8x8xf32> -> vector<8x8xf32>
    %cst_269 = arith.constant 0.176776692 : f32
    %763 = vector.broadcast %cst_269 : f32 to vector<8x8xf32>
    %764 = arith.mulf %762, %763 : vector<8x8xf32>
    %cst_270 = arith.constant dense<0xFF800000> : vector<8xf32>
    %765 = vector.multi_reduction <maximumf>, %764, %cst_270 [1] : vector<8x8xf32> to vector<8xf32>
    %766 = vector.shape_cast %765 : vector<8xf32> to vector<8x1xf32>
    %767 = vector.broadcast %766 : vector<8x1xf32> to vector<8x8xf32>
    %768 = arith.subf %764, %767 : vector<8x8xf32>
    %769 = math.exp %768 : vector<8x8xf32>
    %cst_271 = arith.constant dense<0.000000e+00> : vector<8xf32>
    %770 = vector.multi_reduction <add>, %769, %cst_271 [1] : vector<8x8xf32> to vector<8xf32>
    %771 = vector.shape_cast %770 : vector<8xf32> to vector<8x1xf32>
    %772 = tpu.reciprocal %771 : vector<8x1xf32> -> vector<8x1xf32>
    %773 = vector.broadcast %772 : vector<8x1xf32> to vector<8x8xf32>
    %774 = arith.mulf %769, %773 : vector<8x8xf32>
    %cst_272 = arith.constant dense<0.000000e+00> : vector<8x8xf32>
    %775 = tpu.matmul %774, %760, %cst_272 {dimension_numbers = #tpu.dot_dimension_numbers<[1], [0], [0], [1], [0, 0, 1, 1], [], []>} : vector<8x8xf32>, vector<8x8xf32>, vector<8x8xf32> -> vector<8x8xf32>
    %776 = arith.addf %758, %775 : vector<8x8xf32>
    %777 = tpu.concatenate %719, %738, %757, %776 in 1 : vector<8x8xf32>, vector<8x8xf32>, vector<8x8xf32>, vector<8x8xf32> -> vector<8x32xf32>
    %cst_273 = arith.constant dense<0.000000e+00> : vector<8x32xf32>
    %778 = tpu.matmul %777, %691, %cst_273 {dimension_numbers = #tpu.dot_dimension_numbers<[1], [0], [0], [1], [0, 0, 1, 1], [], []>} : vector<8x32xf32>, vector<32x32xf32>, vector<8x32xf32> -> vector<8x32xf32>
    %779 = vector.broadcast %692 : vector<1x32xf32> to vector<8x32xf32>
    %780 = arith.addf %778, %779 : vector<8x32xf32>
    %cst_274 = arith.constant 0.000000e+00 : f32
    %781 = vector.broadcast %cst_274 : f32 to vector<8x32xf32>
    %782 = arith.maximumf %780, %781 : vector<8x32xf32>
    %783 = arith.addf %777, %782 : vector<8x32xf32>
    %784 = tpu.concatenate %391, %783 in 0 : vector<8x32xf32>, vector<8x32xf32> -> vector<16x32xf32>
    %c464 = arith.constant 464 : index
    %c0_275 = arith.constant 0 : index
    %785 = vector.load %arg3[%c464, %c0_275] : memref<632x128xf32, #tpu.memory_space<vmem>>, vector<1x32xf32>
    %c472 = arith.constant 472 : index
    %c0_276 = arith.constant 0 : index
    %786 = vector.load %arg3[%c472, %c0_276] : memref<632x128xf32, #tpu.memory_space<vmem>>, vector<32x32xf32>
    %c504 = arith.constant 504 : index
    %c0_277 = arith.constant 0 : index
    %787 = vector.load %arg3[%c504, %c0_277] : memref<632x128xf32, #tpu.memory_space<vmem>>, vector<1x32xf32>
    %c512 = arith.constant 512 : index
    %c0_278 = arith.constant 0 : index
    %788 = vector.load %arg3[%c512, %c0_278] : memref<632x128xf32, #tpu.memory_space<vmem>>, vector<32x64xf32>
    %c544 = arith.constant 544 : index
    %c0_279 = arith.constant 0 : index
    %789 = vector.load %arg3[%c544, %c0_279] : memref<632x128xf32, #tpu.memory_space<vmem>>, vector<1x64xf32>
    %c552 = arith.constant 552 : index
    %c0_280 = arith.constant 0 : index
    %790 = vector.load %arg3[%c552, %c0_280] : memref<632x128xf32, #tpu.memory_space<vmem>>, vector<32x32xf32>
    %c584 = arith.constant 584 : index
    %c0_281 = arith.constant 0 : index
    %791 = vector.load %arg3[%c584, %c0_281] : memref<632x128xf32, #tpu.memory_space<vmem>>, vector<1x32xf32>
    %cst_282 = arith.constant dense<0.000000e+00> : vector<1x32xf32>
    %792 = tpu.matmul %785, %786, %cst_282 {dimension_numbers = #tpu.dot_dimension_numbers<[1], [0], [0], [1], [0, 0, 1, 1], [], []>} : vector<1x32xf32>, vector<32x32xf32>, vector<1x32xf32> -> vector<1x32xf32>
    %793 = arith.addf %792, %787 : vector<1x32xf32>
    %cst_283 = arith.constant dense<0.000000e+00> : vector<16x64xf32>
    %794 = tpu.matmul %784, %788, %cst_283 {dimension_numbers = #tpu.dot_dimension_numbers<[1], [0], [0], [1], [0, 0, 1, 1], [], []>} : vector<16x32xf32>, vector<32x64xf32>, vector<16x64xf32> -> vector<16x64xf32>
    %795 = vector.broadcast %789 : vector<1x64xf32> to vector<16x64xf32>
    %796 = arith.addf %794, %795 : vector<16x64xf32>
    %797 = vector.extract_strided_slice %796 {offsets = [0, 0], sizes = [16, 32], strides = [1, 1]} : vector<16x64xf32> to vector<16x32xf32>
    %798 = vector.extract_strided_slice %796 {offsets = [0, 32], sizes = [16, 32], strides = [1, 1]} : vector<16x64xf32> to vector<16x32xf32>
    %799 = vector.extract_strided_slice %793 {offsets = [0, 0], sizes = [1, 8], strides = [1, 1]} : vector<1x32xf32> to vector<1x8xf32>
    %800 = vector.extract_strided_slice %797 {offsets = [0, 0], sizes = [16, 8], strides = [1, 1]} : vector<16x32xf32> to vector<16x8xf32>
    %801 = vector.extract_strided_slice %798 {offsets = [0, 0], sizes = [16, 8], strides = [1, 1]} : vector<16x32xf32> to vector<16x8xf32>
    %802 = tpu.transpose %800, [1, 0] : vector<16x8xf32> -> vector<8x16xf32>
    %cst_284 = arith.constant dense<0.000000e+00> : vector<1x16xf32>
    %803 = tpu.matmul %799, %802, %cst_284 {dimension_numbers = #tpu.dot_dimension_numbers<[1], [0], [0], [1], [0, 0, 1, 1], [], []>} : vector<1x8xf32>, vector<8x16xf32>, vector<1x16xf32> -> vector<1x16xf32>
    %cst_285 = arith.constant 0.176776692 : f32
    %804 = vector.broadcast %cst_285 : f32 to vector<1x16xf32>
    %805 = arith.mulf %803, %804 : vector<1x16xf32>
    %cst_286 = arith.constant dense<0xFF800000> : vector<1xf32>
    %806 = vector.multi_reduction <maximumf>, %805, %cst_286 [1] : vector<1x16xf32> to vector<1xf32>
    %807 = vector.shape_cast %806 : vector<1xf32> to vector<1x1xf32>
    %808 = vector.broadcast %807 : vector<1x1xf32> to vector<1x16xf32>
    %809 = arith.subf %805, %808 : vector<1x16xf32>
    %810 = math.exp %809 : vector<1x16xf32>
    %cst_287 = arith.constant dense<0.000000e+00> : vector<1xf32>
    %811 = vector.multi_reduction <add>, %810, %cst_287 [1] : vector<1x16xf32> to vector<1xf32>
    %812 = vector.shape_cast %811 : vector<1xf32> to vector<1x1xf32>
    %813 = tpu.reciprocal %812 : vector<1x1xf32> -> vector<1x1xf32>
    %814 = vector.broadcast %813 : vector<1x1xf32> to vector<1x16xf32>
    %815 = arith.mulf %810, %814 : vector<1x16xf32>
    %cst_288 = arith.constant dense<0.000000e+00> : vector<1x8xf32>
    %816 = tpu.matmul %815, %801, %cst_288 {dimension_numbers = #tpu.dot_dimension_numbers<[1], [0], [0], [1], [0, 0, 1, 1], [], []>} : vector<1x16xf32>, vector<16x8xf32>, vector<1x8xf32> -> vector<1x8xf32>
    %817 = arith.addf %799, %816 : vector<1x8xf32>
    %818 = vector.extract_strided_slice %793 {offsets = [0, 8], sizes = [1, 8], strides = [1, 1]} : vector<1x32xf32> to vector<1x8xf32>
    %819 = vector.extract_strided_slice %797 {offsets = [0, 8], sizes = [16, 8], strides = [1, 1]} : vector<16x32xf32> to vector<16x8xf32>
    %820 = vector.extract_strided_slice %798 {offsets = [0, 8], sizes = [16, 8], strides = [1, 1]} : vector<16x32xf32> to vector<16x8xf32>
    %821 = tpu.transpose %819, [1, 0] : vector<16x8xf32> -> vector<8x16xf32>
    %cst_289 = arith.constant dense<0.000000e+00> : vector<1x16xf32>
    %822 = tpu.matmul %818, %821, %cst_289 {dimension_numbers = #tpu.dot_dimension_numbers<[1], [0], [0], [1], [0, 0, 1, 1], [], []>} : vector<1x8xf32>, vector<8x16xf32>, vector<1x16xf32> -> vector<1x16xf32>
    %cst_290 = arith.constant 0.176776692 : f32
    %823 = vector.broadcast %cst_290 : f32 to vector<1x16xf32>
    %824 = arith.mulf %822, %823 : vector<1x16xf32>
    %cst_291 = arith.constant dense<0xFF800000> : vector<1xf32>
    %825 = vector.multi_reduction <maximumf>, %824, %cst_291 [1] : vector<1x16xf32> to vector<1xf32>
    %826 = vector.shape_cast %825 : vector<1xf32> to vector<1x1xf32>
    %827 = vector.broadcast %826 : vector<1x1xf32> to vector<1x16xf32>
    %828 = arith.subf %824, %827 : vector<1x16xf32>
    %829 = math.exp %828 : vector<1x16xf32>
    %cst_292 = arith.constant dense<0.000000e+00> : vector<1xf32>
    %830 = vector.multi_reduction <add>, %829, %cst_292 [1] : vector<1x16xf32> to vector<1xf32>
    %831 = vector.shape_cast %830 : vector<1xf32> to vector<1x1xf32>
    %832 = tpu.reciprocal %831 : vector<1x1xf32> -> vector<1x1xf32>
    %833 = vector.broadcast %832 : vector<1x1xf32> to vector<1x16xf32>
    %834 = arith.mulf %829, %833 : vector<1x16xf32>
    %cst_293 = arith.constant dense<0.000000e+00> : vector<1x8xf32>
    %835 = tpu.matmul %834, %820, %cst_293 {dimension_numbers = #tpu.dot_dimension_numbers<[1], [0], [0], [1], [0, 0, 1, 1], [], []>} : vector<1x16xf32>, vector<16x8xf32>, vector<1x8xf32> -> vector<1x8xf32>
    %836 = arith.addf %818, %835 : vector<1x8xf32>
    %837 = vector.extract_strided_slice %793 {offsets = [0, 16], sizes = [1, 8], strides = [1, 1]} : vector<1x32xf32> to vector<1x8xf32>
    %838 = vector.extract_strided_slice %797 {offsets = [0, 16], sizes = [16, 8], strides = [1, 1]} : vector<16x32xf32> to vector<16x8xf32>
    %839 = vector.extract_strided_slice %798 {offsets = [0, 16], sizes = [16, 8], strides = [1, 1]} : vector<16x32xf32> to vector<16x8xf32>
    %840 = tpu.transpose %838, [1, 0] : vector<16x8xf32> -> vector<8x16xf32>
    %cst_294 = arith.constant dense<0.000000e+00> : vector<1x16xf32>
    %841 = tpu.matmul %837, %840, %cst_294 {dimension_numbers = #tpu.dot_dimension_numbers<[1], [0], [0], [1], [0, 0, 1, 1], [], []>} : vector<1x8xf32>, vector<8x16xf32>, vector<1x16xf32> -> vector<1x16xf32>
    %cst_295 = arith.constant 0.176776692 : f32
    %842 = vector.broadcast %cst_295 : f32 to vector<1x16xf32>
    %843 = arith.mulf %841, %842 : vector<1x16xf32>
    %cst_296 = arith.constant dense<0xFF800000> : vector<1xf32>
    %844 = vector.multi_reduction <maximumf>, %843, %cst_296 [1] : vector<1x16xf32> to vector<1xf32>
    %845 = vector.shape_cast %844 : vector<1xf32> to vector<1x1xf32>
    %846 = vector.broadcast %845 : vector<1x1xf32> to vector<1x16xf32>
    %847 = arith.subf %843, %846 : vector<1x16xf32>
    %848 = math.exp %847 : vector<1x16xf32>
    %cst_297 = arith.constant dense<0.000000e+00> : vector<1xf32>
    %849 = vector.multi_reduction <add>, %848, %cst_297 [1] : vector<1x16xf32> to vector<1xf32>
    %850 = vector.shape_cast %849 : vector<1xf32> to vector<1x1xf32>
    %851 = tpu.reciprocal %850 : vector<1x1xf32> -> vector<1x1xf32>
    %852 = vector.broadcast %851 : vector<1x1xf32> to vector<1x16xf32>
    %853 = arith.mulf %848, %852 : vector<1x16xf32>
    %cst_298 = arith.constant dense<0.000000e+00> : vector<1x8xf32>
    %854 = tpu.matmul %853, %839, %cst_298 {dimension_numbers = #tpu.dot_dimension_numbers<[1], [0], [0], [1], [0, 0, 1, 1], [], []>} : vector<1x16xf32>, vector<16x8xf32>, vector<1x8xf32> -> vector<1x8xf32>
    %855 = arith.addf %837, %854 : vector<1x8xf32>
    %856 = vector.extract_strided_slice %793 {offsets = [0, 24], sizes = [1, 8], strides = [1, 1]} : vector<1x32xf32> to vector<1x8xf32>
    %857 = vector.extract_strided_slice %797 {offsets = [0, 24], sizes = [16, 8], strides = [1, 1]} : vector<16x32xf32> to vector<16x8xf32>
    %858 = vector.extract_strided_slice %798 {offsets = [0, 24], sizes = [16, 8], strides = [1, 1]} : vector<16x32xf32> to vector<16x8xf32>
    %859 = tpu.transpose %857, [1, 0] : vector<16x8xf32> -> vector<8x16xf32>
    %cst_299 = arith.constant dense<0.000000e+00> : vector<1x16xf32>
    %860 = tpu.matmul %856, %859, %cst_299 {dimension_numbers = #tpu.dot_dimension_numbers<[1], [0], [0], [1], [0, 0, 1, 1], [], []>} : vector<1x8xf32>, vector<8x16xf32>, vector<1x16xf32> -> vector<1x16xf32>
    %cst_300 = arith.constant 0.176776692 : f32
    %861 = vector.broadcast %cst_300 : f32 to vector<1x16xf32>
    %862 = arith.mulf %860, %861 : vector<1x16xf32>
    %cst_301 = arith.constant dense<0xFF800000> : vector<1xf32>
    %863 = vector.multi_reduction <maximumf>, %862, %cst_301 [1] : vector<1x16xf32> to vector<1xf32>
    %864 = vector.shape_cast %863 : vector<1xf32> to vector<1x1xf32>
    %865 = vector.broadcast %864 : vector<1x1xf32> to vector<1x16xf32>
    %866 = arith.subf %862, %865 : vector<1x16xf32>
    %867 = math.exp %866 : vector<1x16xf32>
    %cst_302 = arith.constant dense<0.000000e+00> : vector<1xf32>
    %868 = vector.multi_reduction <add>, %867, %cst_302 [1] : vector<1x16xf32> to vector<1xf32>
    %869 = vector.shape_cast %868 : vector<1xf32> to vector<1x1xf32>
    %870 = tpu.reciprocal %869 : vector<1x1xf32> -> vector<1x1xf32>
    %871 = vector.broadcast %870 : vector<1x1xf32> to vector<1x16xf32>
    %872 = arith.mulf %867, %871 : vector<1x16xf32>
    %cst_303 = arith.constant dense<0.000000e+00> : vector<1x8xf32>
    %873 = tpu.matmul %872, %858, %cst_303 {dimension_numbers = #tpu.dot_dimension_numbers<[1], [0], [0], [1], [0, 0, 1, 1], [], []>} : vector<1x16xf32>, vector<16x8xf32>, vector<1x8xf32> -> vector<1x8xf32>
    %874 = arith.addf %856, %873 : vector<1x8xf32>
    %875 = tpu.concatenate %817, %836, %855, %874 in 1 : vector<1x8xf32>, vector<1x8xf32>, vector<1x8xf32>, vector<1x8xf32> -> vector<1x32xf32>
    %cst_304 = arith.constant dense<0.000000e+00> : vector<1x32xf32>
    %876 = tpu.matmul %875, %790, %cst_304 {dimension_numbers = #tpu.dot_dimension_numbers<[1], [0], [0], [1], [0, 0, 1, 1], [], []>} : vector<1x32xf32>, vector<32x32xf32>, vector<1x32xf32> -> vector<1x32xf32>
    %877 = arith.addf %876, %791 : vector<1x32xf32>
    %cst_305 = arith.constant 0.000000e+00 : f32
    %878 = vector.broadcast %cst_305 : f32 to vector<1x32xf32>
    %879 = arith.maximumf %877, %878 : vector<1x32xf32>
    %880 = arith.addf %875, %879 : vector<1x32xf32>
    %c592 = arith.constant 592 : index
    %c0_306 = arith.constant 0 : index
    %881 = vector.load %arg3[%c592, %c0_306] : memref<632x128xf32, #tpu.memory_space<vmem>>, vector<32x128xf32>
    %c624 = arith.constant 624 : index
    %c0_307 = arith.constant 0 : index
    %882 = vector.load %arg3[%c624, %c0_307] : memref<632x128xf32, #tpu.memory_space<vmem>>, vector<1x128xf32>
    %cst_308 = arith.constant dense<0.000000e+00> : vector<1x128xf32>
    %883 = tpu.matmul %880, %881, %cst_308 {dimension_numbers = #tpu.dot_dimension_numbers<[1], [0], [0], [1], [0, 0, 1, 1], [], []>} : vector<1x32xf32>, vector<32x128xf32>, vector<1x128xf32> -> vector<1x128xf32>
    %884 = arith.addf %883, %882 : vector<1x128xf32>
    %c0_309 = arith.constant 0 : index
    %c0_310 = arith.constant 0 : index
    %c0_311 = arith.constant 0 : index
    %885 = vector.load %arg4[%c0_309, %c0_310, %c0_311] : memref<1x1x128xf32, #tpu.memory_space<vmem>>, vector<1x1x128xf32>
    %886 = vector.shape_cast %885 : vector<1x1x128xf32> to vector<1x128xf32>
    %887 = vector.shape_cast %884 : vector<1x128xf32> to vector<1x1x128xf32>
    tpu.vector_store %arg4[%c0_309, %c0_310, %c0_311], %887 {strides = array<i32>} : memref<1x1x128xf32, #tpu.memory_space<vmem>>, vector<1x1x128xf32>,
    return
  }
  func.func @transform_0(%arg0: i32) -> (i32, i32, i32) {
    %c0_i32 = arith.constant 0 : i32
    %c0_i32_0 = arith.constant 0 : i32
    %c0_i32_1 = arith.constant 0 : i32
    return %arg0, %c0_i32, %c0_i32_0 : i32, i32, i32
  }
  func.func @transform_1(%arg0: i32) -> (i32, i32, i32) {
    %c0_i32 = arith.constant 0 : i32
    %c0_i32_0 = arith.constant 0 : i32
    %c0_i32_1 = arith.constant 0 : i32
    return %arg0, %c0_i32, %c0_i32_0 : i32, i32, i32
  }
  func.func @transform_2(%arg0: i32) -> (i32, i32) {
    %c0_i32 = arith.constant 0 : i32
    %c0_i32_0 = arith.constant 0 : i32
    %c0_i32_1 = arith.constant 0 : i32
    return %c0_i32, %c0_i32_0 : i32, i32
  }
  func.func @transform_3(%arg0: i32) -> (i32, i32, i32) {
    %c0_i32 = arith.constant 0 : i32
    %c0_i32_0 = arith.constant 0 : i32
    %c0_i32_1 = arith.constant 0 : i32
    return %arg0, %c0_i32, %c0_i32_0 : i32, i32, i32
  }
}

</mosaic_0001>

<bundles_post_ra>
// kernel: _lambda_.1
= control target key start
LH: loop header
LB: loop body
LE: loop exit
PB: predicated region body
PF: predicated region fallthrough
CT: control target
= control target key end

     0   :  { %8 = vsyncpa [#allocation3], 0  ;;  %s11250_s0 = inlined_call_operand.hbm [shape: f32[2,8,16], index: 0, kind: input, shape index: {}]   ;;  %s11251_s1 = inlined_call_operand.hbm [shape: f32[2,8,16], index: 1, kind: input, shape index: {}]   ;;  %s11252_s2 = inlined_call_operand.hbm [shape: f32[632,128], index: 2, kind: input, shape index: {}]   ;;  %s11253_s3 = inlined_call_operand.hbm [shape: f32[2,1,128], index: 3, kind: output, shape index: {}]  }
   0x1   :  { %10 = vsyncpa [#allocation3 + $0x1], 0 }
   0x2   :  { %11 = vsyncpa [#allocation6], 0 }
   0x3   :  { %13 = vsyncpa [#allocation6 + $0x1], 0 }
   0x4   :  { %14 = vsyncpa [#allocation4], 0 }
   0x5   :  { %16 = vsyncpa [#allocation4 + $0x1], 0  ;;  %s10067_s12 = smov 0   ;;  %s10069_s13 = smov 0  }
   0x6   :  { %s10071_s14 = smov 0   ;;  %s10073_s15 = smov 0  }
   0x7 LB: > { %s10088_s16 = sadd.s32 4294967295, %s10027_s15   ;;  %s8524_s17 = sadd.s32 4294967294, %s10027_s15   ;;  %s10027_s15 = sphi %s10073_s15, %s11275_s15   ;;  %s10023_s14 = sphi %s10071_s14, %s11274_s14   ;;  %s10019_s13 = sphi %s10069_s13, %s11273_s13   ;;  %s10015_s12 = sphi %s10067_s12, %s11272_s12  }
   0x8   : > { %p42_p0 = scmp.ne.s32.totalorder %s10019_s13, %s10015_s12  ;;  %p11254_p1 = scmp.eq.s32.totalorder %s10088_s16, 0 }
   0x9   : > { %p119_p3 = scmp.eq.s32.totalorder %s8524_s17, 1  ;;  %p8525_p5 = scmp.ge.s32.totalorder %s10027_s15, 1 }
   0xa   : > { %p10097_p4 = por %p11254_p1, %p42_p0  ;;  %p126_p7 = scmp.lt.s32.totalorder %s10027_s15, 3 }
   0xb   : > { %p10102_p6 = por %p119_p3, %p42_p0  ;;  %s10029_s21 = smov [#allocation7]  }
   0xc   : > { %s11258_s18 = scalar_select %p10097_p4, 1, 0 }
   0xd   : > { %s11259_s19 = scalar_select %p10102_p6, 1, 0 }
   0xe   : > { %p10107_p8 = pnand %p8525_p5, %p126_p7  ;;  %s138_s22 = sshll.u32 %s10029_s21, 4  ;;  %s139_s22 = int_to_ptr.vmem [resolvable:$true] %s138_s22 }
   0xf   : > { %s10121_s24 = sadd.s32 1, %s10027_s15   ;;  %s29_s25 = sadd.s32 1, %s10023_s14 }
  0x10   : > { %s11260_s20 = scalar_select %p10107_p8, 1, 0 }
  0x11   : > { %p9622_p9 = pneg %p10107_p8  ;;  %s26_s26 = ssub.s32 %s10027_s15, %s10121_s24 }
  0x12   : > { %s9884_s27 = scalar_lea.vmem %s139_s22, 10112  ;;  %p9892_p5 = scmp.lt.s32.totalorder %s139_s22, %s139_s22 }
  0x13   : > { %p10116_p11 = pnand %p9622_p9, %p11254_p1  ;;  %p9885_p13 = scmp.ne.s32.totalorder %s139_s22, %s9884_s27 }
  0x14   : > { %p9893_p7 = scmp.lt.s32.totalorder %s9884_s27, %s9884_s27 }
  0x15   : > { %p9875_p12 = pneg %p10116_p11 }
  0x16   : > { %p9894_p10 = por %p9893_p7, %p9892_p5 }
  0x17   : > { %p9887_p0 = pnand %p9885_p13, %p9875_p12 }
  0x19   : > { %p9888_p3 = pneg %p9887_p0 }
  0x1b   : > { %p9895_p2 = pnand %p9894_p10, %p9888_p3 }
  0x1d   : > { %9898 = shalt.err (!%p9895_p2)
}
  0x1e   : > { %s10030_s28 = smov 128   ;;  %s10031_s29 = smov 8  }
  0x1f   : > { %9625 = dma.hbm_to_vmem [thread:$0]  (!%p10116_p11), %s11252_s2, 10112, %s139_s22, [#allocation6], %s10030_s28, %s10030_s28, %s10031_s29  }
  0x20   : > { %p27_p9 = scmp.eq.s32.totalorder %s26_s26, 0  ;;  %p36_p12 = scmp.ne.s32.totalorder %s10023_s14, %s10019_s13 }
  0x21   : > { %p37_p10 = scmp.eq.s32.totalorder %s10027_s15, 0  ;;  %p9638_p2 = scmp.lt.s32.totalorder %s10027_s15, 2 }
  0x22   : > { %s10138_s5 = scalar_select %p27_p9, %s10023_s14, %s29_s25  }
  0x23   : > { %p38_p13 = por %p37_p10, %p36_p12  ;;  %p11262_p0 = scmp.eq.s32.totalorder %s10088_s16, 1 }
  0x24   : > { %s152_s7 = sand.u32 1, %s10023_s14   ;;  %s8529_s8 = sshll.u32 %s10027_s15, 7 }
  0x25   : > { %p10142_p3 = por %p11262_p0, %p36_p12  ;;  %s10148_s9 = sshll.u32 %s152_s7, 3 }
  0x26   : > { %s10153_s17 = scalar_lea.hbm %s11250_s0, %s8529_s8  ;;  %s156_s21 = scalar_lea.vmem [#allocation2], %s10148_s9 }
  0x27   : > { %s11263_s6 = scalar_select %p10142_p3, 1, 0 }
  0x28   : > { %s163_s22 = sshll.u32 %s156_s21, 4  ;;  %p10156_p11 = pnand %p9638_p2, %p38_p13  ;;  %s164_s22 = int_to_ptr.vmem [resolvable:$true] %s163_s22 }
  0x29   : > { %s10163_s27 = scalar_lea.hbm %s11251_s1, %s8529_s8  ;;  %s153_s28 = scalar_lea.sflag [#allocation3], %s152_s7 }
  0x2a   : > { %s9899_s29 = scalar_lea.hbm %s10153_s17, 128  ;;  %p9901_p7 = pneg %p10156_p11 }
  0x2b   : > { %p9900_p5 = scmp.ne.s32.totalorder %s10153_s17, %s9899_s29  ;;  %s9904_s10 = scalar_lea.hbm %s11250_s0, 256 }
  0x2c   : > { %p9905_p10 = scmp.lt.s32.totalorder %s10153_s17, %s11250_s0  ;;  %p9906_p2 = scmp.lt.s32.totalorder %s9904_s10, %s9899_s29 }
  0x2d   : > { %p9902_p9 = pnand %p9901_p7, %p9900_p5 }
  0x2e   : > { %p9907_p13 = por %p9906_p2, %p9905_p10 }
  0x2f   : > { %p9903_p12 = pneg %p9902_p9 }
  0x31   : > { %p9908_p0 = pnand %p9907_p13, %p9903_p12 }
  0x33   : > { %9911 = shalt.err (!%p9908_p0)
}
  0x34   : > { %s9912_s7 = scalar_lea.vmem %s164_s22, 128  ;;  %s10032_s8 = smov [#allocation2]  }
  0x35   : > { %p9913_p1 = scmp.ne.s32.totalorder %s164_s22, %s9912_s7  ;;  %s9917_s25 = sshll.u32 %s10032_s8, 4  ;;  %s9918_s25 = int_to_ptr.vmem [resolvable:$false] %s9917_s25 }
  0x36   : > { %s9919_s26 = scalar_lea.vmem %s9918_s25, 256  ;;  %p9920_p9 = scmp.lt.s32.totalorder %s164_s22, %s9918_s25 }
  0x37   : > { %p9915_p6 = pnand %p9913_p1, %p9901_p7  ;;  %p9921_p3 = scmp.lt.s32.totalorder %s9919_s26, %s9912_s7 }
  0x39   : > { %p9916_p5 = pneg %p9915_p6  ;;  %p9922_p4 = por %p9921_p3, %p9920_p9 }
  0x3b   : > { %p9923_p8 = pnand %p9922_p4, %p9916_p5 }
  0x3d   : > { %9926 = shalt.err (!%p9923_p8)
}
  0x3e   : > { %9629 = dma.hbm_to_vmem [thread:$0]  (!%p10156_p11), %s10153_s17, 128, %s164_s22, %s153_s28  }
  0x3f   : > { %s170_s29 = sand.u32 1, %s10027_s15   ;;  %s174_s30 = scalar_lea.vmem [#allocation5], %s10148_s9 }
  0x40   : > { %s181_s4 = sshll.u32 %s174_s30, 4  ;;  %s171_s10 = scalar_lea.sflag [#allocation6], %s170_s29  ;;  %s182_s4 = int_to_ptr.vmem [resolvable:$true] %s181_s4 }
  0x41   : > { %s9927_s11 = scalar_lea.hbm %s10163_s27, 128  ;;  %s9932_s8 = scalar_lea.hbm %s11251_s1, 256 }
  0x42   : > { %p9928_p1 = scmp.ne.s32.totalorder %s10163_s27, %s9927_s11  ;;  %p9933_p8 = scmp.lt.s32.totalorder %s10163_s27, %s11251_s1 }
  0x43   : > { %p9934_p3 = scmp.lt.s32.totalorder %s9932_s8, %s9927_s11 }
  0x44   : > { %p9930_p4 = pnand %p9928_p1, %p9901_p7 }
  0x45   : > { %p9935_p12 = por %p9934_p3, %p9933_p8 }
  0x46   : > { %p9931_p6 = pneg %p9930_p4 }
  0x48   : > { %p9936_p10 = pnand %p9935_p12, %p9931_p6 }
  0x4a   : > { %9939 = shalt.err (!%p9936_p10)
}
  0x4b   : > { %s9940_s9 = scalar_lea.vmem %s182_s4, 128  ;;  %s10033_s17 = smov [#allocation5]  }
  0x4c   : > { %p9941_p2 = scmp.ne.s32.totalorder %s182_s4, %s9940_s9  ;;  %s9945_s22 = sshll.u32 %s10033_s17, 4  ;;  %s9946_s22 = int_to_ptr.vmem [resolvable:$false] %s9945_s22 }
  0x4d   : > { %s9947_s28 = scalar_lea.vmem %s9946_s22, 256  ;;  %p9948_p5 = scmp.lt.s32.totalorder %s182_s4, %s9946_s22 }
  0x4e   : > { %p9943_p13 = pnand %p9941_p2, %p9901_p7  ;;  %p9949_p9 = scmp.lt.s32.totalorder %s9947_s28, %s9940_s9 }
  0x50   : > { %p9944_p0 = pneg %p9943_p13  ;;  %p9950_p1 = por %p9949_p9, %p9948_p5 }
  0x52   : > { %p9951_p4 = pnand %p9950_p1, %p9944_p0 }
  0x54   : > { %9954 = shalt.err (!%p9951_p4)
}
  0x55   : > { %9632 = dma.hbm_to_vmem [thread:$0]  (!%p10156_p11), %s10163_s27, 128, %s182_s4, %s171_s10  }
  0x56   : > { %p11265_p6 = scmp.ne.s32.totalorder %s11260_s20, 0 }
  0x57   : > { %s10208_s29 = sand.u32 (!%p11265_p6), 1, %s10019_s13   ;;  %p11266_p7 = scmp.ne.s32.totalorder (!%p11265_p6), %s11258_s18, 0 }
  0x58   : > { %190 = sbr.rel (%p11265_p6) target bundleno = 12877 (0x324d), region = 32  ;;  %s8533_s30 = sshll.u32 (!%p11265_p6), %s10208_s29, 3 }
  0x59   : > { %s193_s11 = scalar_lea.sflag (!%p11265_p6), [#allocation3], %s10208_s29  ;;  %s196_s21 = scalar_lea.vmem (!%p11265_p6), [#allocation2], %s8533_s30 }
  0x5d   : > { %9998 = dma.done.wait (%p11266_p7), %s193_s11, 128  }
  0x5e   : > { %10000 = vsyncadd (%p11266_p7), %s193_s11, 4294967168  ;;  %s201_s23 = sand.u32 1, %s10088_s16   ;;  %s10217_s20 = scalar_lea.vmem [#allocation5], %s8533_s30 }
  0x5f   : > { %s202_s27 = scalar_lea.sflag [#allocation6], %s201_s23 }
  0x60   : > { %10002 = dma.done.wait (%p11266_p7), %s202_s27, 128  }
  0x61   : > { %10004 = vsyncadd (%p11266_p7), %s202_s27, 4294967168  ;;  %p11267_p11 = scmp.eq.s32.totalorder %s10088_s16, 0 }
  0x63   : > { %10006 = dma.done.wait (%p11267_p11), [#allocation6], 10112   ;;  %p11268_p8 = pmov %p11267_p11 }
  0x64   : > { %v10034_v0 = vmov 0.0   ;;  %vm10035_vm0 = vmmov 0   ;;  %v241_v1 = vld [vmem:[#allocation7 + $0x20] sm:$0xff]  ;;  %v244_v2 = vld [vmem:[#allocation7 + $0x38] sm:$0xff]  ;;  %v243_v4 = vld [vmem:[#allocation7 + $0x30] sm:$0xff]  ;;  %vm333_vm1 = vcmask 130048  }
  0x65   : > { %10008 = vsyncadd (%p11268_p8), [#allocation6], 4294957184  ;;  %8966 = vmatprep.subr.mxu0 %v10034_v0  ;;  %8977 = vmatprep.subr.mxu1 %v10034_v0  ;;  %v240_v3 = vld [vmem:[#allocation7 + $0x18] sm:$0xff]  ;;  %v10233_v5 = vld [vmem:[%s196_s21] sm:$0xff]  ;;  %vm255_vm2 = vcmask 261120   ;;  %vm407_vm3 = vcmask 64512  }
  0x66   : > { %8981 = vmatprep.mubr.msk.f32.mxu1 %vm10035_vm0, %v10034_v0  ;;  %8974 = vmatprep.mubr.msk.f32.mxu0 %vm10035_vm0, %v10034_v0  ;;  %v239_v6 = vld [vmem:[#allocation7 + $0x10] sm:$0xff]  ;;  %v238_v7 = vld [vmem:[#allocation7 + $0x8] sm:$0xff]  ;;  %v237_v8 = vld [vmem:[#allocation7] sm:$0xff]  ;;  %s10036_s18 = smov 112   ;;  %s10037_s4 = smov 120   ;;  %vm1088_vm4 = vcmask 195584  }
  0x67   : > { %8967 = vmatpush3.msra.mxu0 %v241_v1  ;;  %8978 = vmatpush3.msra.mxu1 %v244_v2  ;;  %v8538_v9 = vld [vmem:[#allocation7 + $0x40] ss:$0 sm:$0xff]  ;;  %v8536_v13 = vld [vmem:[#allocation7 + $0x28] ss:$0 sm:$0xff]  ;;  %s10038_s10 = smov 104   ;;  %s10039_s7 = smov 96  }
  0x68   : > { %8968 = vmatprep.subr.mxu0 %v10034_v0  ;;  %8979 = vmatprep.subr.mxu1 %v10034_v0  ;;  %s10040_s8 = smov 80   ;;  %s10041_s25 = smov 72   ;;  %vm7630_vm5 = vcmask 122880  }
  0x69   : > { %8969 = vmatpush3.msra.mxu0 %v240_v3  ;;  %8980 = vmatpush3.msra.mxu1 %v243_v4  ;;  %s10042_s26 = smov 88   ;;  %s10043_s9 = smov 8  }
  0x6a   : > { %8970 = vmatprep.subr.mxu0 %v10034_v0  ;;  %8982 = vmatmul.mubr.msk.f32.vlgmr.msra.gmra.mxu1 %vm333_vm1, %v10233_v5  ;;  %s10044_s17 = smov 16   ;;  %s10045_s22 = smov 24  }
  0x6b   : > { %8971 = vmatpush3.msra.mxu0 %v239_v6  ;;  %8984 = vmatprep.subr.mxu1 %v10034_v0  ;;  %s8688_s28 = sshll.u32 %s10088_s16, 4  ;;  %s235_s30 = scalar_lea.vmem [#allocation8], %s10208_s29 }
  0x6c   : > { %8972 = vmatprep.subr.mxu0 %v10034_v0  ;;  %8986 = vmatprep.mubr.msk.f32.mxu1 %vm10035_vm0, %v10034_v0  ;;  %s8426_s11 = sshll.u32 %s235_s30, 4  ;;  %s11213_s27 = scalar_lea.hbm %s11253_s3, %s8688_s28  ;;  %s8427_s11 = int_to_ptr.vmem [resolvable:$true] %s8426_s11 }
  0x6d   : > { %8973 = vmatpush3.msra.mxu0 %v238_v7  ;;  %p11269_p12 = scmp.ne.s32.totalorder %s11263_s6, 0 }
  0x6e   : > { %8975 = vmatmul.mubr.msk.f32.vlgmr.msra.gmra.mxu0 %vm255_vm2, %v237_v8  ;;  %8989 = vmatprep.subr.mxu0 %v10034_v0 }
  0x6f   : > { %8991 = vmatprep.mubr.msk.f32.mxu0 %vm10035_vm0, %v10034_v0 }
 0x12a   : > { %v403_v10 = vpop.f32.mrf.mxu1 }
 0x12b   : > { %v10248_v11 = vadd.f32 %v8538_v9, %v403_v10 }
 0x12c   : > { %v8983_v12 = vpop.f32.mrf.mxu1 }
 0x12d   : > { %746 = vrot.lane.b32.xlu1 %v10248_v11, %s10036_s18  ;;  %575 = vrot.lane.b32.xlu0 %v10248_v11, %s10037_s4 }
 0x12e   : > { %8985 = vmatpush3.xpose.msk.msra.mxu1 %vm407_vm3, %v10248_v11  ;;  %v325_v14 = vpop.f32.mrf.mxu0 }
 0x12f   : > { %v10256_v15 = vadd.f32 %v8536_v13, %v325_v14  ;;  %8994 = vmatprep.subr.mxu1 %v10034_v0 }
 0x130   : > { %v8976_v16 = vpop.f32.mrf.mxu0 }
 0x131   : > { %744 = vrot.lane.b32.xlu1 %v10256_v15, %s10036_s18  ;;  %573 = vrot.lane.b32.xlu0 %v10256_v15, %s10037_s4  ;;  %v249_v16 = vld [vmem:[#allocation7 + $0x60] sm:$0xff] }
 0x132   : > { %8987 = vmatmul.mubr.msk.f32.vlgmr.msra.gmra.mxu1 %vm407_vm3, %v10256_v15 }
 0x133   : > { %8996 = vmatprep.mubr.msk.f32.mxu1 %vm10035_vm0, %v10034_v0 }
 0x135   : > { %915 = vrot.lane.b32.xlu1 %v10256_v15, %s10038_s10  ;;  %917 = vrot.lane.b32.xlu0 %v10248_v11, %s10038_s10 }
 0x19f   : > { %v747_v17 = vpop.permute.xlu1 %746  ;;  %v576_v18 = vpop.permute.xlu0 %575 }
 0x1a0   : > { %8995 = vmatpush3.xpose.msk.msra.mxu1 %vm407_vm3, %v576_v18  ;;  %v247_v18 = vld [vmem:[#allocation7 + $0x50] sm:$0xff] }
 0x1a1   : > { %9004 = vmatprep.subr.mxu1 %v10034_v0 }
 0x1a3   : > { %v10273_v19 = vpop.permute.xlu0 %573  ;;  %v10277_v20 = vpop.permute.xlu1 %744 }
 0x1a4   : > { %8997 = vmatmul.mubr.msk.f32.vlgmr.msra.gmra.mxu1 %vm407_vm3, %v10273_v19 }
 0x1a5   : > { %9005 = vmatpush3.xpose.msk.msra.mxu1 %vm407_vm3, %v747_v17  ;;  %9006 = vmatprep.mubr.msk.f32.mxu1 %vm10035_vm0, %v10034_v0  ;;  %v248_v17 = vld [vmem:[#allocation7 + $0x58] sm:$0xff] }
 0x1a6   : > { %9014 = vmatprep.subr.mxu1 %v10034_v0 }
 0x1a7   : > { %v918_v21 = vpop.permute.xlu0 %917  ;;  %v10289_v22 = vpop.permute.xlu1 %915 }
 0x1a8   : > { %9007 = vmatmul.mubr.msk.f32.vlgmr.msra.gmra.mxu1 %vm407_vm3, %v10277_v20 }
 0x1a9   : > { %9015 = vmatpush3.xpose.msk.msra.mxu1 %vm407_vm3, %v918_v21  ;;  %9016 = vmatprep.mubr.msk.f32.mxu1 %vm10035_vm0, %v10034_v0  ;;  %v246_v21 = vld [vmem:[#allocation7 + $0x48] sm:$0xff] }
 0x1aa   : > { %9024 = vmatprep.subr.mxu1 %v10034_v0 }
 0x1ac   : > { %9017 = vmatmul.mubr.msk.f32.vlgmr.msra.gmra.mxu1 %vm407_vm3, %v10289_v22 }
 0x1ad   : > { %9032 = vmatprep.mubr.msk.f32.mxu1 %vm10035_vm0, %v10034_v0  ;;  %9025 = vmatpush3.msra.mxu1 %v249_v16 }
 0x1ae   : > { %9026 = vmatprep.subr.mxu1 %v10034_v0 }
 0x1af   : > { %9027 = vmatpush3.msra.mxu1 %v248_v17 }
 0x1b0   : > { %9028 = vmatprep.subr.mxu1 %v10034_v0 }
 0x1b1   : > { %9029 = vmatpush3.msra.mxu1 %v247_v18 }
 0x1b2   : > { %9030 = vmatprep.subr.mxu1 %v10034_v0 }
 0x1b3   : > { %9031 = vmatpush3.msra.mxu1 %v246_v21 }
 0x1b4   : > { %9053 = vmatprep.subr.mxu1 %v10034_v0 }
 0x1f2   : > { %v480_v23 = vpop.f32.mrf.mxu1 }
 0x1f3   : > { %v484_v24 = vmul.f32 0.17677669, %v480_v23  ;;  %v1170_v23 = vld [vmem:[#allocation7 + $0x78] sm:$0xff] }
 0x1f4   : > { %v8988_v25 = vpop.f32.mrf.mxu1 }
 0x1f5   : > { %v485_v26 = vsel %vm407_vm3, %v484_v24, -inf }
 0x1f6   : > { %486 = vmax.xlane.f32.xlu0 %v485_v26 }
 0x264   : > { %v647_v27 = vpop.f32.mrf.mxu1 }
 0x265   : > { %v651_v28 = vmul.f32 0.17677669, %v647_v27 }
 0x266   : > { %v8998_v29 = vpop.f32.mrf.mxu1 }
 0x267   : > { %v652_v30 = vsel %vm407_vm3, %v651_v28, -inf }
 0x268   : > { %653 = vmax.xlane.f32.xlu1 %v652_v30  ;;  %v818_v31 = vpop.f32.mrf.mxu1 }
 0x269   : > { %v822_v32 = vmul.f32 0.17677669, %v818_v31 }
 0x26a   : > { %v9008_v33 = vpop.f32.mrf.mxu1 }
 0x26b   : > { %v823_v34 = vsel %vm407_vm3, %v822_v32, -inf }
 0x26c   : > { %824 = vmax.xlane.f32.xlu0 %v823_v34  ;;  %v989_v35 = vpop.f32.mrf.mxu1 }
 0x26d   : > { %v993_v36 = vmul.f32 0.17677669, %v989_v35 }
 0x26e   : > { %v9018_v37 = vpop.f32.mrf.mxu1 }
 0x26f   : > { %v994_v38 = vsel %vm407_vm3, %v993_v36, -inf }
 0x270   : > { %995 = vmax.xlane.f32.xlu0 %v994_v38 }
 0x279   : > { %496 = vrot.lane.b32.xlu1 %v10248_v11, %s10039_s7 }
 0x27f   : > { %v487_v39 = vpop.xlane.xlu0 %486 }
 0x280   : > { %v488_v40 = vsub.f32 %v484_v24, %v487_v39  ;;  %v1169_v24 = vld [vmem:[#allocation7 + $0x70] sm:$0xff] }
 0x282   : > { %v489_v41 = vmul.f32 1.442695, %v488_v40  ;;  %v1175_v40 = vld [vmem:[#allocation7 + $0xa0] sm:$0xff] }
 0x284   : > { %9688 = vpow2.f32 %v489_v41  ;;  %v1174_v41 = vld [vmem:[#allocation7 + $0x98] sm:$0xff] }
 0x291   : > { %v9689_v42 = vpop.eup %9688 }
 0x292   : > { %v491_v43 = vsel %vm407_vm3, %v9689_v42, 0.0 }
 0x29d   : > { %492 = vadd.xlane.f32.xlu1 %v491_v43  ;;  %v1172_v43 = vld [vmem:[#allocation7 + $0x88] sm:$0xff] }
 0x2f1   : > { %v654_v44 = vpop.xlane.xlu1 %653 }
 0x2f2   : > { %v655_v45 = vsub.f32 %v651_v28, %v654_v44  ;;  %v8554_v44 = vld [vmem:[#allocation7 + $0x80] ss:$0 sm:$0xff] }
 0x2f4   : > { %v656_v46 = vmul.f32 1.442695, %v655_v45 }
 0x2f5   : > { %v497_v47 = vpop.permute.xlu1 %496  ;;  %v825_v48 = vpop.xlane.xlu0 %824 }
 0x2f6   : > { %9690 = vpow2.f32 %v656_v46  ;;  %v826_v49 = vsub.f32 %v822_v32, %v825_v48  ;;  %8990 = vmatpush3.msra.mxu0 %v497_v47  ;;  %v8552_v48 = vld [vmem:[#allocation7 + $0x68] ss:$0 sm:$0xff] }
 0x2f7   : > { %8999 = vmatprep.subr.mxu0 %v10034_v0 }
 0x2f8   : > { %v827_v50 = vmul.f32 1.442695, %v826_v49 }
 0x2f9   : > { %v996_v51 = vpop.xlane.xlu0 %995 }
 0x2fa   : > { %9692 = vpow2.f32 %v827_v50  ;;  %v997_v52 = vsub.f32 %v993_v36, %v996_v51 }
 0x2fc   : > { %v998_v53 = vmul.f32 1.442695, %v997_v52 }
 0x2fe   : > { %9694 = vpow2.f32 %v998_v53 }
 0x303   : > { %v9691_v54 = vpop.eup %9690 }
 0x304   : > { %v658_v55 = vsel %vm407_vm3, %v9691_v54, 0.0 }
 0x305   : > { %659 = vadd.xlane.f32.xlu0 %v658_v55 }
 0x307   : > { %v9693_v56 = vpop.eup %9692 }
 0x308   : > { %v829_v57 = vsel %vm407_vm3, %v9693_v56, 0.0 }
 0x309   : > { %830 = vadd.xlane.f32.xlu1 %v829_v57 }
 0x30b   : > { %v9695_v58 = vpop.eup %9694 }
 0x30c   : > { %v1000_v59 = vsel %vm407_vm3, %v9695_v58, 0.0 }
 0x30d   : > { %1001 = vadd.xlane.f32.xlu0 %v1000_v59 }
 0x31a   : > { %834 = vrot.lane.b32.xlu1 %v10248_v11, %s10040_s8 }
 0x31e   : > { %1005 = vrot.lane.b32.xlu1 %v10248_v11, %s10041_s25 }
 0x323   : > { %663 = vrot.lane.b32.xlu0 %v10248_v11, %s10042_s26 }
 0x326   : > { %v493_v60 = vpop.xlane.xlu1 %492 }
 0x327   : > { %9696 = vrcp.f32 %v493_v60 }
 0x334   : > { %v9697_v61 = vpop.eup %9696 }
 0x335   : > { %v495_v62 = vmul.f32 %v9697_v61, %v9689_v42  ;;  %v1173_v42 = vld [vmem:[#allocation7 + $0x90] sm:$0xff] }
 0x337   : > { %8992 = vmatmul.mubr.msk.f32.vlgmr.msra.gmra.mxu0 %vm407_vm3, %v495_v62 }
 0x338   : > { %9001 = vmatprep.mubr.msk.f32.mxu0 %vm10035_vm0, %v10034_v0 }
 0x38e   : > { %v660_v63 = vpop.xlane.xlu0 %659 }
 0x38f   : > { %9698 = vrcp.f32 %v660_v63 }
 0x392   : > { %v831_v1 = vpop.xlane.xlu1 %830 }
 0x393   : > { %9700 = vrcp.f32 %v831_v1 }
 0x396   : > { %v1002_v2 = vpop.xlane.xlu0 %1001  ;;  %v835_v6 = vpop.permute.xlu1 %834 }
 0x397   : > { %9702 = vrcp.f32 %v1002_v2 }
 0x39a   : > { %v664_v3 = vpop.permute.xlu0 %663  ;;  %v1006_v10 = vpop.permute.xlu1 %1005 }
 0x39b   : > { %9000 = vmatpush3.msra.mxu0 %v664_v3 }
 0x39c   : > { %v9699_v4 = vpop.eup %9698  ;;  %9009 = vmatprep.subr.mxu0 %v10034_v0 }
 0x39d   : > { %v662_v7 = vmul.f32 %v9699_v4, %v9691_v54  ;;  %v8556_v54 = vld [vmem:[#allocation7 + $0xa8] ss:$0 sm:$0xff] }
 0x39f   : > { %9002 = vmatmul.mubr.msk.f32.vlgmr.msra.gmra.mxu0 %vm407_vm3, %v662_v7 }
 0x3a0   : > { %v9701_v8 = vpop.eup %9700  ;;  %9010 = vmatpush3.msra.mxu0 %v835_v6  ;;  %9011 = vmatprep.mubr.msk.f32.mxu0 %vm10035_vm0, %v10034_v0 }
 0x3a1   : > { %9019 = vmatprep.subr.mxu0 %v10034_v0  ;;  %v833_v9 = vmul.f32 %v9701_v8, %v9693_v56 }
 0x3a3   : > { %9012 = vmatmul.mubr.msk.f32.vlgmr.msra.gmra.mxu0 %vm407_vm3, %v833_v9 }
 0x3a4   : > { %v9703_v11 = vpop.eup %9702  ;;  %9020 = vmatpush3.msra.mxu0 %v1006_v10  ;;  %9021 = vmatprep.mubr.msk.f32.mxu0 %vm10035_vm0, %v10034_v0 }
 0x3a5   : > { %v1004_v12 = vmul.f32 %v9703_v11, %v9695_v58  ;;  %9035 = vmatprep.subr.mxu0 %v10034_v0 }
 0x3a7   : > { %9022 = vmatmul.mubr.msk.f32.vlgmr.msra.gmra.mxu0 %vm407_vm3, %v1004_v12 }
 0x3a8   : > { %9039 = vmatprep.mubr.msk.f32.mxu0 %vm10035_vm0, %v10034_v0  ;;  %9036 = vmatpush3.msra.mxu0 %v1170_v23 }
 0x3a9   : > { %9037 = vmatprep.subr.mxu0 %v10034_v0 }
 0x3aa   : > { %9038 = vmatpush3.msra.mxu0 %v1169_v24 }
 0x3ab   : > { %9040 = vmatmul.mubr.msk.f32.vlgmr.msra.gmra.mxu0 %vm333_vm1, %v10233_v5  ;;  %9042 = vmatprep.subr.mxu0 %v10034_v0 }
 0x3ac   : > { %9050 = vmatprep.mubr.msk.f32.mxu0 %vm10035_vm0, %v10034_v0  ;;  %9043 = vmatpush3.msra.mxu0 %v1175_v40 }
 0x3ad   : > { %9044 = vmatprep.subr.mxu0 %v10034_v0 }
 0x3ae   : > { %9045 = vmatpush3.msra.mxu0 %v1174_v41 }
 0x3af   : > { %9046 = vmatprep.subr.mxu0 %v10034_v0 }
 0x3b0   : > { %9047 = vmatpush3.msra.mxu0 %v1173_v42 }
 0x3b1   : > { %9048 = vmatprep.subr.mxu0 %v10034_v0 }
 0x3b2   : > { %9049 = vmatpush3.msra.mxu0 %v1172_v43 }
 0x3b3   : > { %9063 = vmatprep.subr.mxu0 %v10034_v0 }
 0x3f7   : > { %v568_v13 = vpop.f32.mrf.mxu0 }
 0x3f8   : > { %v572_v34 = vadd.f32 %v568_v13, %v10256_v15 }
 0x3f9   : > { %v8993_v14 = vpop.f32.mrf.mxu0 }
 0x45f   : > { %v735_v25 = vpop.f32.mrf.mxu0 }
 0x460   : > { %740 = vrot.lane.b32.xlu0 %v735_v25, %s10043_s9 }
 0x461   : > { %v9003_v26 = vpop.f32.mrf.mxu0 }
 0x463   : > { %v906_v27 = vpop.f32.mrf.mxu0 }
 0x464   : > { %911 = vrot.lane.b32.xlu1 %v906_v27, %s10044_s17 }
 0x465   : > { %v9013_v28 = vpop.f32.mrf.mxu0 }
 0x467   : > { %v1077_v29 = vpop.f32.mrf.mxu0 }
 0x468   : > { %1082 = vrot.lane.b32.xlu0 %v1077_v29, %s10045_s22 }
 0x469   : > { %v9023_v30 = vpop.f32.mrf.mxu0 }
 0x46b   : > { %v1252_v45 = vpop.f32.mrf.mxu0 }
 0x46c   : > { %v10353_v46 = vadd.f32 %v8554_v44, %v1252_v45 }
 0x46d   : > { %v9041_v47 = vpop.f32.mrf.mxu0 }
 0x46e   : > { %1498 = vrot.lane.b32.xlu0 %v10353_v46, %s10037_s4 }
 0x472   : > { %1669 = vrot.lane.b32.xlu0 %v10353_v46, %s10036_s18 }
 0x476   : > { %1840 = vrot.lane.b32.xlu0 %v10353_v46, %s10038_s10 }
 0x4d2   : > { %v741_v31 = vpop.permute.xlu0 %740 }
 0x4d3   : > { %v743_v33 = vadd.f32 %v741_v31, %v10256_v15 }
 0x4d5   : > { %v1086_v36 = vsel %vm407_vm3, %v572_v34, %v743_v33 }
 0x4d6   : > { %v912_v32 = vpop.permute.xlu1 %911 }
 0x4d7   : > { %v914_v5 = vadd.f32 %v912_v32, %v10256_v15 }
 0x4d9   : > { %v1087_v38 = vsel %vm333_vm1, %v1086_v36, %v914_v5 }
 0x4da   : > { %v1083_v35 = vpop.permute.xlu0 %1082 }
 0x4db   : > { %v1085_v37 = vadd.f32 %v1083_v35, %v10256_v15 }
 0x4dd   : > { %v1089_v39 = vsel %vm1088_vm4, %v1087_v38, %v1085_v37 }
 0x4de   : > { %9033 = vmatmul.mubr.msk.f32.vlgmr.msra.gmra.mxu1 %vm255_vm2, %v1089_v39 }
 0x4df   : > { %9055 = vmatprep.mubr.msk.f32.mxu1 %vm10035_vm0, %v10034_v0 }
 0x4e0   : > { %v1499_v58 = vpop.permute.xlu0 %1498 }
 0x4e4   : > { %v1670_v61 = vpop.permute.xlu0 %1669 }
 0x4e8   : > { %v1841_v63 = vpop.permute.xlu0 %1840 }
 0x59e   : > { %v1163_v49 = vpop.f32.mrf.mxu1 }
 0x59f   : > { %v1164_v50 = vadd.f32 %v8552_v48, %v1163_v49 }
 0x5a0   : > { %v9034_v51 = vpop.f32.mrf.mxu1 }
 0x5a1   : > { %v1167_v52 = vmax.f32 %v1164_v50, 0.0 }
 0x5a3   : > { %v1168_v53 = vadd.f32 %v1167_v52, %v1089_v39 }
 0x5a5   : > { %9051 = vmatmul.mubr.msk.f32.vlgmr.msra.gmra.mxu0 %vm255_vm2, %v1168_v53 }
 0x5a6   : > { %9065 = vmatprep.mubr.msk.f32.mxu0 %vm10035_vm0, %v10034_v0 }
 0x665   : > { %v1329_v55 = vpop.f32.mrf.mxu0 }
 0x666   : > { %v10365_v56 = vadd.f32 %v8556_v54, %v1329_v55 }
 0x667   : > { %v9052_v57 = vpop.f32.mrf.mxu0 }
 0x668   : > { %1500 = vrot.lane.b32.xlu1 %v10365_v56, %s10037_s4  ;;  %9054 = vmatpush3.xpose.msk.msra.mxu1 %vm407_vm3, %v10365_v56 }
 0x669   : > { %9058 = vmatprep.subr.mxu1 %v10034_v0 }
 0x66b   : > { %9056 = vmatmul.mubr.msk.f32.vlgmr.msra.gmra.mxu1 %vm407_vm3, %v10353_v46 }
 0x66c   : > { %1671 = vrot.lane.b32.xlu1 %v10365_v56, %s10036_s18  ;;  %9060 = vmatprep.mubr.msk.f32.mxu1 %vm10035_vm0, %v10034_v0 }
 0x670   : > { %1842 = vrot.lane.b32.xlu1 %v10365_v56, %s10038_s10 }
 0x6da   : > { %v1501_v59 = vpop.permute.xlu1 %1500 }
 0x6db   : > { %9064 = vmatpush3.xpose.msk.msra.mxu0 %vm407_vm3, %v1501_v59 }
 0x6dc   : > { %9073 = vmatprep.subr.mxu0 %v10034_v0 }
 0x6de   : > { %9066 = vmatmul.mubr.msk.f32.vlgmr.msra.gmra.mxu0 %vm407_vm3, %v1499_v58  ;;  %v1672_v60 = vpop.permute.xlu1 %1671 }
 0x6df   : > { %9074 = vmatpush3.xpose.msk.msra.mxu0 %vm407_vm3, %v1672_v60  ;;  %9075 = vmatprep.mubr.msk.f32.mxu0 %vm10035_vm0, %v10034_v0  ;;  %v1180_v60 = vld [vmem:[#allocation7 + $0xc8] sm:$0xff] }
 0x6e0   : > { %9083 = vmatprep.subr.mxu0 %v10034_v0 }
 0x6e2   : > { %9076 = vmatmul.mubr.msk.f32.vlgmr.msra.gmra.mxu0 %vm407_vm3, %v1670_v61  ;;  %v1843_v62 = vpop.permute.xlu1 %1842  ;;  %v1179_v61 = vld [vmem:[#allocation7 + $0xc0] sm:$0xff] }
 0x6e3   : > { %9084 = vmatpush3.xpose.msk.msra.mxu0 %vm407_vm3, %v1843_v62  ;;  %9085 = vmatprep.mubr.msk.f32.mxu0 %vm10035_vm0, %v10034_v0  ;;  %v1178_v62 = vld [vmem:[#allocation7 + $0xb8] sm:$0xff] }
 0x6e4   : > { %9093 = vmatprep.subr.mxu0 %v10034_v0 }
 0x6e6   : > { %9086 = vmatmul.mubr.msk.f32.vlgmr.msra.gmra.mxu0 %vm407_vm3, %v1841_v63  ;;  %v1177_v63 = vld [vmem:[#allocation7 + $0xb0] sm:$0xff] }
 0x6e7   : > { %9101 = vmatprep.mubr.msk.f32.mxu0 %vm10035_vm0, %v10034_v0  ;;  %9094 = vmatpush3.msra.mxu0 %v1180_v60 }
 0x6e8   : > { %9095 = vmatprep.subr.mxu0 %v10034_v0 }
 0x6e9   : > { %9096 = vmatpush3.msra.mxu0 %v1179_v61 }
 0x6ea   : > { %9097 = vmatprep.subr.mxu0 %v10034_v0 }
 0x6eb   : > { %9098 = vmatpush3.msra.mxu0 %v1178_v62 }
 0x6ec   : > { %9099 = vmatprep.subr.mxu0 %v10034_v0 }
 0x6ed   : > { %9100 = vmatpush3.msra.mxu0 %v1177_v63 }
 0x6ee   : > { %9115 = vmatprep.subr.mxu0 %v10034_v0 }
 0x72b   : > { %v1405_v1 = vpop.f32.mrf.mxu1 }
 0x72c   : > { %v1409_v2 = vmul.f32 0.17677669, %v1405_v1  ;;  %v2097_v1 = vld [vmem:[#allocation7 + $0xf8] sm:$0xff] }
 0x72d   : > { %v9057_v3 = vpop.f32.mrf.mxu1 }
 0x72e   : > { %v1410_v4 = vsel %vm407_vm3, %v1409_v2, -inf }
 0x72f   : > { %1411 = vmax.xlane.f32.xlu1 %v1410_v4  ;;  %v2095_v4 = vld [vmem:[#allocation7 + $0xe8] sm:$0xff] }
 0x79e   : > { %v1572_v6 = vpop.f32.mrf.mxu0 }
 0x79f   : > { %v1576_v7 = vmul.f32 0.17677669, %v1572_v6 }
 0x7a0   : > { %v9067_v8 = vpop.f32.mrf.mxu0 }
 0x7a1   : > { %v1577_v9 = vsel %vm407_vm3, %v1576_v7, -inf }
 0x7a2   : > { %1578 = vmax.xlane.f32.xlu0 %v1577_v9  ;;  %v1743_v10 = vpop.f32.mrf.mxu0 }
 0x7a3   : > { %v1747_v11 = vmul.f32 0.17677669, %v1743_v10 }
 0x7a4   : > { %v9077_v12 = vpop.f32.mrf.mxu0 }
 0x7a5   : > { %v1748_v13 = vsel %vm407_vm3, %v1747_v11, -inf }
 0x7a6   : > { %1749 = vmax.xlane.f32.xlu0 %v1748_v13  ;;  %v1914_v14 = vpop.f32.mrf.mxu0 }
 0x7a7   : > { %v1918_v16 = vmul.f32 0.17677669, %v1914_v14 }
 0x7a8   : > { %v9087_v17 = vpop.f32.mrf.mxu0 }
 0x7a9   : > { %v1919_v18 = vsel %vm407_vm3, %v1918_v16, -inf }
 0x7aa   : > { %1920 = vmax.xlane.f32.xlu1 %v1919_v18 }
 0x7b8   : > { %v1412_v21 = vpop.xlane.xlu1 %1411 }
 0x7b9   : > { %v1413_v23 = vsub.f32 %v1409_v2, %v1412_v21  ;;  %v2096_v2 = vld [vmem:[#allocation7 + $0xf0] sm:$0xff] }
 0x7bb   : > { %v1414_v24 = vmul.f32 1.442695, %v1413_v23  ;;  %1588 = vrot.lane.b32.xlu1 %v10365_v56, %s10042_s26 }
 0x7bd   : > { %9704 = vpow2.f32 %v1414_v24 }
 0x7ca   : > { %v9705_v25 = vpop.eup %9704 }
 0x7cb   : > { %v1416_v26 = vsel %vm407_vm3, %v9705_v25, 0.0 }
 0x7cc   : > { %1417 = vadd.xlane.f32.xlu0 %v1416_v26  ;;  %v2094_v26 = vld [vmem:[#allocation7 + $0xe0] sm:$0xff] }
 0x7e2   : > { %1421 = vrot.lane.b32.xlu0 %v10365_v56, %s10039_s7 }
 0x82b   : > { %v1579_v27 = vpop.xlane.xlu0 %1578 }
 0x82c   : > { %v1580_v28 = vsub.f32 %v1576_v7, %v1579_v27  ;;  %v2093_v27 = vld [vmem:[#allocation7 + $0xd8] sm:$0xff] }
 0x82e   : > { %v1581_v29 = vmul.f32 1.442695, %v1580_v28  ;;  %v2101_v28 = vld [vmem:[#allocation7 + $0x118] sm:$0xff] }
 0x82f   : > { %v1750_v30 = vpop.xlane.xlu0 %1749 }
 0x830   : > { %9706 = vpow2.f32 %v1581_v29  ;;  %v1751_v31 = vsub.f32 %v1747_v11, %v1750_v30  ;;  %v2099_v29 = vld [vmem:[#allocation7 + $0x108] sm:$0xff]  ;;  %v8570_v30 = vld [vmem:[#allocation7 + $0xd0] ss:$0 sm:$0xff] }
 0x832   : > { %v1752_v32 = vmul.f32 1.442695, %v1751_v31 }
 0x833   : > { %v1921_v33 = vpop.xlane.xlu1 %1920 }
 0x834   : > { %9708 = vpow2.f32 %v1752_v32  ;;  %v1922_v5 = vsub.f32 %v1918_v16, %v1921_v33 }
 0x836   : > { %v1923_v34 = vmul.f32 1.442695, %v1922_v5 }
 0x837   : > { %v1589_v45 = vpop.permute.xlu1 %1588 }
 0x838   : > { %9710 = vpow2.f32 %v1923_v34 }
 0x83d   : > { %v9707_v35 = vpop.eup %9706 }
 0x83e   : > { %v1583_v36 = vsel %vm407_vm3, %v9707_v35, 0.0 }
 0x83f   : > { %1584 = vadd.xlane.f32.xlu1 %v1583_v36 }
 0x841   : > { %v9709_v37 = vpop.eup %9708 }
 0x842   : > { %v1754_v38 = vsel %vm407_vm3, %v9709_v37, 0.0 }
 0x843   : > { %1755 = vadd.xlane.f32.xlu0 %v1754_v38 }
 0x845   : > { %v9711_v39 = vpop.eup %9710 }
 0x846   : > { %v1925_v40 = vsel %vm407_vm3, %v9711_v39, 0.0 }
 0x847   : > { %1926 = vadd.xlane.f32.xlu1 %v1925_v40 }
 0x855   : > { %v1418_v41 = vpop.xlane.xlu0 %1417 }
 0x856   : > { %9712 = vrcp.f32 %v1418_v41 }
 0x858   : > { %1759 = vrot.lane.b32.xlu1 %v10365_v56, %s10040_s8 }
 0x859   : > { %1930 = vrot.lane.b32.xlu0 %v10365_v56, %s10041_s25  ;;  %v1422_v42 = vpop.permute.xlu0 %1421 }
 0x85a   : > { %9059 = vmatpush3.msra.mxu1 %v1422_v42 }
 0x85b   : > { %9068 = vmatprep.subr.mxu1 %v10034_v0 }
 0x863   : > { %v9713_v43 = vpop.eup %9712 }
 0x864   : > { %v1420_v44 = vmul.f32 %v9713_v43, %v9705_v25  ;;  %v2102_v25 = vld [vmem:[#allocation7 + $0x120] sm:$0xff] }
 0x866   : > { %9061 = vmatmul.mubr.msk.f32.vlgmr.msra.gmra.mxu1 %vm407_vm3, %v1420_v44 }
 0x867   : > { %9069 = vmatpush3.msra.mxu1 %v1589_v45  ;;  %9070 = vmatprep.mubr.msk.f32.mxu1 %vm10035_vm0, %v10034_v0 }
 0x868   : > { %9078 = vmatprep.subr.mxu1 %v10034_v0 }
 0x8c8   : > { %v1585_v47 = vpop.xlane.xlu1 %1584 }
 0x8c9   : > { %9714 = vrcp.f32 %v1585_v47 }
 0x8cc   : > { %v1756_v48 = vpop.xlane.xlu0 %1755 }
 0x8cd   : > { %9716 = vrcp.f32 %v1756_v48 }
 0x8d0   : > { %v1927_v49 = vpop.xlane.xlu1 %1926  ;;  %v1931_v55 = vpop.permute.xlu0 %1930 }
 0x8d1   : > { %9718 = vrcp.f32 %v1927_v49 }
 0x8d4   : > { %v1760_v52 = vpop.permute.xlu1 %1759 }
 0x8d6   : > { %v9715_v50 = vpop.eup %9714 }
 0x8d7   : > { %v1587_v51 = vmul.f32 %v9715_v50, %v9707_v35  ;;  %v8572_v35 = vld [vmem:[#allocation7 + $0x100] ss:$0 sm:$0xff] }
 0x8d9   : > { %9071 = vmatmul.mubr.msk.f32.vlgmr.msra.gmra.mxu1 %vm407_vm3, %v1587_v51 }
 0x8da   : > { %v9717_v53 = vpop.eup %9716  ;;  %9079 = vmatpush3.msra.mxu1 %v1760_v52  ;;  %9080 = vmatprep.mubr.msk.f32.mxu1 %vm10035_vm0, %v10034_v0 }
 0x8db   : > { %9088 = vmatprep.subr.mxu1 %v10034_v0  ;;  %v1758_v54 = vmul.f32 %v9717_v53, %v9709_v37 }
 0x8dd   : > { %9081 = vmatmul.mubr.msk.f32.vlgmr.msra.gmra.mxu1 %vm407_vm3, %v1758_v54 }
 0x8de   : > { %v9719_v56 = vpop.eup %9718  ;;  %9089 = vmatpush3.msra.mxu1 %v1931_v55  ;;  %9090 = vmatprep.mubr.msk.f32.mxu1 %vm10035_vm0, %v10034_v0 }
 0x8df   : > { %v1929_v57 = vmul.f32 %v9719_v56, %v9711_v39  ;;  %9104 = vmatprep.subr.mxu1 %v10034_v0  ;;  %v8574_v39 = vld [vmem:[#allocation7 + $0x128] ss:$0 sm:$0xff] }
 0x8e1   : > { %9091 = vmatmul.mubr.msk.f32.vlgmr.msra.gmra.mxu1 %vm407_vm3, %v1929_v57 }
 0x8e2   : > { %9112 = vmatprep.mubr.msk.f32.mxu1 %vm10035_vm0, %v10034_v0  ;;  %9105 = vmatpush3.msra.mxu1 %v2097_v1 }
 0x8e3   : > { %9106 = vmatprep.subr.mxu1 %v10034_v0 }
 0x8e4   : > { %9107 = vmatpush3.msra.mxu1 %v2096_v2 }
 0x8e5   : > { %9108 = vmatprep.subr.mxu1 %v10034_v0 }
 0x8e6   : > { %9109 = vmatpush3.msra.mxu1 %v2095_v4 }
 0x8e7   : > { %9110 = vmatprep.subr.mxu1 %v10034_v0 }
 0x8e8   : > { %9111 = vmatpush3.msra.mxu1 %v2094_v26 }
 0x8e9   : > { %9113 = vmatmul.mubr.msk.f32.vlgmr.msra.gmra.mxu1 %vm255_vm2, %v2093_v27  ;;  %9126 = vmatprep.subr.mxu1 %v10034_v0 }
 0x8ea   : > { %9128 = vmatprep.mubr.msk.f32.mxu1 %vm10035_vm0, %v10034_v0 }
 0x926   : > { %v1493_v58 = vpop.f32.mrf.mxu1 }
 0x927   : > { %v1497_v16 = vadd.f32 %v1493_v58, %v10353_v46 }
 0x928   : > { %v9062_v59 = vpop.f32.mrf.mxu1 }
 0x999   : > { %v1660_v3 = vpop.f32.mrf.mxu1 }
 0x99a   : > { %1665 = vrot.lane.b32.xlu1 %v1660_v3, %s10043_s9 }
 0x99b   : > { %v9072_v6 = vpop.f32.mrf.mxu1 }
 0x99d   : > { %v1831_v7 = vpop.f32.mrf.mxu1 }
 0x99e   : > { %1836 = vrot.lane.b32.xlu0 %v1831_v7, %s10044_s17 }
 0x99f   : > { %v9082_v8 = vpop.f32.mrf.mxu1 }
 0x9a1   : > { %v2002_v9 = vpop.f32.mrf.mxu1 }
 0x9a2   : > { %2007 = vrot.lane.b32.xlu1 %v2002_v9, %s10045_s22 }
 0x9a3   : > { %v9092_v10 = vpop.f32.mrf.mxu1 }
 0x9a9   : > { %v2182_v36 = vpop.f32.mrf.mxu1 }
 0x9aa   : > { %v10461_v37 = vadd.f32 %v8572_v35, %v2182_v36 }
 0x9ab   : > { %v9114_v38 = vpop.f32.mrf.mxu1 }
 0x9ac   : > { %2428 = vrot.lane.b32.xlu1 %v10461_v37, %s10037_s4 }
 0x9b0   : > { %2599 = vrot.lane.b32.xlu1 %v10461_v37, %s10036_s18 }
 0x9b4   : > { %2770 = vrot.lane.b32.xlu1 %v10461_v37, %s10038_s10 }
 0xa0c   : > { %v1666_v11 = vpop.permute.xlu1 %1665 }
 0xa0d   : > { %v1668_v13 = vadd.f32 %v1666_v11, %v10353_v46 }
 0xa0f   : > { %v2011_v18 = vsel %vm407_vm3, %v1497_v16, %v1668_v13 }
 0xa10   : > { %v1837_v12 = vpop.permute.xlu0 %1836 }
 0xa11   : > { %v1839_v14 = vadd.f32 %v1837_v12, %v10353_v46 }
 0xa13   : > { %v2012_v23 = vsel %vm333_vm1, %v2011_v18, %v1839_v14 }
 0xa14   : > { %v2008_v17 = vpop.permute.xlu1 %2007 }
 0xa15   : > { %v2010_v21 = vadd.f32 %v2008_v17, %v10353_v46  ;;  %v2100_v46 = vld [vmem:[#allocation7 + $0x110] sm:$0xff] }
 0xa17   : > { %v2013_v24 = vsel %vm1088_vm4, %v2012_v23, %v2010_v21 }
 0xa18   : > { %9102 = vmatmul.mubr.msk.f32.vlgmr.msra.gmra.mxu0 %vm255_vm2, %v2013_v24 }
 0xa19   : > { %9123 = vmatprep.mubr.msk.f32.mxu0 %vm10035_vm0, %v10034_v0  ;;  %9116 = vmatpush3.msra.mxu0 %v2102_v25 }
 0xa1a   : > { %9117 = vmatprep.subr.mxu0 %v10034_v0 }
 0xa1b   : > { %9118 = vmatpush3.msra.mxu0 %v2101_v28 }
 0xa1c   : > { %9119 = vmatprep.subr.mxu0 %v10034_v0 }
 0xa1d   : > { %9120 = vmatpush3.msra.mxu0 %v2100_v46 }
 0xa1e   : > { %9121 = vmatprep.subr.mxu0 %v10034_v0  ;;  %v10484_v43 = vpop.permute.xlu1 %2428 }
 0xa1f   : > { %9122 = vmatpush3.msra.mxu0 %v2099_v29 }
 0xa20   : > { %9136 = vmatprep.subr.mxu0 %v10034_v0 }
 0xa22   : > { %v10490_v47 = vpop.permute.xlu1 %2599 }
 0xa26   : > { %v10502_v49 = vpop.permute.xlu1 %2770 }
 0xad8   : > { %v2087_v31 = vpop.f32.mrf.mxu0 }
 0xad9   : > { %v2088_v32 = vadd.f32 %v8570_v30, %v2087_v31 }
 0xada   : > { %v9103_v33 = vpop.f32.mrf.mxu0 }
 0xadb   : > { %v2091_v5 = vmax.f32 %v2088_v32, 0.0 }
 0xadd   : > { %v10455_v34 = vadd.f32 %v2091_v5, %v2013_v24 }
 0xadf   : > { %9124 = vmatmul.mubr.msk.f32.vlgmr.msra.gmra.mxu0 %vm255_vm2, %v10455_v34 }
 0xae0   : > { %9138 = vmatprep.mubr.msk.f32.mxu0 %vm10035_vm0, %v10034_v0 }
 0xb9f   : > { %v2259_v40 = vpop.f32.mrf.mxu0 }
 0xba0   : > { %v10469_v41 = vadd.f32 %v8574_v39, %v2259_v40 }
 0xba1   : > { %v9125_v42 = vpop.f32.mrf.mxu0 }
 0xba2   : > { %2430 = vrot.lane.b32.xlu0 %v10469_v41, %s10037_s4  ;;  %9127 = vmatpush3.xpose.msk.msra.mxu1 %vm407_vm3, %v10469_v41 }
 0xba3   : > { %9131 = vmatprep.subr.mxu1 %v10034_v0 }
 0xba5   : > { %9129 = vmatmul.mubr.msk.f32.vlgmr.msra.gmra.mxu1 %vm407_vm3, %v10461_v37 }
 0xba6   : > { %2601 = vrot.lane.b32.xlu0 %v10469_v41, %s10036_s18  ;;  %9133 = vmatprep.mubr.msk.f32.mxu1 %vm10035_vm0, %v10034_v0 }
 0xbaa   : > { %2772 = vrot.lane.b32.xlu0 %v10469_v41, %s10038_s10 }
 0xc14   : > { %v2431_v44 = vpop.permute.xlu0 %2430 }
 0xc15   : > { %9137 = vmatpush3.xpose.msk.msra.mxu0 %vm407_vm3, %v2431_v44 }
 0xc16   : > { %9146 = vmatprep.subr.mxu0 %v10034_v0 }
 0xc18   : > { %v2602_v45 = vpop.permute.xlu0 %2601  ;;  %9139 = vmatmul.mubr.msk.f32.vlgmr.msra.gmra.mxu0 %vm407_vm3, %v10484_v43 }
 0xc19   : > { %9147 = vmatpush3.xpose.msk.msra.mxu0 %vm407_vm3, %v2602_v45  ;;  %9148 = vmatprep.mubr.msk.f32.mxu0 %vm10035_vm0, %v10034_v0  ;;  %v3026_v45 = vld [vmem:[#allocation7 + $0x170] sm:$0xff] }
 0xc1a   : > { %9156 = vmatprep.subr.mxu0 %v10034_v0 }
 0xc1c   : > { %v2773_v48 = vpop.permute.xlu0 %2772  ;;  %9149 = vmatmul.mubr.msk.f32.vlgmr.msra.gmra.mxu0 %vm407_vm3, %v10490_v47 }
 0xc1d   : > { %9157 = vmatpush3.xpose.msk.msra.mxu0 %vm407_vm3, %v2773_v48  ;;  %9158 = vmatprep.mubr.msk.f32.mxu0 %vm10035_vm0, %v10034_v0  ;;  %v3025_v48 = vld [vmem:[#allocation7 + $0x168] sm:$0xff] }
 0xc1e   : > { %9166 = vmatprep.subr.mxu0 %v10034_v0 }
 0xc20   : > { %9159 = vmatmul.mubr.msk.f32.vlgmr.msra.gmra.mxu0 %vm407_vm3, %v10502_v49 }
 0xc21   : > { %9174 = vmatprep.mubr.msk.f32.mxu0 %vm10035_vm0, %v10034_v0 }
 0xc65   : > { %v2335_v50 = vpop.f32.mrf.mxu1 }
 0xc66   : > { %v2339_v51 = vmul.f32 0.17677669, %v2335_v50  ;;  %v3024_v50 = vld [vmem:[#allocation7 + $0x160] sm:$0xff] }
 0xc67   : > { %v9130_v52 = vpop.f32.mrf.mxu1 }
 0xc68   : > { %v2340_v53 = vsel %vm407_vm3, %v2339_v51, -inf }
 0xc69   : > { %2341 = vmax.xlane.f32.xlu0 %v2340_v53 }
 0xcd8   : > { %v2502_v54 = vpop.f32.mrf.mxu0 }
 0xcd9   : > { %v2506_v55 = vmul.f32 0.17677669, %v2502_v54  ;;  %v2107_v54 = vld [vmem:[#allocation7 + $0x148] sm:$0xff] }
 0xcda   : > { %v9140_v56 = vpop.f32.mrf.mxu0  ;;  %9167 = vmatpush3.msra.mxu0 %v2107_v54 }
 0xcdb   : > { %v2507_v57 = vsel %vm407_vm3, %v2506_v55, -inf  ;;  %9168 = vmatprep.subr.mxu0 %v10034_v0  ;;  %v2105_v56 = vld [vmem:[#allocation7 + $0x138] sm:$0xff] }
 0xcdc   : > { %2508 = vmax.xlane.f32.xlu1 %v2507_v57  ;;  %v2673_v58 = vpop.f32.mrf.mxu0  ;;  %v2104_v57 = vld [vmem:[#allocation7 + $0x130] sm:$0xff] }
 0xcdd   : > { %v2677_v59 = vmul.f32 0.17677669, %v2673_v58 }
 0xcde   : > { %v9150_v60 = vpop.f32.mrf.mxu0 }
 0xcdf   : > { %v2678_v61 = vsel %vm407_vm3, %v2677_v59, -inf }
 0xce0   : > { %v2844_v62 = vpop.f32.mrf.mxu0  ;;  %2679 = vmax.xlane.f32.xlu0 %v2678_v61 }
 0xce1   : > { %v2848_v63 = vmul.f32 0.17677669, %v2844_v62 }
 0xce2   : > { %v9160_v1 = vpop.f32.mrf.mxu0 }
 0xce3   : > { %v2849_v2 = vsel %vm407_vm3, %v2848_v63, -inf }
 0xce4   : > { %2850 = vmax.xlane.f32.xlu0 %v2849_v2 }
 0xced   : > { %2351 = vrot.lane.b32.xlu1 %v10469_v41, %s10039_s7 }
 0xcf2   : > { %v2342_v3 = vpop.xlane.xlu0 %2341 }
 0xcf3   : > { %v2343_v4 = vsub.f32 %v2339_v51, %v2342_v3  ;;  %v3023_v51 = vld [vmem:[#allocation7 + $0x158] sm:$0xff] }
 0xcf5   : > { %v2344_v6 = vmul.f32 1.442695, %v2343_v4 }
 0xcf7   : > { %9720 = vpow2.f32 %v2344_v6 }
 0xd04   : > { %v9721_v7 = vpop.eup %9720 }
 0xd05   : > { %v2346_v8 = vsel %vm407_vm3, %v9721_v7, 0.0 }
 0xd11   : > { %2347 = vadd.xlane.f32.xlu1 %v2346_v8 }
 0xd65   : > { %v2509_v9 = vpop.xlane.xlu1 %2508 }
 0xd66   : > { %v2510_v10 = vsub.f32 %v2506_v55, %v2509_v9  ;;  %v2106_v55 = vld [vmem:[#allocation7 + $0x140] sm:$0xff] }
 0xd67   : > { %9169 = vmatpush3.msra.mxu0 %v2106_v55 }
 0xd68   : > { %v2511_v11 = vmul.f32 1.442695, %v2510_v10  ;;  %9170 = vmatprep.subr.mxu0 %v10034_v0 }
 0xd69   : > { %v2352_v12 = vpop.permute.xlu1 %2351  ;;  %v2680_v13 = vpop.xlane.xlu0 %2679  ;;  %9171 = vmatpush3.msra.mxu0 %v2105_v56 }
 0xd6a   : > { %9722 = vpow2.f32 %v2511_v11  ;;  %v2681_v14 = vsub.f32 %v2677_v59, %v2680_v13  ;;  %9132 = vmatpush3.msra.mxu1 %v2352_v12  ;;  %9172 = vmatprep.subr.mxu0 %v10034_v0 }
 0xd6b   : > { %9141 = vmatprep.subr.mxu1 %v10034_v0  ;;  %9173 = vmatpush3.msra.mxu0 %v2104_v57 }
 0xd6c   : > { %v2682_v16 = vmul.f32 1.442695, %v2681_v14  ;;  %9188 = vmatprep.subr.mxu0 %v10034_v0 }
 0xd6d   : > { %v2851_v17 = vpop.xlane.xlu0 %2850 }
 0xd6e   : > { %9724 = vpow2.f32 %v2682_v16  ;;  %v2852_v18 = vsub.f32 %v2848_v63, %v2851_v17  ;;  %v8590_v63 = vld [vmem:[#allocation7 + $0x178] ss:$0 sm:$0xff]  ;;  %v3030_v17 = vld [vmem:[#allocation7 + $0x190] sm:$0xff] }
 0xd6f   : > { %v3031_v16 = vld [vmem:[#allocation7 + $0x198] sm:$0xff] }
 0xd70   : > { %v2853_v21 = vmul.f32 1.442695, %v2852_v18  ;;  %v3029_v18 = vld [vmem:[#allocation7 + $0x188] sm:$0xff] }
 0xd72   : > { %9726 = vpow2.f32 %v2853_v21  ;;  %v3028_v21 = vld [vmem:[#allocation7 + $0x180] sm:$0xff] }
 0xd77   : > { %v9723_v23 = vpop.eup %9722 }
 0xd78   : > { %v2513_v24 = vsel %vm407_vm3, %v9723_v23, 0.0 }
 0xd79   : > { %2514 = vadd.xlane.f32.xlu0 %v2513_v24 }
 0xd7b   : > { %v9725_v25 = vpop.eup %9724 }
 0xd7c   : > { %v2684_v26 = vsel %vm407_vm3, %v9725_v25, 0.0 }
 0xd7d   : > { %2685 = vadd.xlane.f32.xlu1 %v2684_v26 }
 0xd7f   : > { %v9727_v27 = vpop.eup %9726 }
 0xd80   : > { %v2855_v28 = vsel %vm407_vm3, %v9727_v27, 0.0 }
 0xd81   : > { %2856 = vadd.xlane.f32.xlu0 %v2855_v28 }
 0xd8e   : > { %2689 = vrot.lane.b32.xlu1 %v10469_v41, %s10040_s8 }
 0xd92   : > { %2860 = vrot.lane.b32.xlu1 %v10469_v41, %s10041_s25 }
 0xd97   : > { %2518 = vrot.lane.b32.xlu0 %v10469_v41, %s10042_s26 }
 0xd9a   : > { %v2348_v46 = vpop.xlane.xlu1 %2347 }
 0xd9b   : > { %9728 = vrcp.f32 %v2348_v46  ;;  %v8592_v46 = vld [vmem:[#allocation7 + $0x1a0] ss:$0 sm:$0xff] }
 0xda8   : > { %v9729_v29 = vpop.eup %9728 }
 0xda9   : > { %v2350_v30 = vmul.f32 %v9729_v29, %v9721_v7 }
 0xdab   : > { %9134 = vmatmul.mubr.msk.f32.vlgmr.msra.gmra.mxu1 %vm407_vm3, %v2350_v30 }
 0xdac   : > { %9143 = vmatprep.mubr.msk.f32.mxu1 %vm10035_vm0, %v10034_v0 }
 0xe02   : > { %v2515_v31 = vpop.xlane.xlu0 %2514 }
 0xe03   : > { %9730 = vrcp.f32 %v2515_v31 }
 0xe06   : > { %v2686_v32 = vpop.xlane.xlu1 %2685 }
 0xe07   : > { %9732 = vrcp.f32 %v2686_v32 }
 0xe0a   : > { %v2857_v33 = vpop.xlane.xlu0 %2856  ;;  %v2690_v36 = vpop.permute.xlu1 %2689 }
 0xe0b   : > { %9734 = vrcp.f32 %v2857_v33 }
 0xe0e   : > { %v2519_v5 = vpop.permute.xlu0 %2518  ;;  %v2861_v41 = vpop.permute.xlu1 %2860 }
 0xe0f   : > { %9142 = vmatpush3.msra.mxu1 %v2519_v5 }
 0xe10   : > { %v9731_v35 = vpop.eup %9730  ;;  %9151 = vmatprep.subr.mxu1 %v10034_v0 }
 0xe11   : > { %v2517_v38 = vmul.f32 %v9731_v35, %v9723_v23  ;;  %v8588_v23 = vld [vmem:[#allocation7 + $0x150] ss:$0 sm:$0xff] }
 0xe13   : > { %9144 = vmatmul.mubr.msk.f32.vlgmr.msra.gmra.mxu1 %vm407_vm3, %v2517_v38 }
 0xe14   : > { %v9733_v39 = vpop.eup %9732  ;;  %9152 = vmatpush3.msra.mxu1 %v2690_v36  ;;  %9153 = vmatprep.mubr.msk.f32.mxu1 %vm10035_vm0, %v10034_v0 }
 0xe15   : > { %9161 = vmatprep.subr.mxu1 %v10034_v0  ;;  %v2688_v40 = vmul.f32 %v9733_v39, %v9725_v25 }
 0xe17   : > { %9154 = vmatmul.mubr.msk.f32.vlgmr.msra.gmra.mxu1 %vm407_vm3, %v2688_v40 }
 0xe18   : > { %v9735_v42 = vpop.eup %9734  ;;  %9162 = vmatpush3.msra.mxu1 %v2861_v41  ;;  %9163 = vmatprep.mubr.msk.f32.mxu1 %vm10035_vm0, %v10034_v0 }
 0xe19   : > { %9177 = vmatprep.subr.mxu1 %v10034_v0  ;;  %v2859_v44 = vmul.f32 %v9735_v42, %v9727_v27 }
 0xe1b   : > { %9164 = vmatmul.mubr.msk.f32.vlgmr.msra.gmra.mxu1 %vm407_vm3, %v2859_v44 }
 0xe1c   : > { %9178 = vmatpush3.msra.mxu1 %v3026_v45  ;;  %9185 = vmatprep.mubr.msk.f32.mxu1 %vm10035_vm0, %v10034_v0 }
 0xe1d   : > { %9179 = vmatprep.subr.mxu1 %v10034_v0 }
 0xe1e   : > { %9180 = vmatpush3.msra.mxu1 %v3025_v48 }
 0xe1f   : > { %9181 = vmatprep.subr.mxu1 %v10034_v0 }
 0xe20   : > { %9182 = vmatpush3.msra.mxu1 %v3024_v50 }
 0xe21   : > { %9183 = vmatprep.subr.mxu1 %v10034_v0 }
 0xe22   : > { %9184 = vmatpush3.msra.mxu1 %v3023_v51 }
 0xe23   : > { %9186 = vmatmul.mubr.msk.f32.vlgmr.msra.gmra.mxu1 %vm255_vm2, %v10455_v34  ;;  %9199 = vmatprep.subr.mxu1 %v10034_v0 }
 0xe24   : > { %9201 = vmatprep.mubr.msk.f32.mxu1 %vm10035_vm0, %v10034_v0 }
 0xe6b   : > { %v2423_v52 = vpop.f32.mrf.mxu1 }
 0xe6c   : > { %v2427_v9 = vadd.f32 %v2423_v52, %v10461_v37 }
 0xe6d   : > { %v9135_v53 = vpop.f32.mrf.mxu1 }
 0xed3   : > { %v2590_v34 = vpop.f32.mrf.mxu1 }
 0xed4   : > { %2595 = vrot.lane.b32.xlu0 %v2590_v34, %s10043_s9 }
 0xed5   : > { %v9145_v58 = vpop.f32.mrf.mxu1 }
 0xed7   : > { %v2761_v59 = vpop.f32.mrf.mxu1 }
 0xed8   : > { %2766 = vrot.lane.b32.xlu1 %v2761_v59, %s10044_s17 }
 0xed9   : > { %v9155_v60 = vpop.f32.mrf.mxu1 }
 0xedb   : > { %v2932_v61 = vpop.f32.mrf.mxu1 }
 0xedc   : > { %2937 = vrot.lane.b32.xlu0 %v2932_v61, %s10045_s22 }
 0xedd   : > { %v9165_v62 = vpop.f32.mrf.mxu1 }
 0xee3   : > { %v3108_v1 = vpop.f32.mrf.mxu1 }
 0xee4   : > { %v10555_v2 = vadd.f32 %v8590_v63, %v3108_v1 }
 0xee5   : > { %v9187_v3 = vpop.f32.mrf.mxu1 }
 0xee6   : > { %3354 = vrot.lane.b32.xlu0 %v10555_v2, %s10037_s4 }
 0xeea   : > { %3525 = vrot.lane.b32.xlu0 %v10555_v2, %s10036_s18 }
 0xeee   : > { %3696 = vrot.lane.b32.xlu0 %v10555_v2, %s10038_s10 }
 0xf46   : > { %v2596_v4 = vpop.permute.xlu0 %2595 }
 0xf47   : > { %v2598_v7 = vadd.f32 %v2596_v4, %v10461_v37 }
 0xf49   : > { %v2941_v11 = vsel %vm407_vm3, %v2427_v9, %v2598_v7 }
 0xf4a   : > { %v2767_v6 = vpop.permute.xlu1 %2766 }
 0xf4b   : > { %v2769_v8 = vadd.f32 %v2767_v6, %v10461_v37 }
 0xf4d   : > { %v2942_v13 = vsel %vm333_vm1, %v2941_v11, %v2769_v8 }
 0xf4e   : > { %v2938_v10 = vpop.permute.xlu0 %2937 }
 0xf4f   : > { %v2940_v12 = vadd.f32 %v2938_v10, %v10461_v37 }
 0xf51   : > { %v2943_v14 = vsel %vm1088_vm4, %v2942_v13, %v2940_v12 }
 0xf52   : > { %9175 = vmatmul.mubr.msk.f32.vlgmr.msra.gmra.mxu0 %vm255_vm2, %v2943_v14 }
 0xf53   : > { %9196 = vmatprep.mubr.msk.f32.mxu0 %vm10035_vm0, %v10034_v0  ;;  %9189 = vmatpush3.msra.mxu0 %v3031_v16 }
 0xf54   : > { %9190 = vmatprep.subr.mxu0 %v10034_v0 }
 0xf55   : > { %9191 = vmatpush3.msra.mxu0 %v3030_v17 }
 0xf56   : > { %9192 = vmatprep.subr.mxu0 %v10034_v0 }
 0xf57   : > { %9193 = vmatpush3.msra.mxu0 %v3029_v18 }
 0xf58   : > { %9194 = vmatprep.subr.mxu0 %v10034_v0  ;;  %v3355_v32 = vpop.permute.xlu0 %3354 }
 0xf59   : > { %9195 = vmatpush3.msra.mxu0 %v3028_v21 }
 0xf5a   : > { %9209 = vmatprep.subr.mxu0 %v10034_v0 }
 0xf5c   : > { %v3526_v35 = vpop.permute.xlu0 %3525 }
 0xf60   : > { %v3697_v38 = vpop.permute.xlu0 %3696 }
0x1012   : > { %v3017_v24 = vpop.f32.mrf.mxu0 }
0x1013   : > { %v3018_v25 = vadd.f32 %v8588_v23, %v3017_v24 }
0x1014   : > { %v9176_v26 = vpop.f32.mrf.mxu0 }
0x1015   : > { %v3021_v27 = vmax.f32 %v3018_v25, 0.0 }
0x1017   : > { %v3022_v28 = vadd.f32 %v3021_v27, %v2943_v14 }
0x1019   : > { %9197 = vmatmul.mubr.msk.f32.vlgmr.msra.gmra.mxu0 %vm255_vm2, %v3022_v28 }
0x101a   : > { %9211 = vmatprep.mubr.msk.f32.mxu0 %vm10035_vm0, %v10034_v0 }
0x10d9   : > { %v3185_v29 = vpop.f32.mrf.mxu0 }
0x10da   : > { %v10580_v30 = vadd.f32 %v8592_v46, %v3185_v29 }
0x10db   : > { %v9198_v31 = vpop.f32.mrf.mxu0 }
0x10dc   : > { %3356 = vrot.lane.b32.xlu1 %v10580_v30, %s10037_s4  ;;  %9200 = vmatpush3.xpose.msk.msra.mxu1 %vm407_vm3, %v10580_v30 }
0x10dd   : > { %9204 = vmatprep.subr.mxu1 %v10034_v0 }
0x10df   : > { %9202 = vmatmul.mubr.msk.f32.vlgmr.msra.gmra.mxu1 %vm407_vm3, %v10555_v2 }
0x10e0   : > { %3527 = vrot.lane.b32.xlu1 %v10580_v30, %s10036_s18  ;;  %9206 = vmatprep.mubr.msk.f32.mxu1 %vm10035_vm0, %v10034_v0 }
0x10e4   : > { %3698 = vrot.lane.b32.xlu1 %v10580_v30, %s10038_s10 }
0x114e   : > { %v3357_v33 = vpop.permute.xlu1 %3356 }
0x114f   : > { %9210 = vmatpush3.xpose.msk.msra.mxu0 %vm407_vm3, %v3357_v33 }
0x1150   : > { %9219 = vmatprep.subr.mxu0 %v10034_v0 }
0x1152   : > { %v3528_v5 = vpop.permute.xlu1 %3527  ;;  %9212 = vmatmul.mubr.msk.f32.vlgmr.msra.gmra.mxu0 %vm407_vm3, %v3355_v32 }
0x1153   : > { %9220 = vmatpush3.xpose.msk.msra.mxu0 %vm407_vm3, %v3528_v5  ;;  %9221 = vmatprep.mubr.msk.f32.mxu0 %vm10035_vm0, %v10034_v0 }
0x1154   : > { %9229 = vmatprep.subr.mxu0 %v10034_v0 }
0x1156   : > { %v3699_v36 = vpop.permute.xlu1 %3698  ;;  %9222 = vmatmul.mubr.msk.f32.vlgmr.msra.gmra.mxu0 %vm407_vm3, %v3526_v35 }
0x1157   : > { %9230 = vmatpush3.xpose.msk.msra.mxu0 %vm407_vm3, %v3699_v36  ;;  %9231 = vmatprep.mubr.msk.f32.mxu0 %vm10035_vm0, %v10034_v0  ;;  %v9832_v36 = vld [vmem:[#allocation7 + $0x38] sm:$0xff] }
0x1158   : > { %9239 = vmatprep.subr.mxu0 %v10034_v0 }
0x115a   : > { %9232 = vmatmul.mubr.msk.f32.vlgmr.msra.gmra.mxu0 %vm407_vm3, %v3697_v38  ;;  %v10643_v38 = vld [vmem:[%s10217_s20] sm:$0xff]  ;;  %s8414_s20 = scalar_lea.sflag [#allocation4], %s10208_s29 }
0x115b   : > { %9247 = vmatprep.mubr.msk.f32.mxu0 %vm10035_vm0, %v10034_v0 }
0x119f   : > { %v3261_v39 = vpop.f32.mrf.mxu1 }
0x11a0   : > { %v3265_v40 = vmul.f32 0.17677669, %v3261_v39  ;;  %v9833_v39 = vld [vmem:[#allocation7 + $0x30] sm:$0xff] }
0x11a1   : > { %v9203_v41 = vpop.f32.mrf.mxu1 }
0x11a2   : > { %v3266_v42 = vsel %vm407_vm3, %v3265_v40, -inf }
0x11a3   : > { %3267 = vmax.xlane.f32.xlu1 %v3266_v42 }
0x1212   : > { %v3428_v44 = vpop.f32.mrf.mxu0 }
0x1213   : > { %v3432_v45 = vmul.f32 0.17677669, %v3428_v44 }
0x1214   : > { %v9213_v48 = vpop.f32.mrf.mxu0 }
0x1215   : > { %v3433_v50 = vsel %vm407_vm3, %v3432_v45, -inf }
0x1216   : > { %3434 = vmax.xlane.f32.xlu0 %v3433_v50  ;;  %v3599_v51 = vpop.f32.mrf.mxu0 }
0x1217   : > { %v3603_v52 = vmul.f32 0.17677669, %v3599_v51 }
0x1218   : > { %v9223_v53 = vpop.f32.mrf.mxu0 }
0x1219   : > { %v3604_v54 = vsel %vm407_vm3, %v3603_v52, -inf  ;;  %v9834_v53 = vld [vmem:[#allocation7 + $0x40] ss:$0 sm:$0xff] }
0x121a   : > { %3605 = vmax.xlane.f32.xlu0 %v3604_v54  ;;  %v3770_v55 = vpop.f32.mrf.mxu0 }
0x121b   : > { %v3774_v56 = vmul.f32 0.17677669, %v3770_v55 }
0x121c   : > { %v9233_v57 = vpop.f32.mrf.mxu0 }
0x121d   : > { %v3775_v34 = vsel %vm407_vm3, %v3774_v56, -inf }
0x121e   : > { %3776 = vmax.xlane.f32.xlu1 %v3775_v34 }
0x122c   : > { %v3268_v58 = vpop.xlane.xlu1 %3267 }
0x122d   : > { %v3269_v59 = vsub.f32 %v3265_v40, %v3268_v58  ;;  %v9836_v58 = vld [vmem:[#allocation7 + $0x58] sm:$0xff] }
0x122f   : > { %v3270_v60 = vmul.f32 1.442695, %v3269_v59  ;;  %3444 = vrot.lane.b32.xlu1 %v10580_v30, %s10042_s26  ;;  %v9838_v59 = vld [vmem:[#allocation7 + $0x48] sm:$0xff] }
0x1231   : > { %9736 = vpow2.f32 %v3270_v60 }
0x123e   : > { %v9737_v61 = vpop.eup %9736 }
0x123f   : > { %v3272_v62 = vsel %vm407_vm3, %v9737_v61, 0.0 }
0x1240   : > { %3273 = vadd.xlane.f32.xlu0 %v3272_v62 }
0x1256   : > { %3277 = vrot.lane.b32.xlu0 %v10580_v30, %s10039_s7 }
0x129f   : > { %v3435_v63 = vpop.xlane.xlu0 %3434 }
0x12a0   : > { %v3436_v1 = vsub.f32 %v3432_v45, %v3435_v63 }
0x12a2   : > { %v3437_v3 = vmul.f32 1.442695, %v3436_v1 }
0x12a3   : > { %v3606_v4 = vpop.xlane.xlu0 %3605 }
0x12a4   : > { %9738 = vpow2.f32 %v3437_v3  ;;  %v3607_v6 = vsub.f32 %v3603_v52, %v3606_v4 }
0x12a6   : > { %v3608_v7 = vmul.f32 1.442695, %v3607_v6 }
0x12a7   : > { %v3777_v8 = vpop.xlane.xlu1 %3776 }
0x12a8   : > { %9740 = vpow2.f32 %v3608_v7  ;;  %v3778_v9 = vsub.f32 %v3774_v56, %v3777_v8 }
0x12aa   : > { %v3779_v10 = vmul.f32 1.442695, %v3778_v9 }
0x12ab   : > { %v3445_v25 = vpop.permute.xlu1 %3444 }
0x12ac   : > { %9742 = vpow2.f32 %v3779_v10 }
0x12b1   : > { %v9739_v11 = vpop.eup %9738 }
0x12b2   : > { %v3439_v12 = vsel %vm407_vm3, %v9739_v11, 0.0 }
0x12b3   : > { %3440 = vadd.xlane.f32.xlu1 %v3439_v12 }
0x12b5   : > { %v9741_v13 = vpop.eup %9740 }
0x12b6   : > { %v3610_v14 = vsel %vm407_vm3, %v9741_v13, 0.0 }
0x12b7   : > { %3611 = vadd.xlane.f32.xlu0 %v3610_v14  ;;  %v10702_v14 = vld [vmem:[#allocation7 + $0x1c0] sm:$0xff] }
0x12b8   : > { %9240 = vmatpush3.msra.mxu0 %v10702_v14 }
0x12b9   : > { %v9743_v16 = vpop.eup %9742  ;;  %9241 = vmatprep.subr.mxu0 %v10034_v0 }
0x12ba   : > { %v3781_v17 = vsel %vm407_vm3, %v9743_v16, 0.0 }
0x12bb   : > { %3782 = vadd.xlane.f32.xlu1 %v3781_v17  ;;  %v10712_v17 = vld [vmem:[#allocation7 + $0x1b0] sm:$0xff] }
0x12c9   : > { %v3274_v18 = vpop.xlane.xlu0 %3273 }
0x12ca   : > { %9744 = vrcp.f32 %v3274_v18  ;;  %v10716_v18 = vld [vmem:[#allocation7 + $0x1a8] sm:$0xff] }
0x12cc   : > { %3615 = vrot.lane.b32.xlu1 %v10580_v30, %s10040_s8 }
0x12cd   : > { %3786 = vrot.lane.b32.xlu0 %v10580_v30, %s10041_s25  ;;  %v3278_v21 = vpop.permute.xlu0 %3277 }
0x12ce   : > { %9205 = vmatpush3.msra.mxu1 %v3278_v21 }
0x12cf   : > { %9214 = vmatprep.subr.mxu1 %v10034_v0 }
0x12d7   : > { %v9745_v23 = vpop.eup %9744 }
0x12d8   : > { %v3276_v24 = vmul.f32 %v9745_v23, %v9737_v61 }
0x12da   : > { %9207 = vmatmul.mubr.msk.f32.vlgmr.msra.gmra.mxu1 %vm407_vm3, %v3276_v24 }
0x12db   : > { %9215 = vmatpush3.msra.mxu1 %v3445_v25  ;;  %9216 = vmatprep.mubr.msk.f32.mxu1 %vm10035_vm0, %v10034_v0 }
0x12dc   : > { %9224 = vmatprep.subr.mxu1 %v10034_v0 }
0x133c   : > { %v3441_v26 = vpop.xlane.xlu1 %3440 }
0x133d   : > { %9746 = vrcp.f32 %v3441_v26 }
0x1340   : > { %v3612_v27 = vpop.xlane.xlu0 %3611 }
0x1341   : > { %9748 = vrcp.f32 %v3612_v27 }
0x1344   : > { %v3783_v28 = vpop.xlane.xlu1 %3782  ;;  %v3787_v33 = vpop.permute.xlu0 %3786 }
0x1345   : > { %9750 = vrcp.f32 %v3783_v28 }
0x1348   : > { %v3616_v30 = vpop.permute.xlu1 %3615 }
0x134a   : > { %v9747_v46 = vpop.eup %9746 }
0x134b   : > { %v3443_v29 = vmul.f32 %v9747_v46, %v9739_v11 }
0x134d   : > { %9217 = vmatmul.mubr.msk.f32.vlgmr.msra.gmra.mxu1 %vm407_vm3, %v3443_v29 }
0x134e   : > { %v9749_v31 = vpop.eup %9748  ;;  %9225 = vmatpush3.msra.mxu1 %v3616_v30  ;;  %9226 = vmatprep.mubr.msk.f32.mxu1 %vm10035_vm0, %v10034_v0 }
0x134f   : > { %9234 = vmatprep.subr.mxu1 %v10034_v0  ;;  %v3614_v32 = vmul.f32 %v9749_v31, %v9741_v13 }
0x1351   : > { %9227 = vmatmul.mubr.msk.f32.vlgmr.msra.gmra.mxu1 %vm407_vm3, %v3614_v32 }
0x1352   : > { %v9751_v5 = vpop.eup %9750  ;;  %9235 = vmatpush3.msra.mxu1 %v3787_v33  ;;  %9236 = vmatprep.mubr.msk.f32.mxu1 %vm10035_vm0, %v10034_v0 }
0x1353   : > { %v3785_v35 = vmul.f32 %v9751_v5, %v9743_v16  ;;  %9250 = vmatprep.subr.mxu1 %v10034_v0  ;;  %v10706_v16 = vld [vmem:[#allocation7 + $0x1b8] sm:$0xff] }
0x1354   : > { %9242 = vmatpush3.msra.mxu0 %v10706_v16 }
0x1355   : > { %9237 = vmatmul.mubr.msk.f32.vlgmr.msra.gmra.mxu1 %vm407_vm3, %v3785_v35  ;;  %9243 = vmatprep.subr.mxu0 %v10034_v0 }
0x1356   : > { %9251 = vmatpush3.msra.mxu1 %v9832_v36  ;;  %9254 = vmatprep.mubr.msk.f32.mxu1 %vm10035_vm0, %v10034_v0 }
0x1357   : > { %9252 = vmatprep.subr.mxu1 %v10034_v0  ;;  %9244 = vmatpush3.msra.mxu0 %v10712_v17 }
0x1358   : > { %9253 = vmatpush3.msra.mxu1 %v9833_v39  ;;  %9245 = vmatprep.subr.mxu0 %v10034_v0 }
0x1359   : > { %9255 = vmatmul.mubr.msk.f32.vlgmr.msra.gmra.mxu1 %vm333_vm1, %v10643_v38  ;;  %9257 = vmatprep.subr.mxu1 %v10034_v0 }
0x135a   : > { %9259 = vmatprep.mubr.msk.f32.mxu1 %vm10035_vm0, %v10034_v0  ;;  %9246 = vmatpush3.msra.mxu0 %v10716_v18 }
0x135b   : > { %9262 = vmatprep.subr.mxu0 %v10034_v0 }
0x139a   : > { %v10651_v40 = vpop.f32.mrf.mxu1 }
0x139c   : > { %v9208_v41 = vpop.f32.mrf.mxu1 }
0x139d   : > { %v3353_v41 = vadd.f32 %v10651_v40, %v10555_v2 }
0x140d   : > { %v10653_v42 = vpop.f32.mrf.mxu1 }
0x140f   : > { %v9218_v44 = vpop.f32.mrf.mxu1 }
0x1411   : > { %v10655_v45 = vpop.f32.mrf.mxu1 }
0x1413   : > { %v9228_v48 = vpop.f32.mrf.mxu1 }
0x1415   : > { %v10657_v50 = vpop.f32.mrf.mxu1 }
0x1417   : > { %v9238_v51 = vpop.f32.mrf.mxu1 }
0x1419   : > { %v4019_v52 = vpop.f32.mrf.mxu1 }
0x141a   : > { %v10659_v54 = vadd.f32 %v9834_v53, %v4019_v52 }
0x141b   : > { %v9256_v55 = vpop.f32.mrf.mxu1 }
0x141c   : > { %4352 = vrot.lane.b32.xlu0 %v10659_v54, %s10036_s18  ;;  %4185 = vrot.lane.b32.xlu1 %v10659_v54, %s10037_s4 }
0x141d   : > { %9258 = vmatpush3.xpose.msk.msra.mxu1 %vm407_vm3, %v10659_v54 }
0x141e   : > { %9267 = vmatprep.subr.mxu1 %v10034_v0 }
0x1420   : > { %9260 = vmatmul.mubr.msk.f32.vlgmr.msra.gmra.mxu1 %vm407_vm3, %v10256_v15  ;;  %4519 = vrot.lane.b32.xlu1 %v10659_v54, %s10038_s10 }
0x1421   : > { %9269 = vmatprep.mubr.msk.f32.mxu1 %vm10035_vm0, %v10034_v0 }
0x148e   : > { %v4186_v56 = vpop.permute.xlu1 %4185  ;;  %v4353_v57 = vpop.permute.xlu0 %4352 }
0x148f   : > { %9268 = vmatpush3.xpose.msk.msra.mxu1 %vm407_vm3, %v4186_v56 }
0x1490   : > { %9277 = vmatprep.subr.mxu1 %v10034_v0 }
0x1492   : > { %9270 = vmatmul.mubr.msk.f32.vlgmr.msra.gmra.mxu1 %vm407_vm3, %v10273_v19  ;;  %v4520_v34 = vpop.permute.xlu1 %4519  ;;  %v9835_v19 = vld [vmem:[#allocation7 + $0x60] sm:$0xff] }
0x1493   : > { %9278 = vmatpush3.xpose.msk.msra.mxu1 %vm407_vm3, %v4353_v57  ;;  %9279 = vmatprep.mubr.msk.f32.mxu1 %vm10035_vm0, %v10034_v0 }
0x1494   : > { %9287 = vmatprep.subr.mxu1 %v10034_v0 }
0x1496   : > { %9280 = vmatmul.mubr.msk.f32.vlgmr.msra.gmra.mxu1 %vm407_vm3, %v10277_v20  ;;  %v9837_v20 = vld [vmem:[#allocation7 + $0x50] sm:$0xff] }
0x1497   : > { %9288 = vmatpush3.xpose.msk.msra.mxu1 %vm407_vm3, %v4520_v34  ;;  %9289 = vmatprep.mubr.msk.f32.mxu1 %vm10035_vm0, %v10034_v0 }
0x1498   : > { %9297 = vmatprep.subr.mxu1 %v10034_v0 }
0x149a   : > { %9290 = vmatmul.mubr.msk.f32.vlgmr.msra.gmra.mxu1 %vm407_vm3, %v10289_v22 }
0x149b   : > { %9298 = vmatpush3.msra.mxu1 %v9835_v19  ;;  %9305 = vmatprep.mubr.msk.f32.mxu1 %vm10035_vm0, %v10034_v0 }
0x149c   : > { %9299 = vmatprep.subr.mxu1 %v10034_v0 }
0x149d   : > { %9300 = vmatpush3.msra.mxu1 %v9836_v58 }
0x149e   : > { %9301 = vmatprep.subr.mxu1 %v10034_v0 }
0x149f   : > { %9302 = vmatpush3.msra.mxu1 %v9837_v20 }
0x14a0   : > { %9303 = vmatprep.subr.mxu1 %v10034_v0 }
0x14a1   : > { %9304 = vmatpush3.msra.mxu1 %v9838_v59 }
0x14a2   : > { %9326 = vmatprep.subr.mxu1 %v10034_v0 }
0x14e0   : > { %v4092_v22 = vpop.f32.mrf.mxu1 }
0x14e1   : > { %v4096_v60 = vmul.f32 0.17677669, %v4092_v22 }
0x14e2   : > { %v9261_v61 = vpop.f32.mrf.mxu1 }
0x14e3   : > { %v4097_v62 = vsel %vm407_vm3, %v4096_v60, -inf }
0x14e4   : > { %4098 = vmax.xlane.f32.xlu0 %v4097_v62 }
0x1552   : > { %v4255_v63 = vpop.f32.mrf.mxu1 }
0x1553   : > { %v4259_v1 = vmul.f32 0.17677669, %v4255_v63 }
0x1554   : > { %v9271_v3 = vpop.f32.mrf.mxu1 }
0x1555   : > { %v4260_v4 = vsel %vm407_vm3, %v4259_v1, -inf }
0x1556   : > { %4261 = vmax.xlane.f32.xlu1 %v4260_v4  ;;  %v4422_v6 = vpop.f32.mrf.mxu1 }
0x1557   : > { %v4426_v7 = vmul.f32 0.17677669, %v4422_v6 }
0x1558   : > { %v9281_v8 = vpop.f32.mrf.mxu1 }
0x1559   : > { %v4427_v9 = vsel %vm407_vm3, %v4426_v7, -inf  ;;  %v9840_v8 = vld [vmem:[#allocation7 + $0x70] sm:$0xff] }
0x155a   : > { %4428 = vmax.xlane.f32.xlu0 %v4427_v9  ;;  %v4589_v10 = vpop.f32.mrf.mxu1  ;;  %v9841_v9 = vld [vmem:[#allocation7 + $0xa0] sm:$0xff] }
0x155b   : > { %v4593_v11 = vmul.f32 0.17677669, %v4589_v10  ;;  %v9842_v10 = vld [vmem:[#allocation7 + $0x98] sm:$0xff] }
0x155c   : > { %v9291_v12 = vpop.f32.mrf.mxu1 }
0x155d   : > { %v4594_v13 = vsel %vm407_vm3, %v4593_v11, -inf  ;;  %v9844_v12 = vld [vmem:[#allocation7 + $0x88] sm:$0xff] }
0x155e   : > { %4595 = vmax.xlane.f32.xlu0 %v4594_v13 }
0x1567   : > { %3521 = vrot.lane.b32.xlu1 %v10653_v42, %s10043_s9 }
0x156b   : > { %3863 = vrot.lane.b32.xlu1 %v10657_v50, %s10045_s22 }
0x156d   : > { %v4099_v21 = vpop.xlane.xlu0 %4098 }
0x156e   : > { %v4100_v23 = vsub.f32 %v4096_v60, %v4099_v21 }
0x156f   : > { %4108 = vrot.lane.b32.xlu1 %v10659_v54, %s10039_s7 }
0x1570   : > { %v4101_v24 = vmul.f32 1.442695, %v4100_v23 }
0x1572   : > { %9752 = vpow2.f32 %v4101_v24 }
0x1574   : > { %3692 = vrot.lane.b32.xlu0 %v10655_v45, %s10044_s17 }
0x1578   : > { %4271 = vrot.lane.b32.xlu0 %v10659_v54, %s10042_s26 }
0x157f   : > { %v9753_v25 = vpop.eup %9752 }
0x1580   : > { %v4103_v26 = vsel %vm407_vm3, %v9753_v25, 0.0 }
0x1593   : > { %4104 = vadd.xlane.f32.xlu1 %v4103_v26 }
0x15df   : > { %v4262_v27 = vpop.xlane.xlu1 %4261 }
0x15e0   : > { %v4263_v28 = vsub.f32 %v4259_v1, %v4262_v27 }
0x15e2   : > { %v4264_v46 = vmul.f32 1.442695, %v4263_v28 }
0x15e3   : > { %v4429_v29 = vpop.xlane.xlu0 %4428  ;;  %v3522_v30 = vpop.permute.xlu1 %3521 }
0x15e4   : > { %9754 = vpow2.f32 %v4264_v46  ;;  %v4430_v31 = vsub.f32 %v4426_v7, %v4429_v29  ;;  %v3524_v35 = vadd.f32 %v3522_v30, %v10555_v2  ;;  %v9839_v7 = vld [vmem:[#allocation7 + $0x78] sm:$0xff] }
0x15e6   : > { %v4431_v32 = vmul.f32 1.442695, %v4430_v31  ;;  %v3867_v45 = vsel %vm407_vm3, %v3353_v41, %v3524_v35 }
0x15e7   : > { %v4596_v33 = vpop.xlane.xlu0 %4595  ;;  %v3864_v36 = vpop.permute.xlu1 %3863 }
0x15e8   : > { %9756 = vpow2.f32 %v4431_v32  ;;  %v4597_v5 = vsub.f32 %v4593_v11, %v4596_v33  ;;  %v3866_v48 = vadd.f32 %v3864_v36, %v10555_v2  ;;  %v9843_v11 = vld [vmem:[#allocation7 + $0x90] sm:$0xff] }
0x15ea   : > { %v4598_v39 = vmul.f32 1.442695, %v4597_v5 }
0x15eb   : > { %v3693_v42 = vpop.permute.xlu0 %3692  ;;  %v4109_v52 = vpop.permute.xlu1 %4108 }
0x15ec   : > { %9758 = vpow2.f32 %v4598_v39  ;;  %v3695_v44 = vadd.f32 %v3693_v42, %v10555_v2 }
0x15ee   : > { %v3868_v50 = vsel %vm333_vm1, %v3867_v45, %v3695_v44  ;;  %v9845_v44 = vld [vmem:[#allocation7 + $0x80] ss:$0 sm:$0xff] }
0x15ef   : > { %v10735_v51 = vsel %vm1088_vm4, %v3868_v50, %v3866_v48  ;;  %v4272_v20 = vpop.permute.xlu0 %4271  ;;  %v9846_v50 = vld [vmem:[#allocation7 + $0x68] ss:$0 sm:$0xff] }
0x15f0   : > { %9248 = vmatmul.mubr.msk.f32.vlgmr.msra.gmra.mxu0 %vm255_vm2, %v10735_v51 }
0x15f1   : > { %v9755_v53 = vpop.eup %9754  ;;  %9263 = vmatpush3.msra.mxu0 %v4109_v52  ;;  %9264 = vmatprep.mubr.msk.f32.mxu0 %vm10035_vm0, %v10034_v0 }
0x15f2   : > { %v4266_v40 = vsel %vm407_vm3, %v9755_v53, 0.0  ;;  %9272 = vmatprep.subr.mxu0 %v10034_v0 }
0x15f3   : > { %4267 = vadd.xlane.f32.xlu0 %v4266_v40 }
0x15f5   : > { %v9757_v2 = vpop.eup %9756 }
0x15f6   : > { %v4433_v55 = vsel %vm407_vm3, %v9757_v2, 0.0 }
0x15f7   : > { %4434 = vadd.xlane.f32.xlu1 %v4433_v55 }
0x15f9   : > { %v9759_v56 = vpop.eup %9758 }
0x15fa   : > { %v4600_v57 = vsel %vm407_vm3, %v9759_v56, 0.0 }
0x15fb   : > { %4601 = vadd.xlane.f32.xlu0 %v4600_v57 }
0x1608   : > { %4438 = vrot.lane.b32.xlu1 %v10659_v54, %s10040_s8 }
0x1611   : > { %4605 = vrot.lane.b32.xlu0 %v10659_v54, %s10041_s25 }
0x161c   : > { %v4105_v34 = vpop.xlane.xlu1 %4104 }
0x161d   : > { %9760 = vrcp.f32 %v4105_v34 }
0x162a   : > { %v9761_v19 = vpop.eup %9760 }
0x162b   : > { %v4107_v58 = vmul.f32 %v9761_v19, %v9753_v25 }
0x162d   : > { %9265 = vmatmul.mubr.msk.f32.vlgmr.msra.gmra.mxu0 %vm407_vm3, %v4107_v58 }
0x162e   : > { %9273 = vmatpush3.msra.mxu0 %v4272_v20  ;;  %9274 = vmatprep.mubr.msk.f32.mxu0 %vm10035_vm0, %v10034_v0 }
0x162f   : > { %9282 = vmatprep.subr.mxu0 %v10034_v0 }
0x167c   : > { %v4268_v59 = vpop.xlane.xlu0 %4267 }
0x167d   : > { %9762 = vrcp.f32 %v4268_v59 }
0x1680   : > { %v4435_v22 = vpop.xlane.xlu1 %4434 }
0x1681   : > { %9764 = vrcp.f32 %v4435_v22 }
0x1684   : > { %v4602_v60 = vpop.xlane.xlu0 %4601  ;;  %v4439_v62 = vpop.permute.xlu1 %4438 }
0x1685   : > { %9766 = vrcp.f32 %v4602_v60 }
0x1688   : > { %v4606_v3 = vpop.permute.xlu0 %4605 }
0x168a   : > { %v9763_v54 = vpop.eup %9762 }
0x168b   : > { %v4270_v61 = vmul.f32 %v9763_v54, %v9755_v53  ;;  %v9848_v54 = vld [vmem:[#allocation7 + $0xc8] sm:$0xff] }
0x168d   : > { %9275 = vmatmul.mubr.msk.f32.vlgmr.msra.gmra.mxu0 %vm407_vm3, %v4270_v61  ;;  %v9849_v61 = vld [vmem:[#allocation7 + $0xc0] sm:$0xff] }
0x168e   : > { %v9765_v63 = vpop.eup %9764  ;;  %9283 = vmatpush3.msra.mxu0 %v4439_v62  ;;  %9284 = vmatprep.mubr.msk.f32.mxu0 %vm10035_vm0, %v10034_v0  ;;  %v9850_v62 = vld [vmem:[#allocation7 + $0xb8] sm:$0xff] }
0x168f   : > { %9292 = vmatprep.subr.mxu0 %v10034_v0  ;;  %v4437_v1 = vmul.f32 %v9765_v63, %v9757_v2  ;;  %v9851_v63 = vld [vmem:[#allocation7 + $0xb0] sm:$0xff] }
0x1691   : > { %9285 = vmatmul.mubr.msk.f32.vlgmr.msra.gmra.mxu0 %vm407_vm3, %v4437_v1 }
0x1692   : > { %v9767_v4 = vpop.eup %9766  ;;  %9293 = vmatpush3.msra.mxu0 %v4606_v3  ;;  %9294 = vmatprep.mubr.msk.f32.mxu0 %vm10035_vm0, %v10034_v0 }
0x1693   : > { %v4604_v6 = vmul.f32 %v9767_v4, %v9759_v56  ;;  %9308 = vmatprep.subr.mxu0 %v10034_v0  ;;  %v9847_v56 = vld [vmem:[#allocation7 + $0xa8] ss:$0 sm:$0xff] }
0x1695   : > { %9295 = vmatmul.mubr.msk.f32.vlgmr.msra.gmra.mxu0 %vm407_vm3, %v4604_v6 }
0x1696   : > { %9309 = vmatpush3.msra.mxu0 %v9839_v7  ;;  %9312 = vmatprep.mubr.msk.f32.mxu0 %vm10035_vm0, %v10034_v0 }
0x1697   : > { %9310 = vmatprep.subr.mxu0 %v10034_v0 }
0x1698   : > { %9311 = vmatpush3.msra.mxu0 %v9840_v8 }
0x1699   : > { %9313 = vmatmul.mubr.msk.f32.vlgmr.msra.gmra.mxu0 %vm333_vm1, %v10643_v38  ;;  %9315 = vmatprep.subr.mxu0 %v10034_v0 }
0x169a   : > { %9316 = vmatpush3.msra.mxu0 %v9841_v9  ;;  %9323 = vmatprep.mubr.msk.f32.mxu0 %vm10035_vm0, %v10034_v0 }
0x169b   : > { %9317 = vmatprep.subr.mxu0 %v10034_v0 }
0x169c   : > { %9318 = vmatpush3.msra.mxu0 %v9842_v10 }
0x169d   : > { %9319 = vmatprep.subr.mxu0 %v10034_v0 }
0x169e   : > { %9320 = vmatpush3.msra.mxu0 %v9843_v11 }
0x169f   : > { %9321 = vmatprep.subr.mxu0 %v10034_v0 }
0x16a0   : > { %9322 = vmatpush3.msra.mxu0 %v9844_v12 }
0x16a1   : > { %9336 = vmatprep.subr.mxu0 %v10034_v0 }
0x16b0   : > { %v10774_v38 = vpop.f32.mrf.mxu0 }
0x16b2   : > { %v9249_v13 = vpop.f32.mrf.mxu0 }
0x16ed   : > { %v4180_v21 = vpop.f32.mrf.mxu0 }
0x16ee   : > { %v4184_v33 = vadd.f32 %v4180_v21, %v10256_v15 }
0x16ef   : > { %v9266_v23 = vpop.f32.mrf.mxu0 }
0x174d   : > { %v4343_v24 = vpop.f32.mrf.mxu0 }
0x174e   : > { %4348 = vrot.lane.b32.xlu1 %v4343_v24, %s10043_s9 }
0x174f   : > { %v9276_v25 = vpop.f32.mrf.mxu0 }
0x1751   : > { %v4510_v26 = vpop.f32.mrf.mxu0 }
0x1752   : > { %4515 = vrot.lane.b32.xlu0 %v4510_v26, %s10044_s17 }
0x1753   : > { %v9286_v27 = vpop.f32.mrf.mxu0 }
0x1755   : > { %v4677_v28 = vpop.f32.mrf.mxu0 }
0x1756   : > { %4682 = vrot.lane.b32.xlu1 %v4677_v28, %s10045_s22 }
0x1757   : > { %v9296_v46 = vpop.f32.mrf.mxu0 }
0x1759   : > { %v4830_v42 = vpop.f32.mrf.mxu0 }
0x175a   : > { %v10789_v45 = vadd.f32 %v9845_v44, %v4830_v42 }
0x175b   : > { %v9314_v48 = vpop.f32.mrf.mxu0 }
0x175c   : > { %5072 = vrot.lane.b32.xlu1 %v10789_v45, %s10037_s4 }
0x1760   : > { %5243 = vrot.lane.b32.xlu1 %v10789_v45, %s10036_s18 }
0x1764   : > { %5414 = vrot.lane.b32.xlu1 %v10789_v45, %s10038_s10 }
0x17c0   : > { %v4349_v29 = vpop.permute.xlu1 %4348 }
0x17c1   : > { %v4351_v31 = vadd.f32 %v4349_v29, %v10256_v15 }
0x17c3   : > { %v4686_v35 = vsel %vm407_vm3, %v4184_v33, %v4351_v31 }
0x17c4   : > { %v4516_v30 = vpop.permute.xlu0 %4515 }
0x17c5   : > { %v4518_v32 = vadd.f32 %v4516_v30, %v10256_v15 }
0x17c7   : > { %v4687_v39 = vsel %vm333_vm1, %v4686_v35, %v4518_v32 }
0x17c8   : > { %v4683_v5 = vpop.permute.xlu1 %4682 }
0x17c9   : > { %v4685_v36 = vadd.f32 %v4683_v5, %v10256_v15 }
0x17cb   : > { %v4688_v41 = vsel %vm1088_vm4, %v4687_v39, %v4685_v36 }
0x17cc   : > { %9306 = vmatmul.mubr.msk.f32.vlgmr.msra.gmra.mxu1 %vm255_vm2, %v4688_v41 }
0x17cd   : > { %9328 = vmatprep.mubr.msk.f32.mxu1 %vm10035_vm0, %v10034_v0 }
0x17ce   : > { %v5073_v19 = vpop.permute.xlu1 %5072 }
0x17d2   : > { %v5244_v59 = vpop.permute.xlu1 %5243 }
0x17d6   : > { %v5415_v60 = vpop.permute.xlu1 %5414 }
0x188c   : > { %v4758_v15 = vpop.f32.mrf.mxu1 }
0x188d   : > { %v4759_v52 = vadd.f32 %v9846_v50, %v4758_v15 }
0x188e   : > { %v9307_v53 = vpop.f32.mrf.mxu1 }
0x188f   : > { %v4762_v40 = vmax.f32 %v4759_v52, 0.0 }
0x1891   : > { %v4763_v2 = vadd.f32 %v4762_v40, %v4688_v41 }
0x1893   : > { %9324 = vmatmul.mubr.msk.f32.vlgmr.msra.gmra.mxu0 %vm255_vm2, %v4763_v2 }
0x1894   : > { %9338 = vmatprep.mubr.msk.f32.mxu0 %vm10035_vm0, %v10034_v0 }
0x1953   : > { %v4903_v55 = vpop.f32.mrf.mxu0 }
0x1954   : > { %v10800_v57 = vadd.f32 %v9847_v56, %v4903_v55 }
0x1955   : > { %v9325_v34 = vpop.f32.mrf.mxu0 }
0x1956   : > { %5074 = vrot.lane.b32.xlu0 %v10800_v57, %s10037_s4  ;;  %9327 = vmatpush3.xpose.msk.msra.mxu1 %vm407_vm3, %v10800_v57 }
0x1957   : > { %9331 = vmatprep.subr.mxu1 %v10034_v0 }
0x1959   : > { %9329 = vmatmul.mubr.msk.f32.vlgmr.msra.gmra.mxu1 %vm407_vm3, %v10789_v45 }
0x195a   : > { %5245 = vrot.lane.b32.xlu0 %v10800_v57, %s10036_s18  ;;  %9333 = vmatprep.mubr.msk.f32.mxu1 %vm10035_vm0, %v10034_v0 }
0x195e   : > { %5416 = vrot.lane.b32.xlu0 %v10800_v57, %s10038_s10 }
0x19c8   : > { %v5075_v58 = vpop.permute.xlu0 %5074 }
0x19c9   : > { %9337 = vmatpush3.xpose.msk.msra.mxu0 %vm407_vm3, %v5075_v58 }
0x19ca   : > { %9346 = vmatprep.subr.mxu0 %v10034_v0 }
0x19cc   : > { %9339 = vmatmul.mubr.msk.f32.vlgmr.msra.gmra.mxu0 %vm407_vm3, %v5073_v19  ;;  %v5246_v20 = vpop.permute.xlu0 %5245 }
0x19cd   : > { %9347 = vmatpush3.xpose.msk.msra.mxu0 %vm407_vm3, %v5246_v20  ;;  %9348 = vmatprep.mubr.msk.f32.mxu0 %vm10035_vm0, %v10034_v0 }
0x19ce   : > { %9356 = vmatprep.subr.mxu0 %v10034_v0 }
0x19d0   : > { %9349 = vmatmul.mubr.msk.f32.vlgmr.msra.gmra.mxu0 %vm407_vm3, %v5244_v59  ;;  %v5417_v22 = vpop.permute.xlu0 %5416 }
0x19d1   : > { %9357 = vmatpush3.xpose.msk.msra.mxu0 %vm407_vm3, %v5417_v22  ;;  %9358 = vmatprep.mubr.msk.f32.mxu0 %vm10035_vm0, %v10034_v0 }
0x19d2   : > { %9366 = vmatprep.subr.mxu0 %v10034_v0 }
0x19d4   : > { %9359 = vmatmul.mubr.msk.f32.vlgmr.msra.gmra.mxu0 %vm407_vm3, %v5415_v60 }
0x19d5   : > { %9367 = vmatpush3.msra.mxu0 %v9848_v54  ;;  %9374 = vmatprep.mubr.msk.f32.mxu0 %vm10035_vm0, %v10034_v0 }
0x19d6   : > { %9368 = vmatprep.subr.mxu0 %v10034_v0 }
0x19d7   : > { %9369 = vmatpush3.msra.mxu0 %v9849_v61 }
0x19d8   : > { %9370 = vmatprep.subr.mxu0 %v10034_v0 }
0x19d9   : > { %9371 = vmatpush3.msra.mxu0 %v9850_v62 }
0x19da   : > { %9372 = vmatprep.subr.mxu0 %v10034_v0 }
0x19db   : > { %9373 = vmatpush3.msra.mxu0 %v9851_v63 }
0x19dc   : > { %9388 = vmatprep.subr.mxu0 %v10034_v0 }
0x1a19   : > { %v4979_v1 = vpop.f32.mrf.mxu1 }
0x1a1a   : > { %v4983_v3 = vmul.f32 0.17677669, %v4979_v1  ;;  %v9852_v1 = vld [vmem:[#allocation7 + $0x120] sm:$0xff] }
0x1a1b   : > { %v9330_v4 = vpop.f32.mrf.mxu1 }
0x1a1c   : > { %v4984_v6 = vsel %vm407_vm3, %v4983_v3, -inf  ;;  %v9854_v4 = vld [vmem:[#allocation7 + $0x110] sm:$0xff] }
0x1a1d   : > { %4985 = vmax.xlane.f32.xlu0 %v4984_v6  ;;  %v9855_v6 = vld [vmem:[#allocation7 + $0x108] sm:$0xff] }
0x1a8c   : > { %v5146_v7 = vpop.f32.mrf.mxu0 }
0x1a8d   : > { %v5150_v8 = vmul.f32 0.17677669, %v5146_v7 }
0x1a8e   : > { %v9340_v9 = vpop.f32.mrf.mxu0 }
0x1a8f   : > { %v5151_v10 = vsel %vm407_vm3, %v5150_v8, -inf }
0x1a90   : > { %5152 = vmax.xlane.f32.xlu1 %v5151_v10  ;;  %v5317_v11 = vpop.f32.mrf.mxu0 }
0x1a91   : > { %v5321_v12 = vmul.f32 0.17677669, %v5317_v11 }
0x1a92   : > { %v9350_v13 = vpop.f32.mrf.mxu0 }
0x1a93   : > { %v5322_v21 = vsel %vm407_vm3, %v5321_v12, -inf }
0x1a94   : > { %v5488_v23 = vpop.f32.mrf.mxu0  ;;  %5323 = vmax.xlane.f32.xlu0 %v5322_v21 }
0x1a95   : > { %v5492_v24 = vmul.f32 0.17677669, %v5488_v23 }
0x1a96   : > { %v9360_v25 = vpop.f32.mrf.mxu0 }
0x1a97   : > { %v5493_v26 = vsel %vm407_vm3, %v5492_v24, -inf }
0x1a98   : > { %5494 = vmax.xlane.f32.xlu0 %v5493_v26 }
0x1aa1   : > { %4995 = vrot.lane.b32.xlu1 %v10800_v57, %s10039_s7 }
0x1aa6   : > { %v4986_v27 = vpop.xlane.xlu0 %4985 }
0x1aa7   : > { %v4987_v28 = vsub.f32 %v4983_v3, %v4986_v27  ;;  %v9853_v3 = vld [vmem:[#allocation7 + $0x118] sm:$0xff] }
0x1aa9   : > { %v4988_v46 = vmul.f32 1.442695, %v4987_v28 }
0x1aab   : > { %9768 = vpow2.f32 %v4988_v46 }
0x1ab8   : > { %v9769_v29 = vpop.eup %9768 }
0x1ab9   : > { %v4990_v30 = vsel %vm407_vm3, %v9769_v29, 0.0 }
0x1ac5   : > { %4991 = vadd.xlane.f32.xlu1 %v4990_v30 }
0x1b19   : > { %v5153_v31 = vpop.xlane.xlu1 %5152 }
0x1b1a   : > { %v5154_v32 = vsub.f32 %v5150_v8, %v5153_v31 }
0x1b1c   : > { %v5155_v33 = vmul.f32 1.442695, %v5154_v32 }
0x1b1d   : > { %v4996_v5 = vpop.permute.xlu1 %4995  ;;  %v5324_v35 = vpop.xlane.xlu0 %5323 }
0x1b1e   : > { %9770 = vpow2.f32 %v5155_v33  ;;  %v5325_v36 = vsub.f32 %v5321_v12, %v5324_v35  ;;  %9332 = vmatpush3.msra.mxu1 %v4996_v5  ;;  %v9856_v33 = vld [vmem:[#allocation7 + $0xd0] ss:$0 sm:$0xff] }
0x1b1f   : > { %9341 = vmatprep.subr.mxu1 %v10034_v0 }
0x1b20   : > { %v5326_v39 = vmul.f32 1.442695, %v5325_v36 }
0x1b21   : > { %v5495_v41 = vpop.xlane.xlu0 %5494 }
0x1b22   : > { %9772 = vpow2.f32 %v5326_v39  ;;  %v5496_v42 = vsub.f32 %v5492_v24, %v5495_v41  ;;  %v9857_v41 = vld [vmem:[#allocation7 + $0x128] ss:$0 sm:$0xff] }
0x1b24   : > { %v5497_v44 = vmul.f32 1.442695, %v5496_v42 }
0x1b26   : > { %9774 = vpow2.f32 %v5497_v44 }
0x1b2b   : > { %v9771_v48 = vpop.eup %9770 }
0x1b2c   : > { %v5157_v15 = vsel %vm407_vm3, %v9771_v48, 0.0 }
0x1b2d   : > { %5158 = vadd.xlane.f32.xlu0 %v5157_v15 }
0x1b2f   : > { %v9773_v50 = vpop.eup %9772 }
0x1b30   : > { %v5328_v52 = vsel %vm407_vm3, %v9773_v50, 0.0 }
0x1b31   : > { %5329 = vadd.xlane.f32.xlu1 %v5328_v52  ;;  %v9859_v52 = vld [vmem:[#allocation7 + $0x140] sm:$0xff] }
0x1b33   : > { %v9775_v53 = vpop.eup %9774 }
0x1b34   : > { %v5499_v40 = vsel %vm407_vm3, %v9775_v53, 0.0 }
0x1b35   : > { %5500 = vadd.xlane.f32.xlu0 %v5499_v40 }
0x1b42   : > { %5333 = vrot.lane.b32.xlu1 %v10800_v57, %s10040_s8 }
0x1b46   : > { %5504 = vrot.lane.b32.xlu1 %v10800_v57, %s10041_s25 }
0x1b4b   : > { %5162 = vrot.lane.b32.xlu0 %v10800_v57, %s10042_s26 }
0x1b4e   : > { %v4992_v2 = vpop.xlane.xlu1 %4991 }
0x1b4f   : > { %9776 = vrcp.f32 %v4992_v2 }
0x1b5c   : > { %v9777_v55 = vpop.eup %9776 }
0x1b5d   : > { %v4994_v56 = vmul.f32 %v9777_v55, %v9769_v29 }
0x1b5f   : > { %9334 = vmatmul.mubr.msk.f32.vlgmr.msra.gmra.mxu1 %vm407_vm3, %v4994_v56 }
0x1b60   : > { %9343 = vmatprep.mubr.msk.f32.mxu1 %vm10035_vm0, %v10034_v0 }
0x1bb6   : > { %v5159_v34 = vpop.xlane.xlu0 %5158 }
0x1bb7   : > { %9778 = vrcp.f32 %v5159_v34 }
0x1bba   : > { %v5330_v19 = vpop.xlane.xlu1 %5329 }
0x1bbb   : > { %9780 = vrcp.f32 %v5330_v19 }
0x1bbe   : > { %v5501_v58 = vpop.xlane.xlu0 %5500  ;;  %v5334_v57 = vpop.permute.xlu1 %5333 }
0x1bbf   : > { %9782 = vrcp.f32 %v5501_v58 }
0x1bc2   : > { %v5163_v20 = vpop.permute.xlu0 %5162  ;;  %v5505_v61 = vpop.permute.xlu1 %5504 }
0x1bc3   : > { %9342 = vmatpush3.msra.mxu1 %v5163_v20 }
0x1bc4   : > { %v9779_v59 = vpop.eup %9778  ;;  %9351 = vmatprep.subr.mxu1 %v10034_v0 }
0x1bc5   : > { %v5161_v22 = vmul.f32 %v9779_v59, %v9771_v48 }
0x1bc7   : > { %9344 = vmatmul.mubr.msk.f32.vlgmr.msra.gmra.mxu1 %vm407_vm3, %v5161_v22 }
0x1bc8   : > { %v9781_v60 = vpop.eup %9780  ;;  %9352 = vmatpush3.msra.mxu1 %v5334_v57  ;;  %9353 = vmatprep.mubr.msk.f32.mxu1 %vm10035_vm0, %v10034_v0 }
0x1bc9   : > { %9361 = vmatprep.subr.mxu1 %v10034_v0  ;;  %v5332_v54 = vmul.f32 %v9781_v60, %v9773_v50 }
0x1bcb   : > { %9354 = vmatmul.mubr.msk.f32.vlgmr.msra.gmra.mxu1 %vm407_vm3, %v5332_v54 }
0x1bcc   : > { %v9783_v62 = vpop.eup %9782  ;;  %9362 = vmatpush3.msra.mxu1 %v5505_v61  ;;  %9363 = vmatprep.mubr.msk.f32.mxu1 %vm10035_vm0, %v10034_v0 }
0x1bcd   : > { %v5503_v63 = vmul.f32 %v9783_v62, %v9775_v53  ;;  %9377 = vmatprep.subr.mxu1 %v10034_v0  ;;  %v9861_v53 = vld [vmem:[#allocation7 + $0x130] sm:$0xff] }
0x1bcf   : > { %9364 = vmatmul.mubr.msk.f32.vlgmr.msra.gmra.mxu1 %vm407_vm3, %v5503_v63 }
0x1bd0   : > { %9378 = vmatpush3.msra.mxu1 %v9852_v1  ;;  %9385 = vmatprep.mubr.msk.f32.mxu1 %vm10035_vm0, %v10034_v0 }
0x1bd1   : > { %9379 = vmatprep.subr.mxu1 %v10034_v0 }
0x1bd2   : > { %9380 = vmatpush3.msra.mxu1 %v9853_v3 }
0x1bd3   : > { %9381 = vmatprep.subr.mxu1 %v10034_v0 }
0x1bd4   : > { %9382 = vmatpush3.msra.mxu1 %v9854_v4 }
0x1bd5   : > { %9383 = vmatprep.subr.mxu1 %v10034_v0 }
0x1bd6   : > { %9384 = vmatpush3.msra.mxu1 %v9855_v6 }
0x1bd7   : > { %9393 = vmatprep.subr.mxu1 %v10034_v0 }
0x1c1f   : > { %v5067_v7 = vpop.f32.mrf.mxu1 }
0x1c20   : > { %v5071_v27 = vadd.f32 %v5067_v7, %v10789_v45 }
0x1c21   : > { %v9335_v8 = vpop.f32.mrf.mxu1 }
0x1c87   : > { %v5234_v9 = vpop.f32.mrf.mxu1 }
0x1c88   : > { %5239 = vrot.lane.b32.xlu0 %v5234_v9, %s10043_s9 }
0x1c89   : > { %v9345_v10 = vpop.f32.mrf.mxu1 }
0x1c8b   : > { %v5405_v11 = vpop.f32.mrf.mxu1 }
0x1c8c   : > { %5410 = vrot.lane.b32.xlu1 %v5405_v11, %s10044_s17 }
0x1c8d   : > { %v9355_v12 = vpop.f32.mrf.mxu1 }
0x1c8f   : > { %v5576_v13 = vpop.f32.mrf.mxu1 }
0x1c90   : > { %5581 = vrot.lane.b32.xlu0 %v5576_v13, %s10045_s22 }
0x1c91   : > { %v9365_v21 = vpop.f32.mrf.mxu1 }
0x1cfa   : > { %v5240_v23 = vpop.permute.xlu0 %5239 }
0x1cfb   : > { %v5242_v25 = vadd.f32 %v5240_v23, %v10789_v45 }
0x1cfd   : > { %v5585_v46 = vsel %vm407_vm3, %v5071_v27, %v5242_v25 }
0x1cfe   : > { %v5411_v24 = vpop.permute.xlu1 %5410 }
0x1cff   : > { %v5413_v26 = vadd.f32 %v5411_v24, %v10789_v45 }
0x1d01   : > { %v5586_v30 = vsel %vm333_vm1, %v5585_v46, %v5413_v26 }
0x1d02   : > { %v5582_v28 = vpop.permute.xlu0 %5581 }
0x1d03   : > { %v5584_v29 = vadd.f32 %v5582_v28, %v10789_v45 }
0x1d05   : > { %v5587_v31 = vsel %vm1088_vm4, %v5586_v30, %v5584_v29 }
0x1d06   : > { %9375 = vmatmul.mubr.msk.f32.vlgmr.msra.gmra.mxu0 %vm255_vm2, %v5587_v31 }
0x1d07   : > { %9390 = vmatprep.mubr.msk.f32.mxu0 %vm10035_vm0, %v10034_v0 }
0x1dc6   : > { %v5657_v32 = vpop.f32.mrf.mxu0 }
0x1dc7   : > { %v5658_v5 = vadd.f32 %v9856_v33, %v5657_v32 }
0x1dc8   : > { %v9376_v35 = vpop.f32.mrf.mxu0 }
0x1dc9   : > { %v5661_v36 = vmax.f32 %v5658_v5, 0.0 }
0x1dcb   : > { %v10883_v39 = vadd.f32 %v5661_v36, %v5587_v31 }
0x1dcd   : > { %9386 = vmatmul.mubr.msk.f32.vlgmr.msra.gmra.mxu1 %vm255_vm2, %v10883_v39 }
0x1dce   : > { %9395 = vmatprep.mubr.msk.f32.mxu1 %vm10035_vm0, %v10034_v0 }
0x1e8d   : > { %v5732_v45 = vpop.f32.mrf.mxu1 }
0x1e8e   : > { %v10889_v42 = vadd.f32 %v9857_v41, %v5732_v45 }
0x1e8f   : > { %v9387_v44 = vpop.f32.mrf.mxu1 }
0x1e90   : > { %6065 = vrot.lane.b32.xlu0 %v10889_v42, %s10036_s18  ;;  %5898 = vrot.lane.b32.xlu1 %v10889_v42, %s10037_s4 }
0x1e91   : > { %9389 = vmatpush3.xpose.msk.msra.mxu0 %vm407_vm3, %v10889_v42 }
0x1e92   : > { %9398 = vmatprep.subr.mxu0 %v10034_v0 }
0x1e94   : > { %9391 = vmatmul.mubr.msk.f32.vlgmr.msra.gmra.mxu0 %vm407_vm3, %v10461_v37  ;;  %6232 = vrot.lane.b32.xlu1 %v10889_v42, %s10038_s10 }
0x1e95   : > { %9400 = vmatprep.mubr.msk.f32.mxu0 %vm10035_vm0, %v10034_v0 }
0x1f02   : > { %v5899_v48 = vpop.permute.xlu1 %5898  ;;  %v6066_v15 = vpop.permute.xlu0 %6065 }
0x1f03   : > { %9399 = vmatpush3.xpose.msk.msra.mxu0 %vm407_vm3, %v5899_v48 }
0x1f04   : > { %9408 = vmatprep.subr.mxu0 %v10034_v0 }
0x1f06   : > { %9401 = vmatmul.mubr.msk.f32.vlgmr.msra.gmra.mxu0 %vm407_vm3, %v10484_v43  ;;  %v6233_v50 = vpop.permute.xlu1 %6232  ;;  %v9858_v43 = vld [vmem:[#allocation7 + $0x148] sm:$0xff] }
0x1f07   : > { %9409 = vmatpush3.xpose.msk.msra.mxu0 %vm407_vm3, %v6066_v15  ;;  %9410 = vmatprep.mubr.msk.f32.mxu0 %vm10035_vm0, %v10034_v0 }
0x1f08   : > { %9418 = vmatprep.subr.mxu0 %v10034_v0 }
0x1f0a   : > { %9411 = vmatmul.mubr.msk.f32.vlgmr.msra.gmra.mxu0 %vm407_vm3, %v10490_v47  ;;  %v9860_v47 = vld [vmem:[#allocation7 + $0x138] sm:$0xff] }
0x1f0b   : > { %9419 = vmatpush3.xpose.msk.msra.mxu0 %vm407_vm3, %v6233_v50  ;;  %9420 = vmatprep.mubr.msk.f32.mxu0 %vm10035_vm0, %v10034_v0 }
0x1f0c   : > { %9428 = vmatprep.subr.mxu0 %v10034_v0 }
0x1f0e   : > { %9421 = vmatmul.mubr.msk.f32.vlgmr.msra.gmra.mxu0 %vm407_vm3, %v10502_v49 }
0x1f0f   : > { %9429 = vmatpush3.msra.mxu0 %v9858_v43  ;;  %9436 = vmatprep.mubr.msk.f32.mxu0 %vm10035_vm0, %v10034_v0 }
0x1f10   : > { %9430 = vmatprep.subr.mxu0 %v10034_v0 }
0x1f11   : > { %9431 = vmatpush3.msra.mxu0 %v9859_v52  ;;  %v9862_v52 = vld [vmem:[#allocation7 + $0x170] sm:$0xff] }
0x1f12   : > { %9432 = vmatprep.subr.mxu0 %v10034_v0 }
0x1f13   : > { %9433 = vmatpush3.msra.mxu0 %v9860_v47  ;;  %v9863_v47 = vld [vmem:[#allocation7 + $0x168] sm:$0xff] }
0x1f14   : > { %9434 = vmatprep.subr.mxu0 %v10034_v0 }
0x1f15   : > { %9435 = vmatpush3.msra.mxu0 %v9861_v53  ;;  %v9864_v53 = vld [vmem:[#allocation7 + $0x160] sm:$0xff] }
0x1f16   : > { %9450 = vmatprep.subr.mxu0 %v10034_v0 }
0x1f54   : > { %v5805_v49 = vpop.f32.mrf.mxu0 }
0x1f55   : > { %v5809_v40 = vmul.f32 0.17677669, %v5805_v49  ;;  %v9865_v49 = vld [vmem:[#allocation7 + $0x158] sm:$0xff] }
0x1f56   : > { %v9392_v2 = vpop.f32.mrf.mxu0 }
0x1f57   : > { %v5810_v55 = vsel %vm407_vm3, %v5809_v40, -inf }
0x1f58   : > { %5811 = vmax.xlane.f32.xlu0 %v5810_v55 }
0x1fc6   : > { %v5968_v56 = vpop.f32.mrf.mxu0 }
0x1fc7   : > { %v5972_v34 = vmul.f32 0.17677669, %v5968_v56 }
0x1fc8   : > { %v9402_v19 = vpop.f32.mrf.mxu0 }
0x1fc9   : > { %v5973_v58 = vsel %vm407_vm3, %v5972_v34, -inf }
0x1fca   : > { %5974 = vmax.xlane.f32.xlu1 %v5973_v58  ;;  %v6135_v20 = vpop.f32.mrf.mxu0 }
0x1fcb   : > { %v6139_v59 = vmul.f32 0.17677669, %v6135_v20 }
0x1fcc   : > { %v9412_v57 = vpop.f32.mrf.mxu0 }
0x1fcd   : > { %v6140_v22 = vsel %vm407_vm3, %v6139_v59, -inf }
0x1fce   : > { %6141 = vmax.xlane.f32.xlu0 %v6140_v22  ;;  %v6302_v60 = vpop.f32.mrf.mxu0 }
0x1fcf   : > { %v6306_v54 = vmul.f32 0.17677669, %v6302_v60 }
0x1fd0   : > { %v9422_v61 = vpop.f32.mrf.mxu0 }
0x1fd1   : > { %v6307_v62 = vsel %vm407_vm3, %v6306_v54, -inf }
0x1fd2   : > { %6308 = vmax.xlane.f32.xlu0 %v6307_v62 }
0x1fdb   : > { %5821 = vrot.lane.b32.xlu1 %v10889_v42, %s10039_s7 }
0x1fe1   : > { %v5812_v63 = vpop.xlane.xlu0 %5811 }
0x1fe2   : > { %v5813_v1 = vsub.f32 %v5809_v40, %v5812_v63 }
0x1fe4   : > { %v5814_v3 = vmul.f32 1.442695, %v5813_v1 }
0x1fe6   : > { %9784 = vpow2.f32 %v5814_v3 }
0x1ff3   : > { %v9785_v4 = vpop.eup %9784 }
0x1ff4   : > { %v5816_v6 = vsel %vm407_vm3, %v9785_v4, 0.0 }
0x1fff   : > { %5817 = vadd.xlane.f32.xlu1 %v5816_v6 }
0x2053   : > { %v5975_v7 = vpop.xlane.xlu1 %5974 }
0x2054   : > { %v5976_v8 = vsub.f32 %v5972_v34, %v5975_v7 }
0x2056   : > { %v5977_v9 = vmul.f32 1.442695, %v5976_v8  ;;  %v9867_v8 = vld [vmem:[#allocation7 + $0x198] sm:$0xff] }
0x2057   : > { %v5822_v10 = vpop.permute.xlu1 %5821  ;;  %v6142_v11 = vpop.xlane.xlu0 %6141 }
0x2058   : > { %9786 = vpow2.f32 %v5977_v9  ;;  %v6143_v12 = vsub.f32 %v6139_v59, %v6142_v11  ;;  %9394 = vmatpush3.msra.mxu1 %v5822_v10  ;;  %v9866_v59 = vld [vmem:[#allocation7 + $0x178] ss:$0 sm:$0xff]  ;;  %v9868_v9 = vld [vmem:[#allocation7 + $0x190] sm:$0xff]  ;;  %v9869_v10 = vld [vmem:[#allocation7 + $0x188] sm:$0xff] }
0x2059   : > { %9403 = vmatprep.subr.mxu1 %v10034_v0 }
0x205a   : > { %v6144_v13 = vmul.f32 1.442695, %v6143_v12  ;;  %v9871_v12 = vld [vmem:[#allocation7 + $0x150] ss:$0 sm:$0xff] }
0x205b   : > { %v6309_v21 = vpop.xlane.xlu0 %6308 }
0x205c   : > { %9788 = vpow2.f32 %v6144_v13  ;;  %v6310_v23 = vsub.f32 %v6306_v54, %v6309_v21 }
0x205e   : > { %v6311_v24 = vmul.f32 1.442695, %v6310_v23 }
0x2060   : > { %9790 = vpow2.f32 %v6311_v24 }
0x2065   : > { %v9787_v25 = vpop.eup %9786 }
0x2066   : > { %v5979_v26 = vsel %vm407_vm3, %v9787_v25, 0.0 }
0x2067   : > { %5980 = vadd.xlane.f32.xlu0 %v5979_v26  ;;  %v9872_v26 = vld [vmem:[#allocation7 + $0x1a0] ss:$0 sm:$0xff] }
0x2069   : > { %v9789_v27 = vpop.eup %9788 }
0x206a   : > { %v6146_v28 = vsel %vm407_vm3, %v9789_v27, 0.0 }
0x206b   : > { %6147 = vadd.xlane.f32.xlu1 %v6146_v28 }
0x206d   : > { %v9791_v46 = vpop.eup %9790 }
0x206e   : > { %v6313_v29 = vsel %vm407_vm3, %v9791_v46, 0.0 }
0x206f   : > { %6314 = vadd.xlane.f32.xlu0 %v6313_v29 }
0x207c   : > { %6151 = vrot.lane.b32.xlu1 %v10889_v42, %s10040_s8 }
0x2080   : > { %6318 = vrot.lane.b32.xlu1 %v10889_v42, %s10041_s25 }
0x2085   : > { %5984 = vrot.lane.b32.xlu0 %v10889_v42, %s10042_s26 }
0x2088   : > { %v5818_v30 = vpop.xlane.xlu1 %5817 }
0x2089   : > { %9792 = vrcp.f32 %v5818_v30 }
0x2096   : > { %v9793_v31 = vpop.eup %9792 }
0x2097   : > { %v5820_v32 = vmul.f32 %v9793_v31, %v9785_v4 }
0x2099   : > { %9396 = vmatmul.mubr.msk.f32.vlgmr.msra.gmra.mxu1 %vm407_vm3, %v5820_v32 }
0x209a   : > { %9405 = vmatprep.mubr.msk.f32.mxu1 %vm10035_vm0, %v10034_v0 }
0x20f0   : > { %v5981_v33 = vpop.xlane.xlu0 %5980 }
0x20f1   : > { %9794 = vrcp.f32 %v5981_v33 }
0x20f4   : > { %v6148_v5 = vpop.xlane.xlu1 %6147 }
0x20f5   : > { %9796 = vrcp.f32 %v6148_v5 }
0x20f8   : > { %v6315_v35 = vpop.xlane.xlu0 %6314  ;;  %v6152_v41 = vpop.permute.xlu1 %6151 }
0x20f9   : > { %9798 = vrcp.f32 %v6315_v35 }
0x20fc   : > { %v5985_v36 = vpop.permute.xlu0 %5984  ;;  %v6319_v15 = vpop.permute.xlu1 %6318 }
0x20fd   : > { %9404 = vmatpush3.msra.mxu1 %v5985_v36 }
0x20fe   : > { %v9795_v45 = vpop.eup %9794  ;;  %9413 = vmatprep.subr.mxu1 %v10034_v0 }
0x20ff   : > { %v5983_v42 = vmul.f32 %v9795_v45, %v9787_v25 }
0x2101   : > { %9406 = vmatmul.mubr.msk.f32.vlgmr.msra.gmra.mxu1 %vm407_vm3, %v5983_v42 }
0x2102   : > { %v9797_v44 = vpop.eup %9796  ;;  %9414 = vmatpush3.msra.mxu1 %v6152_v41  ;;  %9415 = vmatprep.mubr.msk.f32.mxu1 %vm10035_vm0, %v10034_v0 }
0x2103   : > { %9423 = vmatprep.subr.mxu1 %v10034_v0  ;;  %v6150_v48 = vmul.f32 %v9797_v44, %v9789_v27 }
0x2105   : > { %9416 = vmatmul.mubr.msk.f32.vlgmr.msra.gmra.mxu1 %vm407_vm3, %v6150_v48 }
0x2106   : > { %v9799_v50 = vpop.eup %9798  ;;  %9424 = vmatpush3.msra.mxu1 %v6319_v15  ;;  %9425 = vmatprep.mubr.msk.f32.mxu1 %vm10035_vm0, %v10034_v0 }
0x2107   : > { %9439 = vmatprep.subr.mxu1 %v10034_v0  ;;  %v6317_v43 = vmul.f32 %v9799_v50, %v9791_v46 }
0x2109   : > { %9426 = vmatmul.mubr.msk.f32.vlgmr.msra.gmra.mxu1 %vm407_vm3, %v6317_v43 }
0x210a   : > { %9440 = vmatpush3.msra.mxu1 %v9862_v52  ;;  %9447 = vmatprep.mubr.msk.f32.mxu1 %vm10035_vm0, %v10034_v0 }
0x210b   : > { %9441 = vmatprep.subr.mxu1 %v10034_v0 }
0x210c   : > { %9442 = vmatpush3.msra.mxu1 %v9863_v47 }
0x210d   : > { %9443 = vmatprep.subr.mxu1 %v10034_v0 }
0x210e   : > { %9444 = vmatpush3.msra.mxu1 %v9864_v53 }
0x210f   : > { %9445 = vmatprep.subr.mxu1 %v10034_v0 }
0x2110   : > { %9446 = vmatpush3.msra.mxu1 %v9865_v49 }
0x2111   : > { %9448 = vmatmul.mubr.msk.f32.vlgmr.msra.gmra.mxu1 %vm255_vm2, %v10883_v39  ;;  %9461 = vmatprep.subr.mxu1 %v10034_v0 }
0x2112   : > { %9463 = vmatprep.mubr.msk.f32.mxu1 %vm10035_vm0, %v10034_v0 }
0x2159   : > { %v5893_v40 = vpop.f32.mrf.mxu1 }
0x215a   : > { %v5897_v63 = vadd.f32 %v5893_v40, %v10461_v37 }
0x215b   : > { %v9397_v2 = vpop.f32.mrf.mxu1 }
0x21c1   : > { %v6056_v55 = vpop.f32.mrf.mxu1 }
0x21c2   : > { %6061 = vrot.lane.b32.xlu0 %v6056_v55, %s10043_s9 }
0x21c3   : > { %v9407_v56 = vpop.f32.mrf.mxu1 }
0x21c5   : > { %v6223_v34 = vpop.f32.mrf.mxu1 }
0x21c6   : > { %6228 = vrot.lane.b32.xlu1 %v6223_v34, %s10044_s17 }
0x21c7   : > { %v9417_v19 = vpop.f32.mrf.mxu1 }
0x21c9   : > { %v6390_v58 = vpop.f32.mrf.mxu1 }
0x21ca   : > { %6395 = vrot.lane.b32.xlu0 %v6390_v58, %s10045_s22 }
0x21cb   : > { %v9427_v20 = vpop.f32.mrf.mxu1 }
0x21d1   : > { %v6543_v39 = vpop.f32.mrf.mxu1 }
0x21d2   : > { %v10969_v57 = vadd.f32 %v9866_v59, %v6543_v39 }
0x21d3   : > { %v9449_v22 = vpop.f32.mrf.mxu1 }
0x21d4   : > { %6785 = vrot.lane.b32.xlu0 %v10969_v57, %s10037_s4 }
0x21d8   : > { %6956 = vrot.lane.b32.xlu0 %v10969_v57, %s10036_s18 }
0x21dc   : > { %7127 = vrot.lane.b32.xlu0 %v10969_v57, %s10038_s10 }
0x2234   : > { %v6062_v60 = vpop.permute.xlu0 %6061 }
0x2235   : > { %v6064_v61 = vadd.f32 %v6062_v60, %v10461_v37 }
0x2237   : > { %v6399_v3 = vsel %vm407_vm3, %v5897_v63, %v6064_v61 }
0x2238   : > { %v6229_v54 = vpop.permute.xlu1 %6228 }
0x2239   : > { %v6231_v62 = vadd.f32 %v6229_v54, %v10461_v37 }
0x223b   : > { %v6400_v6 = vsel %vm333_vm1, %v6399_v3, %v6231_v62 }
0x223c   : > { %v6396_v1 = vpop.permute.xlu0 %6395 }
0x223d   : > { %v6398_v4 = vadd.f32 %v6396_v1, %v10461_v37  ;;  %v9870_v37 = vld [vmem:[#allocation7 + $0x180] sm:$0xff] }
0x223f   : > { %v6401_v7 = vsel %vm1088_vm4, %v6400_v6, %v6398_v4 }
0x2240   : > { %9437 = vmatmul.mubr.msk.f32.vlgmr.msra.gmra.mxu0 %vm255_vm2, %v6401_v7 }
0x2241   : > { %9451 = vmatpush3.msra.mxu0 %v9867_v8  ;;  %9458 = vmatprep.mubr.msk.f32.mxu0 %vm10035_vm0, %v10034_v0 }
0x2242   : > { %9452 = vmatprep.subr.mxu0 %v10034_v0 }
0x2243   : > { %9453 = vmatpush3.msra.mxu0 %v9868_v9 }
0x2244   : > { %9454 = vmatprep.subr.mxu0 %v10034_v0 }
0x2245   : > { %9455 = vmatpush3.msra.mxu0 %v9869_v10 }
0x2246   : > { %9456 = vmatprep.subr.mxu0 %v10034_v0  ;;  %v6786_v46 = vpop.permute.xlu0 %6785 }
0x2247   : > { %9457 = vmatpush3.msra.mxu0 %v9870_v37 }
0x2248   : > { %9471 = vmatprep.subr.mxu0 %v10034_v0 }
0x224a   : > { %v6957_v31 = vpop.permute.xlu0 %6956 }
0x224e   : > { %v7128_v33 = vpop.permute.xlu0 %7127 }
0x2300   : > { %v6471_v11 = vpop.f32.mrf.mxu0 }
0x2301   : > { %v6472_v13 = vadd.f32 %v9871_v12, %v6471_v11 }
0x2302   : > { %v9438_v21 = vpop.f32.mrf.mxu0 }
0x2303   : > { %v6475_v23 = vmax.f32 %v6472_v13, 0.0 }
0x2305   : > { %v6476_v24 = vadd.f32 %v6475_v23, %v6401_v7 }
0x2307   : > { %9459 = vmatmul.mubr.msk.f32.vlgmr.msra.gmra.mxu0 %vm255_vm2, %v6476_v24 }
0x2308   : > { %9473 = vmatprep.mubr.msk.f32.mxu0 %vm10035_vm0, %v10034_v0 }
0x23c7   : > { %v6616_v25 = vpop.f32.mrf.mxu0 }
0x23c8   : > { %v10994_v27 = vadd.f32 %v9872_v26, %v6616_v25 }
0x23c9   : > { %v9460_v28 = vpop.f32.mrf.mxu0 }
0x23ca   : > { %6787 = vrot.lane.b32.xlu1 %v10994_v27, %s10037_s4  ;;  %9462 = vmatpush3.xpose.msk.msra.mxu1 %vm407_vm3, %v10994_v27 }
0x23cb   : > { %9466 = vmatprep.subr.mxu1 %v10034_v0 }
0x23cd   : > { %9464 = vmatmul.mubr.msk.f32.vlgmr.msra.gmra.mxu1 %vm407_vm3, %v10969_v57 }
0x23ce   : > { %6958 = vrot.lane.b32.xlu1 %v10994_v27, %s10036_s18  ;;  %9468 = vmatprep.mubr.msk.f32.mxu1 %vm10035_vm0, %v10034_v0 }
0x23d2   : > { %7129 = vrot.lane.b32.xlu1 %v10994_v27, %s10038_s10 }
0x243c   : > { %v6788_v29 = vpop.permute.xlu1 %6787 }
0x243d   : > { %9472 = vmatpush3.xpose.msk.msra.mxu0 %vm407_vm3, %v6788_v29  ;;  %v7385_v29 = vld [vmem:[#allocation7 + $0x218] sm:$0xff] }
0x243e   : > { %9481 = vmatprep.subr.mxu0 %v10034_v0 }
0x2440   : > { %v6959_v30 = vpop.permute.xlu1 %6958  ;;  %9474 = vmatmul.mubr.msk.f32.vlgmr.msra.gmra.mxu0 %vm407_vm3, %v6786_v46 }
0x2441   : > { %9482 = vmatpush3.xpose.msk.msra.mxu0 %vm407_vm3, %v6959_v30  ;;  %9483 = vmatprep.mubr.msk.f32.mxu0 %vm10035_vm0, %v10034_v0 }
0x2442   : > { %9491 = vmatprep.subr.mxu0 %v10034_v0 }
0x2444   : > { %v7130_v32 = vpop.permute.xlu1 %7129  ;;  %9484 = vmatmul.mubr.msk.f32.vlgmr.msra.gmra.mxu0 %vm407_vm3, %v6957_v31 }
0x2445   : > { %9492 = vmatpush3.xpose.msk.msra.mxu0 %vm407_vm3, %v7130_v32  ;;  %9493 = vmatprep.mubr.msk.f32.mxu0 %vm10035_vm0, %v10034_v0 }
0x2446   : > { %9501 = vmatprep.subr.mxu0 %v10034_v0 }
0x2448   : > { %9494 = vmatmul.mubr.msk.f32.vlgmr.msra.gmra.mxu0 %vm407_vm3, %v7128_v33 }
0x2449   : > { %9502 = vmatpush3.msra.mxu0 %v10702_v14  ;;  %9509 = vmatprep.mubr.msk.f32.mxu0 %vm10035_vm0, %v10034_v0 }
0x244a   : > { %9503 = vmatprep.subr.mxu0 %v10034_v0 }
0x244b   : > { %9504 = vmatpush3.msra.mxu0 %v10706_v16 }
0x244c   : > { %9505 = vmatprep.subr.mxu0 %v10034_v0 }
0x244d   : > { %9506 = vmatpush3.msra.mxu0 %v10712_v17 }
0x244e   : > { %9507 = vmatprep.subr.mxu0 %v10034_v0 }
0x244f   : > { %9508 = vmatpush3.msra.mxu0 %v10716_v18 }
0x2450   : > { %9523 = vmatprep.subr.mxu0 %v7385_v29 }
0x248d   : > { %v6692_v5 = vpop.f32.mrf.mxu1 }
0x248e   : > { %v6696_v35 = vmul.f32 0.17677669, %v6692_v5 }
0x248f   : > { %v9465_v36 = vpop.f32.mrf.mxu1 }
0x2490   : > { %v6697_v14 = vsel %vm407_vm3, %v6696_v35, -inf }
0x2491   : > { %6698 = vmax.xlane.f32.xlu1 %v6697_v14 }
0x2500   : > { %v6859_v45 = vpop.f32.mrf.mxu0 }
0x2501   : > { %v6863_v41 = vmul.f32 0.17677669, %v6859_v45 }
0x2502   : > { %v9475_v42 = vpop.f32.mrf.mxu0 }
0x2503   : > { %v6864_v44 = vsel %vm407_vm3, %v6863_v41, -inf }
0x2504   : > { %6865 = vmax.xlane.f32.xlu0 %v6864_v44  ;;  %v7030_v16 = vpop.f32.mrf.mxu0 }
0x2505   : > { %v7034_v48 = vmul.f32 0.17677669, %v7030_v16 }
0x2506   : > { %v9485_v15 = vpop.f32.mrf.mxu0 }
0x2507   : > { %v7035_v17 = vsel %vm407_vm3, %v7034_v48, -inf }
0x2508   : > { %7036 = vmax.xlane.f32.xlu0 %v7035_v17  ;;  %v7201_v50 = vpop.f32.mrf.mxu0 }
0x2509   : > { %v7205_v18 = vmul.f32 0.17677669, %v7201_v50 }
0x250a   : > { %v9495_v43 = vpop.f32.mrf.mxu0 }
0x250b   : > { %v7206_v52 = vsel %vm407_vm3, %v7205_v18, -inf }
0x250c   : > { %7207 = vmax.xlane.f32.xlu1 %v7206_v52  ;;  %v7383_v52 = vld [vmem:[#allocation7 + $0x208] sm:$0xff] }
0x251a   : > { %v6699_v47 = vpop.xlane.xlu1 %6698 }
0x251b   : > { %v6700_v53 = vsub.f32 %v6696_v35, %v6699_v47  ;;  %v8606_v35 = vld [vmem:[#allocation7 + $0x1c8] ss:$0 sm:$0xff]  ;;  %v7382_v47 = vld [vmem:[#allocation7 + $0x200] sm:$0xff] }
0x251c   : > { %v3944_v14 = vadd.f32 %v8606_v35, %v10774_v38  ;;  %v7384_v38 = vld [vmem:[#allocation7 + $0x210] sm:$0xff] }
0x251d   : > { %v6701_v49 = vmul.f32 1.442695, %v6700_v53  ;;  %6875 = vrot.lane.b32.xlu1 %v10994_v27, %s10042_s26  ;;  %v7380_v53 = vld [vmem:[#allocation7 + $0x1f0] sm:$0xff] }
0x251e   : > { %v3947_v44 = vmax.f32 %v3944_v14, 0.0 }
0x251f   : > { %9800 = vpow2.f32 %v6701_v49  ;;  %v7377_v49 = vld [vmem:[#allocation7 + $0x1d8] sm:$0xff] }
0x252c   : > { %v9801_v40 = vpop.eup %9800 }
0x252d   : > { %v6703_v2 = vsel %vm407_vm3, %v9801_v40, 0.0 }
0x252e   : > { %6704 = vadd.xlane.f32.xlu0 %v6703_v2 }
0x2544   : > { %6708 = vrot.lane.b32.xlu0 %v10994_v27, %s10039_s7 }
0x258d   : > { %v6866_v55 = vpop.xlane.xlu0 %6865 }
0x258e   : > { %v6867_v56 = vsub.f32 %v6863_v41, %v6866_v55 }
0x2590   : > { %v6868_v34 = vmul.f32 1.442695, %v6867_v56 }
0x2591   : > { %v7037_v19 = vpop.xlane.xlu0 %7036 }
0x2592   : > { %9802 = vpow2.f32 %v6868_v34  ;;  %v7038_v58 = vsub.f32 %v7034_v48, %v7037_v19 }
0x2594   : > { %v7039_v20 = vmul.f32 1.442695, %v7038_v58 }
0x2595   : > { %v7208_v39 = vpop.xlane.xlu1 %7207 }
0x2596   : > { %9804 = vpow2.f32 %v7039_v20  ;;  %v7209_v59 = vsub.f32 %v7205_v18, %v7208_v39  ;;  %v3948_v18 = vadd.f32 %v3947_v44, %v10735_v51  ;;  %v7379_v51 = vld [vmem:[#allocation7 + $0x1e8] sm:$0xff]  ;;  %v8667_v39 = vld [vmem:[#allocation7 + $0x220] ss:$0 sm:$0xff] }
0x2598   : > { %v7210_v22 = vmul.f32 1.442695, %v7209_v59 }
0x2599   : > { %v6876_v8 = vpop.permute.xlu1 %6875 }
0x259a   : > { %9806 = vpow2.f32 %v7210_v22  ;;  %v7381_v22 = vld [vmem:[#allocation7 + $0x1f8] sm:$0x1] }
0x259f   : > { %v9803_v60 = vpop.eup %9802 }
0x25a0   : > { %v6870_v54 = vsel %vm407_vm3, %v9803_v60, 0.0 }
0x25a1   : > { %6871 = vadd.xlane.f32.xlu1 %v6870_v54 }
0x25a3   : > { %v9805_v61 = vpop.eup %9804 }
0x25a4   : > { %v7041_v62 = vsel %vm407_vm3, %v9805_v61, 0.0 }
0x25a5   : > { %7042 = vadd.xlane.f32.xlu0 %v7041_v62 }
0x25a7   : > { %v9807_v63 = vpop.eup %9806 }
0x25a8   : > { %v7212_v1 = vsel %vm407_vm3, %v9807_v63, 0.0 }
0x25a9   : > { %7213 = vadd.xlane.f32.xlu1 %v7212_v1 }
0x25b7   : > { %v6705_v3 = vpop.xlane.xlu0 %6704 }
0x25b8   : > { %9808 = vrcp.f32 %v6705_v3 }
0x25ba   : > { %7046 = vrot.lane.b32.xlu1 %v10994_v27, %s10040_s8 }
0x25bb   : > { %7217 = vrot.lane.b32.xlu0 %v10994_v27, %s10041_s25  ;;  %v6709_v4 = vpop.permute.xlu0 %6708 }
0x25bc   : > { %9467 = vmatpush3.msra.mxu1 %v6709_v4 }
0x25bd   : > { %9476 = vmatprep.subr.mxu1 %v10034_v0 }
0x25c5   : > { %v9809_v6 = vpop.eup %9808 }
0x25c6   : > { %v6707_v7 = vmul.f32 %v9809_v6, %v9801_v40  ;;  %v7376_v40 = vld [vmem:[#allocation7 + $0x1d0] sm:$0x1] }
0x25c8   : > { %9469 = vmatmul.mubr.msk.f32.vlgmr.msra.gmra.mxu1 %vm407_vm3, %v6707_v7 }
0x25c9   : > { %9477 = vmatpush3.msra.mxu1 %v6876_v8  ;;  %9478 = vmatprep.mubr.msk.f32.mxu1 %vm10035_vm0, %v10034_v0 }
0x25ca   : > { %9486 = vmatprep.subr.mxu1 %v10034_v0 }
0x262a   : > { %v6872_v9 = vpop.xlane.xlu1 %6871 }
0x262b   : > { %9810 = vrcp.f32 %v6872_v9 }
0x262e   : > { %v7043_v10 = vpop.xlane.xlu0 %7042 }
0x262f   : > { %9812 = vrcp.f32 %v7043_v10 }
0x2632   : > { %v7214_v37 = vpop.xlane.xlu1 %7213  ;;  %v7218_v24 = vpop.permute.xlu0 %7217 }
0x2633   : > { %9814 = vrcp.f32 %v7214_v37 }
0x2636   : > { %v7047_v13 = vpop.permute.xlu1 %7046 }
0x2638   : > { %v9811_v11 = vpop.eup %9810 }
0x2639   : > { %v6874_v12 = vmul.f32 %v9811_v11, %v9803_v60 }
0x263b   : > { %9479 = vmatmul.mubr.msk.f32.vlgmr.msra.gmra.mxu1 %vm407_vm3, %v6874_v12 }
0x263c   : > { %v9813_v21 = vpop.eup %9812  ;;  %9487 = vmatpush3.msra.mxu1 %v7047_v13  ;;  %9488 = vmatprep.mubr.msk.f32.mxu1 %vm10035_vm0, %v10034_v0 }
0x263d   : > { %9496 = vmatprep.subr.mxu1 %v10034_v0  ;;  %v7045_v23 = vmul.f32 %v9813_v21, %v9805_v61 }
0x263f   : > { %9489 = vmatmul.mubr.msk.f32.vlgmr.msra.gmra.mxu1 %vm407_vm3, %v7045_v23 }
0x2640   : > { %v9815_v25 = vpop.eup %9814  ;;  %9497 = vmatpush3.msra.mxu1 %v7218_v24  ;;  %9498 = vmatprep.mubr.msk.f32.mxu1 %vm10035_vm0, %v10034_v0 }
0x2641   : > { %v7216_v26 = vmul.f32 %v9815_v25, %v9807_v63  ;;  %9512 = vmatprep.subr.mxu1 %v10034_v0 }
0x2643   : > { %9499 = vmatmul.mubr.msk.f32.vlgmr.msra.gmra.mxu1 %vm407_vm3, %v7216_v26 }
0x2644   : > { %9520 = vmatprep.mubr.msk.f32.mxu1 %vm10035_vm0, %v10034_v0  ;;  %9513 = vmatpush3.msra.mxu1 %v7380_v53 }
0x2645   : > { %9514 = vmatprep.subr.mxu1 %v10034_v0 }
0x2646   : > { %9515 = vmatpush3.msra.mxu1 %v7379_v51 }
0x2647   : > { %9516 = vmatprep.subr.mxu1 %v10034_v0 }
0x2688   : > { %v6780_v27 = vpop.f32.mrf.mxu1 }
0x2689   : > { %v6784_v16 = vadd.f32 %v6780_v27, %v10969_v57 }
0x268a   : > { %v9470_v28 = vpop.f32.mrf.mxu1 }
0x26fb   : > { %v6947_v46 = vpop.f32.mrf.mxu1 }
0x26fc   : > { %6952 = vrot.lane.b32.xlu1 %v6947_v46, %s10043_s9 }
0x26fd   : > { %v9480_v30 = vpop.f32.mrf.mxu1 }
0x26ff   : > { %v7118_v31 = vpop.f32.mrf.mxu1 }
0x2700   : > { %7123 = vrot.lane.b32.xlu0 %v7118_v31, %s10044_s17 }
0x2701   : > { %v9490_v32 = vpop.f32.mrf.mxu1 }
0x2703   : > { %v7289_v33 = vpop.f32.mrf.mxu1 }
0x2704   : > { %7294 = vrot.lane.b32.xlu1 %v7289_v33, %s10045_s22 }
0x2705   : > { %v9500_v5 = vpop.f32.mrf.mxu1 }
0x276e   : > { %v6953_v36 = vpop.permute.xlu1 %6952 }
0x276f   : > { %v6955_v41 = vadd.f32 %v6953_v36, %v10969_v57 }
0x2771   : > { %v7298_v15 = vsel %vm407_vm3, %v6784_v16, %v6955_v41 }
0x2772   : > { %v7124_v45 = vpop.permute.xlu0 %7123 }
0x2773   : > { %v7126_v42 = vadd.f32 %v7124_v45, %v10969_v57 }
0x2775   : > { %v7299_v50 = vsel %vm333_vm1, %v7298_v15, %v7126_v42 }
0x2776   : > { %v7295_v48 = vpop.permute.xlu1 %7294 }
0x2777   : > { %v7297_v17 = vadd.f32 %v7295_v48, %v10969_v57  ;;  %v7378_v57 = vld [vmem:[#allocation7 + $0x1e0] sm:$0xff] }
0x2778   : > { %9517 = vmatpush3.msra.mxu1 %v7378_v57 }
0x2779   : > { %v7300_v43 = vsel %vm1088_vm4, %v7299_v50, %v7297_v17  ;;  %9518 = vmatprep.subr.mxu1 %v10034_v0 }
0x277a   : > { %9510 = vmatmul.mubr.msk.f32.vlgmr.msra.gmra.mxu0 %vm255_vm2, %v7300_v43  ;;  %9519 = vmatpush3.msra.mxu1 %v7377_v49 }
0x277b   : > { %9531 = vmatprep.mubr.msk.f32.mxu0 %vm255_vm2, %v3948_v18  ;;  %9524 = vmatpush3.msra.mxu0 %v7385_v29 }
0x277c   : > { %9525 = vmatprep.subr.mxu0 %v7384_v38  ;;  %9521 = vmatmul.mubr.msk.f32.vlgmr.msra.gmra.mxu1 %vm255_vm2, %v7376_v40 }
0x277d   : > { %9526 = vmatpush3.msra.mxu0 %v7384_v38  ;;  %9534 = vmatprep.subr.mxu1 %v10034_v0 }
0x277e   : > { %9527 = vmatprep.subr.mxu0 %v7383_v52  ;;  %9538 = vmatprep.mubr.msk.f32.mxu1 %vm10035_vm0, %v10034_v0 }
0x277f   : > { %9528 = vmatpush3.msra.mxu0 %v7383_v52 }
0x2780   : > { %9529 = vmatprep.subr.mxu0 %v7382_v47 }
0x2781   : > { %9530 = vmatpush3.msra.mxu0 %v7382_v47 }
0x2782   : > { %9541 = vmatprep.subr.mxu0 %v10034_v0 }
0x283a   : > { %v7370_v2 = vpop.f32.mrf.mxu0 }
0x283b   : > { %v7371_v55 = vadd.f32 %v8606_v35, %v7370_v2 }
0x283c   : > { %v9511_v56 = vpop.f32.mrf.mxu0  ;;  %v7461_v58 = vpop.f32.mrf.mxu1 }
0x283d   : > { %v7374_v34 = vmax.f32 %v7371_v55, 0.0  ;;  %v11096_v62 = vadd.f32 %v7461_v58, %v7381_v22 }
0x283e   : > { %v9522_v20 = vpop.f32.mrf.mxu1 }
0x283f   : > { %v7375_v19 = vadd.f32 %v7374_v34, %v7300_v43 }
0x2841   : > { %9532 = vmatmul.mubr.msk.f32.vlgmr.msra.gmra.mxu0 %vm255_vm2, %v7375_v19 }
0x2842   : > { %9545 = vmatprep.mubr.msk.f32.mxu0 %vm10035_vm0, %v10034_v0 }
0x2901   : > { %v9533_v59 = vpop.f32.mrf.mxu0 }
0x2902   : > { %v11088_v60 = vadd.f32 %v9533_v59, %v8667_v39 }
0x2903   : > { %v7541_v54 = vpop.f32.mrf.mxu0 }
0x2904   : > { %v11090_v61 = vadd.f32 %v8667_v39, %v7541_v54  ;;  %7726 = vrot.lane.b32.xlu0 %v11088_v60, %s10037_s4  ;;  %9535 = vmatpush3.xpose.msk.msra.mxu1 %vm407_vm3, %v11088_v60 }
0x2905   : > { %9536 = vmatprep.subr.mxu1 %v10034_v0 }
0x2906   : > { %7724 = vrot.lane.b32.xlu1 %v11090_v61, %s10037_s4 }
0x2908   : > { %9537 = vmatpush3.xpose.msk.msra.mxu1 %vm407_vm3, %v11090_v61  ;;  %7722 = vrot.lane.b32.xlu0 %v11096_v62, %s10037_s4  ;;  %s10046_s4 = smov [#allocation8]  }
0x2909   : > { %9548 = vmatprep.subr.mxu1 %v10034_v0  ;;  %s9959_s16 = sshll.u32 %s10046_s4, 4  ;;  %s9960_s16 = int_to_ptr.vmem [resolvable:$false] %s9959_s16 }
0x290a   : > { %p9962_p13 = scmp.lt.s32.totalorder %s8427_s11, %s9960_s16 }
0x290b   : > { %9539 = vmatmul.mubr.msk.f32.vlgmr.msra.gmra.mxu1 %vm407_vm3, %v11096_v62 }
0x290c   : > { %9552 = vmatprep.mubr.msk.f32.mxu1 %vm10035_vm0, %v10034_v0 }
0x2976   : > { %v7727_v63 = vpop.permute.xlu0 %7726 }
0x2977   : > { %9549 = vmatpush3.xpose.msk.msra.mxu1 %vm407_vm3, %v7727_v63 }
0x2978   : > { %9550 = vmatprep.subr.mxu1 %v10034_v0  ;;  %v7725_v1 = vpop.permute.xlu1 %7724 }
0x297a   : > { %v7723_v3 = vpop.permute.xlu0 %7722 }
0x297b   : > { %9551 = vmatpush3.xpose.msk.msra.mxu1 %vm407_vm3, %v7725_v1 }
0x297c   : > { %9569 = vmatprep.subr.mxu1 %v10034_v0 }
0x297e   : > { %9553 = vmatmul.mubr.msk.f32.vlgmr.msra.gmra.mxu1 %vm407_vm3, %v7723_v3 }
0x297f   : > { %9573 = vmatprep.mubr.msk.f32.mxu1 %vm10035_vm0, %v10034_v0 }
0x29cb   : > { %v7625_v4 = vpop.f32.mrf.mxu1 }
0x29cc   : > { %v7629_v6 = vmul.f32 0.17677669, %v7625_v4 }
0x29cd   : > { %v9540_v7 = vpop.f32.mrf.mxu1 }
0x29ce   : > { %v7631_v8 = vsel %vm7630_vm5, %v7629_v6, -inf }
0x29cf   : > { %7632 = vmax.xlane.f32.xlu1 %v7631_v8 }
0x29e0   : > { %7642 = vrot.lane.b32.xlu1 %v11090_v61, %s10039_s7 }
0x29e4   : > { %7818 = vrot.lane.b32.xlu1 %v11088_v60, %s10042_s26 }
0x29e8   : > { %7904 = vrot.lane.b32.xlu1 %v11088_v60, %s10036_s18 }
0x2a3e   : > { %v7800_v9 = vpop.f32.mrf.mxu1 }
0x2a3f   : > { %v7804_v10 = vmul.f32 0.17677669, %v7800_v9 }
0x2a40   : > { %v9554_v37 = vpop.f32.mrf.mxu1 }
0x2a41   : > { %v7805_v11 = vsel %vm7630_vm5, %v7804_v10, -inf }
0x2a42   : > { %7806 = vmax.xlane.f32.xlu0 %v7805_v11  ;;  %v7389_v11 = vld [vmem:[#allocation7 + $0x238] sm:$0xff] }
0x2a58   : > { %7644 = vrot.lane.b32.xlu0 %v11088_v60, %s10039_s7  ;;  %v7633_v12 = vpop.xlane.xlu1 %7632 }
0x2a59   : > { %v7634_v13 = vsub.f32 %v7629_v6, %v7633_v12  ;;  %v7388_v12 = vld [vmem:[#allocation7 + $0x230] sm:$0xff] }
0x2a5b   : > { %v7635_v21 = vmul.f32 1.442695, %v7634_v13  ;;  %v7387_v13 = vld [vmem:[#allocation7 + $0x228] sm:$0xff] }
0x2a5c   : > { %v7643_v46 = vpop.permute.xlu1 %7642 }
0x2a5d   : > { %9816 = vpow2.f32 %v7635_v21 }
0x2a60   : > { %v7819_v5 = vpop.permute.xlu1 %7818 }
0x2a64   : > { %v7905_v36 = vpop.permute.xlu1 %7904 }
0x2a6a   : > { %v9817_v23 = vpop.eup %9816 }
0x2a6b   : > { %v7637_v24 = vsel %vm7630_vm5, %v9817_v23, 0.0 }
0x2a77   : > { %7638 = vadd.xlane.f32.xlu0 %v7637_v24 }
0x2a8d   : > { %7816 = vrot.lane.b32.xlu0 %v11090_v61, %s10042_s26 }
0x2a91   : > { %7902 = vrot.lane.b32.xlu0 %v11090_v61, %s10036_s18 }
0x2acb   : > { %v7807_v25 = vpop.xlane.xlu0 %7806 }
0x2acc   : > { %v7808_v26 = vsub.f32 %v7804_v10, %v7807_v25 }
0x2ace   : > { %v7809_v27 = vmul.f32 1.442695, %v7808_v26 }
0x2acf   : > { %v7645_v28 = vpop.permute.xlu0 %7644 }
0x2ad0   : > { %9818 = vpow2.f32 %v7809_v27  ;;  %9542 = vmatpush3.msra.mxu0 %v7645_v28 }
0x2ad1   : > { %9543 = vmatprep.subr.mxu0 %v10034_v0 }
0x2ad2   : > { %9544 = vmatpush3.msra.mxu0 %v7643_v46 }
0x2ad3   : > { %9555 = vmatprep.subr.mxu0 %v10034_v0 }
0x2add   : > { %v9819_v29 = vpop.eup %9818 }
0x2ade   : > { %v7811_v30 = vsel %vm7630_vm5, %v9819_v29, 0.0 }
0x2adf   : > { %7812 = vadd.xlane.f32.xlu1 %v7811_v30 }
0x2af0   : > { %7900 = vrot.lane.b32.xlu1 %v11096_v62, %s10036_s18  ;;  %s9955_s18 = scalar_lea.vmem %s8427_s11, 16 }
0x2af1   : > { %p9956_p3 = scmp.ne.s32.totalorder %s8427_s11, %s9955_s18 }
0x2af3   : > { %p9957_p10 = pnand %p9956_p3, %p11269_p12 }
0x2af4   : > { %7994 = vrot.lane.b32.xlu1 %v11090_v61, %s10040_s8 }
0x2af5   : > { %p9958_p2 = pneg %p9957_p10 }
0x2b00   : > { %v7639_v31 = vpop.xlane.xlu0 %7638 }
0x2b01   : > { %9820 = vrcp.f32 %v7639_v31 }
0x2b04   : > { %v7817_v35 = vpop.permute.xlu0 %7816 }
0x2b08   : > { %v7903_v42 = vpop.permute.xlu0 %7902 }
0x2b0e   : > { %v9821_v32 = vpop.eup %9820 }
0x2b0f   : > { %v7641_v33 = vmul.f32 %v9821_v32, %v9817_v23 }
0x2b11   : > { %9546 = vmatmul.mubr.msk.f32.vlgmr.msra.gmra.mxu0 %vm333_vm1, %v7641_v33  ;;  %v8337_v33 = vld [vmem:[#allocation7 + $0x268] sm:$0xff] }
0x2b12   : > { %9556 = vmatpush3.msra.mxu0 %v7819_v5  ;;  %9559 = vmatprep.mubr.msk.f32.mxu0 %vm10035_vm0, %v10034_v0  ;;  %v8336_v5 = vld [vmem:[#allocation7 + $0x260] sm:$0xff] }
0x2b13   : > { %9557 = vmatprep.subr.mxu0 %v10034_v0 }
0x2b14   : > { %9558 = vmatpush3.msra.mxu0 %v7817_v35  ;;  %v8335_v35 = vld [vmem:[#allocation7 + $0x258] sm:$0xff] }
0x2b15   : > { %9562 = vmatprep.subr.mxu0 %v10034_v0 }
0x2b68   : > { %v7813_v14 = vpop.xlane.xlu1 %7812 }
0x2b69   : > { %9822 = vrcp.f32 %v7813_v14 }
0x2b6c   : > { %v7901_v44 = vpop.permute.xlu1 %7900 }
0x2b70   : > { %v7995_v57 = vpop.permute.xlu1 %7994 }
0x2b76   : > { %v9823_v45 = vpop.eup %9822 }
0x2b77   : > { %v7815_v41 = vmul.f32 %v9823_v45, %v9819_v29 }
0x2b79   : > { %9560 = vmatmul.mubr.msk.f32.vlgmr.msra.gmra.mxu0 %vm333_vm1, %v7815_v41 }
0x2b7a   : > { %9563 = vmatpush3.xpose.msk.msra.mxu0 %vm407_vm3, %v7905_v36  ;;  %9566 = vmatprep.mubr.msk.f32.mxu0 %vm10035_vm0, %v10034_v0  ;;  %v7391_v36 = vld [vmem:[#allocation7 + $0x248] sm:$0x1] }
0x2b7b   : > { %9564 = vmatprep.subr.mxu0 %v10034_v0 }
0x2b7e   : > { %9565 = vmatpush3.xpose.msk.msra.mxu0 %vm407_vm3, %v7903_v42 }
0x2b7f   : > { %9583 = vmatprep.subr.mxu0 %v10034_v0 }
0x2b81   : > { %9567 = vmatmul.mubr.msk.f32.vlgmr.msra.gmra.mxu0 %vm407_vm3, %v7901_v44 }
0x2b82   : > { %9587 = vmatprep.mubr.msk.f32.mxu0 %vm10035_vm0, %v10034_v0 }
0x2bd1   : > { %v11154_v16 = vpop.f32.mrf.mxu0 }
0x2bd2   : > { %v7721_v28 = vadd.f32 %v11154_v16, %v11096_v62  ;;  %v8338_v16 = vld [vmem:[#allocation7 + $0x270] sm:$0x1] }
0x2bd3   : > { %v9547_v48 = vpop.f32.mrf.mxu0 }
0x2c39   : > { %v7891_v15 = vpop.f32.mrf.mxu0 }
0x2c3b   : > { %v9561_v17 = vpop.f32.mrf.mxu0 }
0x2c41   : > { %v7978_v50 = vpop.f32.mrf.mxu0 }
0x2c42   : > { %v7982_v18 = vmul.f32 0.17677669, %v7978_v50 }
0x2c43   : > { %v9568_v43 = vpop.f32.mrf.mxu0 }
0x2c44   : > { %v7983_v38 = vsel %vm7630_vm5, %v7982_v18, -inf }
0x2c45   : > { %7984 = vmax.xlane.f32.xlu0 %v7983_v38 }
0x2c5b   : > { %7996 = vrot.lane.b32.xlu0 %v11088_v60, %s10040_s8 }
0x2c5f   : > { %8082 = vrot.lane.b32.xlu0 %v11088_v60, %s10038_s10 }
0x2c63   : > { %8078 = vrot.lane.b32.xlu0 %v11096_v62, %s10038_s10 }
0x2cce   : > { %v7985_v52 = vpop.xlane.xlu0 %7984 }
0x2ccf   : > { %v7986_v47 = vsub.f32 %v7982_v18, %v7985_v52 }
0x2cd1   : > { %v7987_v53 = vmul.f32 1.442695, %v7986_v47 }
0x2cd2   : > { %v7997_v51 = vpop.permute.xlu0 %7996 }
0x2cd3   : > { %9824 = vpow2.f32 %v7987_v53  ;;  %9570 = vmatpush3.msra.mxu1 %v7997_v51 }
0x2cd4   : > { %9571 = vmatprep.subr.mxu1 %v10034_v0 }
0x2cd5   : > { %9572 = vmatpush3.msra.mxu1 %v7995_v57 }
0x2cd6   : > { %9576 = vmatprep.subr.mxu1 %v10034_v0  ;;  %v8083_v34 = vpop.permute.xlu0 %8082 }
0x2cda   : > { %v8079_v58 = vpop.permute.xlu0 %8078 }
0x2ce0   : > { %v9825_v49 = vpop.eup %9824 }
0x2ce1   : > { %v7989_v40 = vsel %vm7630_vm5, %v9825_v49, 0.0 }
0x2ce2   : > { %7990 = vadd.xlane.f32.xlu1 %v7989_v40 }
0x2cf3   : > { %8080 = vrot.lane.b32.xlu1 %v11090_v61, %s10038_s10  ;;  %s9961_s10 = scalar_lea.vmem %s9960_s16, 32 }
0x2cf4   : > { %p9963_p0 = scmp.lt.s32.totalorder %s9961_s10, %s9955_s18 }
0x2cf6   : > { %p9964_p5 = por %p9963_p0, %p9962_p13 }
0x2cf8   : > { %p9965_p9 = pnand %p9964_p5, %p9958_p2 }
0x2d6b   : > { %v7991_v2 = vpop.xlane.xlu1 %7990 }
0x2d6c   : > { %9826 = vrcp.f32 %v7991_v2 }
0x2d6f   : > { %v8081_v19 = vpop.permute.xlu1 %8080 }
0x2d79   : > { %v9827_v55 = vpop.eup %9826 }
0x2d7a   : > { %v7993_v56 = vmul.f32 %v9827_v55, %v9825_v49 }
0x2d7c   : > { %9574 = vmatmul.mubr.msk.f32.vlgmr.msra.gmra.mxu1 %vm333_vm1, %v7993_v56 }
0x2d7d   : > { %9577 = vmatpush3.xpose.msk.msra.mxu1 %vm407_vm3, %v8083_v34  ;;  %9580 = vmatprep.mubr.msk.f32.mxu1 %vm10035_vm0, %v10034_v0 }
0x2d7e   : > { %9578 = vmatprep.subr.mxu1 %v10034_v0 }
0x2d81   : > { %9579 = vmatpush3.xpose.msk.msra.mxu1 %vm407_vm3, %v8081_v19 }
0x2d82   : > { %9601 = vmatprep.subr.mxu1 %v10034_v0 }
0x2d84   : > { %9581 = vmatmul.mubr.msk.f32.vlgmr.msra.gmra.mxu1 %vm407_vm3, %v8079_v58 }
0x2d85   : > { %9609 = vmatprep.mubr.msk.f32.mxu1 %vm10035_vm0, %v10034_v0  ;;  %9602 = vmatpush3.msra.mxu1 %v8337_v33 }
0x2d86   : > { %9603 = vmatprep.subr.mxu1 %v10034_v0 }
0x2d87   : > { %9604 = vmatpush3.msra.mxu1 %v8336_v5 }
0x2d88   : > { %9605 = vmatprep.subr.mxu1 %v10034_v0 }
0x2d89   : > { %9606 = vmatpush3.msra.mxu1 %v8335_v35 }
0x2d8a   : > { %9607 = vmatprep.subr.mxu1 %v10034_v0 }
0x2e3c   : > { %v8069_v20 = vpop.f32.mrf.mxu1 }
0x2e3e   : > { %v9575_v39 = vpop.f32.mrf.mxu1 }
0x2e44   : > { %v8156_v59 = vpop.f32.mrf.mxu1 }
0x2e45   : > { %v8160_v22 = vmul.f32 0.17677669, %v8156_v59 }
0x2e46   : > { %v9582_v54 = vpop.f32.mrf.mxu1 }
0x2e47   : > { %v8161_v63 = vsel %vm7630_vm5, %v8160_v22, -inf }
0x2e48   : > { %8162 = vmax.xlane.f32.xlu1 %v8161_v63 }
0x2e59   : > { %8172 = vrot.lane.b32.xlu1 %v11090_v61, %s10041_s25 }
0x2e5d   : > { %7896 = vrot.lane.b32.xlu1 %v7891_v15, %s10043_s9 }
0x2ed1   : > { %v8163_v1 = vpop.xlane.xlu1 %8162 }
0x2ed2   : > { %v8164_v3 = vsub.f32 %v8160_v22, %v8163_v1 }
0x2ed4   : > { %v8165_v4 = vmul.f32 1.442695, %v8164_v3 }
0x2ed5   : > { %v8173_v61 = vpop.permute.xlu1 %8172 }
0x2ed6   : > { %9828 = vpow2.f32 %v8165_v4 }
0x2ed9   : > { %v7897_v24 = vpop.permute.xlu1 %7896 }
0x2eda   : > { %v7899_v26 = vadd.f32 %v7897_v24, %v11096_v62 }
0x2edc   : > { %v8256_v29 = vsel %vm407_vm3, %v7721_v28, %v7899_v26 }
0x2ee3   : > { %v9829_v6 = vpop.eup %9828 }
0x2ee4   : > { %v8167_v7 = vsel %vm7630_vm5, %v9829_v6, 0.0 }
0x2ee5   : > { %8168 = vadd.xlane.f32.xlu0 %v8167_v7 }
0x2efb   : > { %8174 = vrot.lane.b32.xlu0 %v11088_v60, %s10041_s25  ;;  %v7390_v60 = vld [vmem:[#allocation7 + $0x240] sm:$0xff] }
0x2eff   : > { %8074 = vrot.lane.b32.xlu0 %v8069_v20, %s10044_s17 }
0x2f6e   : > { %v8169_v8 = vpop.xlane.xlu0 %8168 }
0x2f6f   : > { %9830 = vrcp.f32 %v8169_v8 }
0x2f72   : > { %v8175_v9 = vpop.permute.xlu0 %8174 }
0x2f73   : > { %9584 = vmatpush3.msra.mxu0 %v8175_v9 }
0x2f74   : > { %9585 = vmatprep.subr.mxu0 %v10034_v0 }
0x2f75   : > { %9586 = vmatpush3.msra.mxu0 %v8173_v61 }
0x2f76   : > { %9590 = vmatprep.subr.mxu0 %v10034_v0  ;;  %v8075_v25 = vpop.permute.xlu0 %8074 }
0x2f77   : > { %v8077_v27 = vadd.f32 %v8075_v25, %v11096_v62 }
0x2f79   : > { %v8257_v31 = vsel %vm333_vm1, %v8256_v29, %v8077_v27 }
0x2f7c   : > { %v9831_v10 = vpop.eup %9830 }
0x2f7d   : > { %v8171_v37 = vmul.f32 %v9831_v10, %v9829_v6 }
0x2f7f   : > { %9588 = vmatmul.mubr.msk.f32.vlgmr.msra.gmra.mxu0 %vm333_vm1, %v8171_v37 }
0x2f80   : > { %9598 = vmatprep.mubr.msk.f32.mxu0 %vm10035_vm0, %v10034_v0  ;;  %9591 = vmatpush3.msra.mxu0 %v7390_v60 }
0x2f81   : > { %9592 = vmatprep.subr.mxu0 %v10034_v0 }
0x2f82   : > { %9593 = vmatpush3.msra.mxu0 %v7389_v11 }
0x2f83   : > { %9594 = vmatprep.subr.mxu0 %v10034_v0 }
0x2f84   : > { %9595 = vmatpush3.msra.mxu0 %v7388_v12 }
0x2f85   : > { %9596 = vmatprep.subr.mxu0 %v10034_v0 }
0x2f86   : > { %9597 = vmatpush3.msra.mxu0 %v7387_v13 }
0x303f   : > { %v8247_v21 = vpop.f32.mrf.mxu0 }
0x3040   : > { %8252 = vrot.lane.b32.xlu1 %v8247_v21, %s10045_s22 }
0x3041   : > { %v9589_v23 = vpop.f32.mrf.mxu0 }
0x30b2   : > { %v8253_v46 = vpop.permute.xlu1 %8252 }
0x30b3   : > { %v8255_v30 = vadd.f32 %v8253_v46, %v11096_v62  ;;  %v8334_v62 = vld [vmem:[#allocation7 + $0x250] sm:$0xff] }
0x30b4   : > { %9608 = vmatpush3.msra.mxu1 %v8334_v62 }
0x30b5   : > { %v8258_v32 = vsel %vm1088_vm4, %v8257_v31, %v8255_v30 }
0x30b6   : > { %9599 = vmatmul.mubr.msk.f32.vlgmr.msra.gmra.mxu0 %vm255_vm2, %v8258_v32 }
0x3176   : > { %v8328_v14 = vpop.f32.mrf.mxu0 }
0x3177   : > { %v8329_v45 = vadd.f32 %v8328_v14, %v7391_v36 }
0x3178   : > { %v9600_v41 = vpop.f32.mrf.mxu0 }
0x3179   : > { %v8332_v42 = vmax.f32 %v8329_v45, 0.0 }
0x317b   : > { %v8333_v44 = vadd.f32 %v8332_v42, %v8258_v32 }
0x317d   : > { %9610 = vmatmul.mubr.msk.f32.vlgmr.msra.gmra.mxu1 %vm255_vm2, %v8333_v44 }
0x323d   : > { %v8408_v48 = vpop.f32.mrf.mxu1 }
0x323e   : > { %v8409_v15 = vadd.f32 %v8408_v48, %v8338_v16 }
0x323f   : > { %v9611_v0 = vpop.f32.mrf.mxu1 }
0x3240   : > { %8412 = vst [vmem:[%s235_s30] sm:$0x1] %v8409_v15 }
0x3241   : > { %9968 = shalt.err (!%p9965_p9)
}
0x3242   : > { %s9969_s7 = scalar_lea.hbm %s11213_s27, 16  ;;  %s9973_s25 = scalar_lea.hbm %s11253_s3, 32 }
0x3243   : > { %p9970_p1 = scmp.ne.s32.totalorder %s11213_s27, %s9969_s7  ;;  %p9974_p7 = scmp.lt.s32.totalorder %s11213_s27, %s11253_s3 }
0x3244   : > { %p9975_p11 = scmp.lt.s32.totalorder %s9973_s25, %s9969_s7 }
0x3245   : > { %p9971_p4 = pnand %p9970_p1, %p11269_p12 }
0x3246   : > { %p9976_p8 = por %p9975_p11, %p9974_p7 }
0x3247   : > { %p9972_p6 = pneg %p9971_p4 }
0x3249   : > { %p9977_p3 = pnand %p9976_p8, %p9972_p6 }
0x324b   : > { %9980 = shalt.err (!%p9977_p3)
}
0x324c   : > { %9620 = dma.vmem_to_hbm [thread:$0]  (%p11269_p12), %s8427_s11, 16, %s11213_s27, %s8414_s20  }
0x324d PF: > { %s8438_s17 = sand.u32 1, %s10015_s12   ;;  %p11270_p10 = scmp.ne.s32.totalorder %s11259_s19, 0 }
0x324e   : > { %p11271_p2 = scmp.ge.s32.totalorder %s10027_s15, 2  ;;  %s8439_s22 = scalar_lea.sflag [#allocation4], %s8438_s17 }
0x3250   : > { %p9634_p13 = pnand %p11271_p2, %p11270_p10 }
0x3252   : > { %p9635_p0 = pneg %p9634_p13 }
0x3254   : > { %10010 = dma.done.wait (%p9635_p0), %s8439_s22, 16  }
0x3255   : > { %10012 = vsyncadd (%p9635_p0), %s8439_s22, 4294967280  ;;  %p19_p5 = scmp.ge.s32.totalorder %s10121_s24, 4   ;;  %s11272_s12 = smov %s10019_s13 }
0x3256   : > { %s11273_s13 = smov %s10023_s14  ;;  %s11274_s14 = smov %s10138_s5 }
0x3257   : > { %s11275_s15 = smov %s10121_s24  ;;  %21 = sbr.rel (!%p19_p5) target bundleno = 7 (0x7), region = 94 }
0x325c   :  { %8443 = vsyncpa [#allocation3], 1 }
0x325d   :  { %8445 = vsyncpa [#allocation3 + $0x1], 1 }
0x325e   :  { %8446 = vsyncpa [#allocation6], 1 }
0x325f   :  { %8448 = vsyncpa [#allocation6 + $0x1], 1 }
0x3260   :  { %8449 = vsyncpa [#allocation4], 1 }
0x3261   :  { %8451 = vsyncpa [#allocation4 + $0x1], 1 }

</bundles_post_ra>
